<compile_context>
chip_gen: v5e
topology: v5e:2x2
jax: 0.10.0
libtpu: 0.0.40
codegen_flags: <defaults>
</compile_context>

<pallas_src>
import math

import numpy as np

import jax
import jax.numpy as jnp
from jax.experimental import pallas as pl
from jax.experimental.pallas import tpu as pltpu

BN_EPS = 1e-5
D_IN = 4            # decoder input spatial extent (leaf_dim=8)
D_MID = 6           # after 3x3x3 full deconv
D_OUT = 8           # after 2x2x2 stride-2 deconv
K3 = 3              # deconv3 kernel size
K4 = 2              # deconv4 kernel size
C1 = 32             # deconv2 out channels
C2 = 16             # deconv3 out channels


def _elu(y):
    # ELU(alpha=1); clamp exp arg so the positive branch never overflows.
    return jnp.where(y > 0.0, y, jnp.exp(jnp.minimum(y, 0.0)) - 1.0)


# ----------------------------- fused Pallas kernel -----------------------------------

def _fused_leaf_decoder_kernel(x2_ref, w2_ref, g2_ref, b2_ref,
                               w3x_ref, g3_ref, b3_ref, w4_ref,
                               o_ref, t3s_ref, h2s_ref):
    # x2:(B*16, 4*C0) bf16  rows=(b,d,h), lanes=(w,c0)
    # w2:(4*C0, 128) bf16   block-diagonal over w -> lanes (w,c1)
    # w3x:(128, 864) bf16   rows=(w_in,c1), cols=(kd,kh,ow,c2)  (x-tap folded in)
    # w4:(64, 32*c3) bf16   rows=(iw,c2),   cols=(pd,ph,OW,c3)  (stride-2 parities)
    # o:(B*16, 32*c3) f32   rows=(b,id,ih), cols=(pd,ph,OW,c3)
    m = x2_ref.shape[0]            # B * 16
    bsz = m // 16
    n1 = float(bsz * 64)           # voxels feeding bn2 stats
    n2 = float(bsz * 216)          # voxels feeding bn3 stats

    # -------- stage 1: deconv2 (1x1x1 == channel matmul) + bn2 + ELU ----------------
    h1 = jnp.dot(x2_ref[...], w2_ref[...], preferred_element_type=jnp.float32)  # (m,128)
    s1 = jnp.sum(h1, axis=0, keepdims=True)                       # (1,128)
    q1 = jnp.sum(h1 * h1, axis=0, keepdims=True)
    s1c = s1[:, 0:32] + s1[:, 32:64] + s1[:, 64:96] + s1[:, 96:128]   # fold w groups
    q1c = q1[:, 0:32] + q1[:, 32:64] + q1[:, 64:96] + q1[:, 96:128]
    mean1 = s1c / n1
    var1 = q1c / n1 - mean1 * mean1
    scale1 = g2_ref[...] * jax.lax.rsqrt(var1 + BN_EPS)           # (1,32)
    bias1 = b2_ref[...] - mean1 * scale1
    scale1 = jnp.concatenate([scale1] * 4, axis=1)                 # tile over w -> (1,128)
    bias1 = jnp.concatenate([bias1] * 4, axis=1)
    a1 = _elu(h1 * scale1 + bias1).astype(jnp.bfloat16)            # (m,128) lane-dense

    # -------- stage 2: deconv3 (k=3 full deconv) as x-folded tap matmul --------------
    # cols ordered (kd, kh, ow, c2): each (kd,kh) tap owns a contiguous 96-lane block.
    t3 = jnp.dot(a1, w3x_ref[...], preferred_element_type=jnp.float32)   # (m,864)

    # unpack rows (b,d,h) into a 4D scratch so the (d,h)->(od,oh) col2im is slab adds
    for b in range(bsz):
        for d in range(4):
            r0 = b * 16 + d * 4
            t3s_ref[b, d] = t3[r0:r0 + 4, :]

    # col2im over (d,h): h2[b, d+kd, h+kh, (ow,c2)] += t3[b, d, h, (kd,kh,ow,c2)]
    h2s_ref[...] = jnp.zeros_like(h2s_ref)
    for kd in range(K3):
        for kh in range(K3):
            c0 = kd * (K3 * D_MID * C2) + kh * (D_MID * C2)
            cur = h2s_ref[:, pl.ds(kd, 4), pl.ds(kh, 4), :]
            h2s_ref[:, pl.ds(kd, 4), pl.ds(kh, 4), :] = (
                cur + t3s_ref[:, :, :, pl.ds(c0, D_MID * C2)])

    # -------- bn3 statistics over the full 6^3 grid (one-pass) -----------------------
    h2 = h2s_ref[...]                                              # (B,6,6,96)
    s2 = jnp.sum(jnp.sum(h2, axis=0), axis=0)                      # (6,96)
    q2 = jnp.sum(jnp.sum(h2 * h2, axis=0), axis=0)
    s2 = jnp.sum(s2, axis=0, keepdims=True)                        # (1,96)
    q2 = jnp.sum(q2, axis=0, keepdims=True)
    s2c = (s2[:, 0:16] + s2[:, 16:32] + s2[:, 32:48]
           + s2[:, 48:64] + s2[:, 64:80] + s2[:, 80:96])           # (1,16)
    q2c = (q2[:, 0:16] + q2[:, 16:32] + q2[:, 32:48]
           + q2[:, 48:64] + q2[:, 64:80] + q2[:, 80:96])
    mean2 = s2c / n2
    var2 = q2c / n2 - mean2 * mean2
    scale2 = g3_ref[...] * jax.lax.rsqrt(var2 + BN_EPS)            # (1,16)
    bias2 = b3_ref[...] - mean2 * scale2
    scale2 = jnp.concatenate([scale2] * 4, axis=1)                 # (1,64) (ow = 1..4)
    bias2 = jnp.concatenate([bias2] * 4, axis=1)

    # -------- stage 3: deconv4 (k=2,s=2,p=2 -> parity matmul) + sigmoid + clamp ------
    # only the inner 4^3 (od,oh,ow in 1..4) of the 6^3 grid reaches the 8^3 output.
    chunks = []
    for b in range(bsz):
        for d in range(4):
            chunks.append(h2s_ref[b, 1 + d, pl.ds(1, 4), pl.ds(C2, 4 * C2)])
    h2in = jnp.concatenate(chunks, axis=0)                         # (m,64) rows=(b,id,ih)
    a2 = _elu(h2in * scale2 + bias2).astype(jnp.bfloat16)

    z = jnp.dot(a2, w4_ref[...], preferred_element_type=jnp.float32)    # (m, 32*c3)
    ez = jnp.exp(-jnp.abs(z))                                      # no transient inf
    sig = jnp.where(z >= 0.0, 1.0 / (1.0 + ez), ez / (1.0 + ez))
    o_ref[...] = jnp.clip(sig, 1e-7, 1.0 - 1e-7)


# ----------------------------- pallas_call wrapper -----------------------------------

def _call_fused(x2, w2blk, g2, b2, w3x, g3, b3, w4all):
    m = x2.shape[0]
    bsz = m // 16
    n_out = w4all.shape[1]
    flops = 2 * m * 256 * 128 + 2 * m * 128 * 864 + 2 * m * 64 * n_out
    cost = pl.CostEstimate(
        flops=flops,
        transcendentals=m * 128 + m * 64 + m * n_out + 64,
        bytes_accessed=(m * 256 * 2 + 256 * 128 * 2 + 128 * 864 * 2
                        + 64 * n_out * 2 + m * n_out * 4 + 4 * (32 + 32 + 16 + 16)))

    def full(shape):
        return pl.BlockSpec(shape, lambda i, _s=shape: tuple(0 for _ in _s))

    return pl.pallas_call(
        _fused_leaf_decoder_kernel,
        out_shape=jax.ShapeDtypeStruct((m, n_out), jnp.float32),
        grid=(1,),
        in_specs=[full(x2.shape), full(w2blk.shape), full(g2.shape), full(b2.shape),
                  full(w3x.shape), full(g3.shape), full(b3.shape), full(w4all.shape)],
        out_specs=full((m, n_out)),
        scratch_shapes=[pltpu.VMEM((bsz, 4, 4, K3 * K3 * D_MID * C2), jnp.float32),
                        pltpu.VMEM((bsz, D_MID, D_MID, D_MID * C2), jnp.float32)],
        compiler_params=pltpu.CompilerParams(dimension_semantics=("arbitrary",)),
        cost_estimate=cost,
    )(x2, w2blk, g2, b2, w3x, g3, b3, w4all)


# ----------------------------- forward pass ------------------------------------------

def leaf_decoder_forward(x, params):
    """x: (B, node_ch, 4, 4, 4) f32 -> (B, voxel_ch+1, 8, 8, 8) f32 (NCDHW)."""
    b, c0 = x.shape[0], x.shape[1]
    c3 = params["w4all"].shape[1] // (4 * D_OUT)

    # input layout plumbing: NCDHW -> rows (b,d,h), lanes (w, c0); one tiny XLA
    # transpose+cast kept in the wrapper (see header note).
    x2 = (jnp.transpose(x, (0, 2, 3, 4, 1))
          .reshape(b * 16, 4 * c0).astype(jnp.bfloat16))

    y = _call_fused(x2, params["w2blk"], params["bn2_g"], params["bn2_b"],
                    params["w3x"], params["bn3_g"], params["bn3_b"],
                    params["w4all"])                               # (B*16, 32*c3)

    # sub-pixel reassembly of the in-kernel parity-major deconv4 columns (4 KB permute)
    y = y.reshape(b, 4, 4, 2, 2, D_OUT, c3)
    out = jnp.transpose(y, (0, 6, 1, 3, 2, 4, 5)).reshape(b, c3, D_OUT, D_OUT, D_OUT)
    return out


# ----------------------------- parameter init ----------------------------------------

def init_params(key, node_channels=64, voxel_channels=0):
    """Matches _LeafDecoder(leaf_dim=8) init: xavier_uniform(gain=sqrt(2)) deconv weights
    (bias=False) and BatchNorm affine = (1, 0).  Returns
      params: spatially-folded, pre-cast bf16 matmul weights + f32 BN params
      raw:    the f32 (bf16-representable) ConvTranspose3d weights in PyTorch layout,
              used by the independent plain-JAX reference."""
    c0, c3 = node_channels, voxel_channels + 1
    k2, k3, k4 = jax.random.split(key, 3)

    def xavier(k, shape):
        # ConvTranspose3d weight (in_ch, out_ch, kd, kh, kw):
        #   fan_in = out_ch * receptive, fan_out = in_ch * receptive
        rec = shape[2] * shape[3] * shape[4]
        fan_in, fan_out = shape[1] * rec, shape[0] * rec
        bound = math.sqrt(2.0) * math.sqrt(6.0 / (fan_in + fan_out))
        w = jax.random.uniform(k, shape, minval=-bound, maxval=bound, dtype=jnp.float32)
        # round once to bf16 so kernel (bf16 storage) and reference (f32 math) use the
        # exact same weight values
        return w.astype(jnp.bfloat16).astype(jnp.float32)

    w2 = xavier(k2, (c0, C1, 1, 1, 1))
    w3 = xavier(k3, (C1, C2, K3, K3, K3))
    w4 = xavier(k4, (C2, c3, K4, K4, K4))

    # ---- fold spatial structure into dense matmul weights (once, at init) -----------
    w2_np = np.asarray(w2).reshape(c0, C1)
    w3_np = np.asarray(w3)
    w4_np = np.asarray(w4)

    # deconv2 (1x1x1): block-diagonal over the lane-resident w position
    #   rows (w, c0), cols (w, c1)
    w2blk = np.kron(np.eye(4, dtype=np.float32), w2_np)                 # (4*c0, 128)

    # deconv3 (k=3 full deconv): fold the x-direction tap into the weight
    #   rows (w_in, c1), cols (kd, kh, ow, c2) with ow = w_in + kw
    w3x = np.zeros((4 * C1, K3 * K3 * D_MID * C2), np.float32)          # (128, 864)
    for w_in in range(4):
        for kw in range(K3):
            ow = w_in + kw
            for kd in range(K3):
                for kh in range(K3):
                    col = kd * (K3 * D_MID * C2) + kh * (D_MID * C2) + ow * C2
                    w3x[w_in * C1:(w_in + 1) * C1, col:col + C2] = w3_np[:, :, kd, kh, kw]

    # deconv4 (k=2, s=2, p=2): stride == kernel -> no tap overlap; output voxel
    # (OD,OH,OW) = (2*id+pd, 2*ih+ph, 2*iw+pw) with inner input voxels only.
    #   rows (iw, c2), cols (pd, ph, OW, c3)
    w4all = np.zeros((4 * C2, K4 * K4 * D_OUT * c3), np.float32)        # (64, 32*c3)
    for iw in range(4):
        for pw in range(K4):
            ow = 2 * iw + pw
            for pd in range(K4):
                for ph in range(K4):
                    col = pd * (K4 * D_OUT * c3) + ph * (D_OUT * c3) + ow * c3
                    w4all[iw * C2:(iw + 1) * C2, col:col + c3] = w4_np[:, :, pd, ph, pw]

    params = dict(
        w2blk=jnp.asarray(w2blk, jnp.bfloat16),
        w3x=jnp.asarray(w3x, jnp.bfloat16),
        w4all=jnp.asarray(w4all, jnp.bfloat16),
        bn2_g=jnp.ones((1, C1), jnp.float32), bn2_b=jnp.zeros((1, C1), jnp.float32),
        bn3_g=jnp.ones((1, C2), jnp.float32), bn3_b=jnp.zeros((1, C2), jnp.float32))
    raw = dict(w2=w2, w3=w3, w4=w4)
    return params, raw


# ----------------------------- plain-JAX reference -----------------------------------

def _conv_transpose3d_ref(x, w, stride, padding):
    # x: (B, Ci, D, D, D) f32, w: (Ci, Co, k, k, k) f32 (PyTorch ConvTranspose3d layout)
    b, d = x.shape[0], x.shape[2]
    co, k = w.shape[1], w.shape[2]
    s, p = stride, padding
    full = (d - 1) * s + k
    out_d = full - 2 * p
    big = jnp.zeros((b, co, full, full, full), jnp.float32)
    for kd in range(k):
        for kh in range(k):
            for kw in range(k):
                contrib = jnp.einsum('bidhw,io->bodhw', x, w[:, :, kd, kh, kw])
                big = big.at[:, :,
                             kd:kd + (d - 1) * s + 1:s,
                             kh:kh + (d - 1) * s + 1:s,
                             kw:kw + (d - 1) * s + 1:s].add(contrib)
    return big[:, :, p:p + out_d, p:p + out_d, p:p + out_d]


def _bn_ref(h):
    mu = jnp.mean(h, axis=(0, 2, 3, 4), keepdims=True)
    var = jnp.mean(jnp.square(h - mu), axis=(0, 2, 3, 4), keepdims=True)
    return (h - mu) * jax.lax.rsqrt(var + BN_EPS)     # gamma=1, beta=0


def leaf_decoder_reference(x, raw):
    # mirrors the kernel path's bf16 casts of matmul inputs so the check is tight
    q = lambda t: t.astype(jnp.bfloat16).astype(jnp.float32)
    h = _conv_transpose3d_ref(q(x), raw["w2"], 1, 0)
    h = _elu(_bn_ref(h))
    h = _conv_transpose3d_ref(q(h), raw["w3"], 1, 0)
    h = _elu(_bn_ref(h))
    h = _conv_transpose3d_ref(q(h), raw["w4"], 2, 2)
    s = 1.0 / (1.0 + jnp.exp(-h))
    return jnp.clip(s, 1e-7, 1.0 - 1e-7)


# ----------------------------- self-test ----------------------------------------------

if __name__ == "__main__":
    B = 2
    node_channels = 64       # module default
    voxel_channels = 0       # module default -> 1 output channel

    key = jax.random.PRNGKey(0)
    kx, kp = jax.random.split(key)
    x = jax.random.normal(kx, (B, node_channels, D_IN, D_IN, D_IN), dtype=jnp.float32)
    params, raw = init_params(kp, node_channels, voxel_channels)

    fwd = jax.jit(leaf_decoder_forward)
    out = jax.block_until_ready(fwd(x, params))

    ref = leaf_decoder_reference(x, raw)
    assert out.shape == (B, voxel_channels + 1, D_OUT, D_OUT, D_OUT)
    assert bool(jnp.all(jnp.isfinite(out)))
    max_err = float(jnp.max(jnp.abs(out - ref)))
    assert jnp.allclose(out, ref, atol=5e-3, rtol=1e-3), f"max |err| = {max_err}"

    print("KERNEL_OK")
</pallas_src>

<mosaic_0001>
module attributes {stable_mosaic.version = 11 : i64} {
  func.func @_fused_leaf_decoder_kernel(%arg0: i32, %arg1: memref<32x256xbf16, #tpu.memory_space<vmem>>, %arg2: memref<256x128xbf16, #tpu.memory_space<vmem>>, %arg3: memref<1x32xf32, #tpu.memory_space<vmem>>, %arg4: memref<1x32xf32, #tpu.memory_space<vmem>>, %arg5: memref<128x864xbf16, #tpu.memory_space<vmem>>, %arg6: memref<1x16xf32, #tpu.memory_space<vmem>>, %arg7: memref<1x16xf32, #tpu.memory_space<vmem>>, %arg8: memref<64x32xbf16, #tpu.memory_space<vmem>>, %arg9: memref<32x32xf32, #tpu.memory_space<vmem>>, %arg10: memref<2x4x4x864xf32, #tpu.memory_space<vmem>>, %arg11: memref<2x6x6x96xf32, #tpu.memory_space<vmem>>) attributes {dimension_semantics = [#tpu.dimension_semantics<arbitrary>], iteration_bounds = array<i64: 1>, scalar_prefetch = 0 : i64, scratch_operands = 2 : i64, tpu.core_type = #tpu.core_type<tc>, window_params = [{pipeline_mode = #tpu.pipeline_mode<synchronous>, transform_indices = @transform_0, window_bounds = array<i64: 32, 256>}, {pipeline_mode = #tpu.pipeline_mode<synchronous>, transform_indices = @transform_1, window_bounds = array<i64: 256, 128>}, {pipeline_mode = #tpu.pipeline_mode<synchronous>, transform_indices = @transform_2, window_bounds = array<i64: 1, 32>}, {pipeline_mode = #tpu.pipeline_mode<synchronous>, transform_indices = @transform_3, window_bounds = array<i64: 1, 32>}, {pipeline_mode = #tpu.pipeline_mode<synchronous>, transform_indices = @transform_4, window_bounds = array<i64: 128, 864>}, {pipeline_mode = #tpu.pipeline_mode<synchronous>, transform_indices = @transform_5, window_bounds = array<i64: 1, 16>}, {pipeline_mode = #tpu.pipeline_mode<synchronous>, transform_indices = @transform_6, window_bounds = array<i64: 1, 16>}, {pipeline_mode = #tpu.pipeline_mode<synchronous>, transform_indices = @transform_7, window_bounds = array<i64: 64, 32>}, {pipeline_mode = #tpu.pipeline_mode<synchronous>, transform_indices = @transform_8, window_bounds = array<i64: 32, 32>}]} {
    %c0 = arith.constant 0 : index
    %c0_0 = arith.constant 0 : index
    %0 = vector.load %arg1[%c0, %c0_0] : memref<32x256xbf16, #tpu.memory_space<vmem>>, vector<32x256xbf16>
    %c0_1 = arith.constant 0 : index
    %c0_2 = arith.constant 0 : index
    %1 = vector.load %arg2[%c0_1, %c0_2] : memref<256x128xbf16, #tpu.memory_space<vmem>>, vector<256x128xbf16>
    %cst = arith.constant dense<0.000000e+00> : vector<32x128xf32>
    %2 = tpu.matmul %0, %1, %cst {dimension_numbers = #tpu.dot_dimension_numbers<[1], [0], [0], [1], [0, 0, 1, 1], [], []>} : vector<32x256xbf16>, vector<256x128xbf16>, vector<32x128xf32> -> vector<32x128xf32>
    %cst_3 = arith.constant dense<0.000000e+00> : vector<128xf32>
    %3 = vector.multi_reduction <add>, %2, %cst_3 [0] : vector<32x128xf32> to vector<128xf32>
    %4 = vector.shape_cast %3 : vector<128xf32> to vector<1x128xf32>
    %5 = arith.mulf %2, %2 : vector<32x128xf32>
    %cst_4 = arith.constant dense<0.000000e+00> : vector<128xf32>
    %6 = vector.multi_reduction <add>, %5, %cst_4 [0] : vector<32x128xf32> to vector<128xf32>
    %7 = vector.shape_cast %6 : vector<128xf32> to vector<1x128xf32>
    %8 = vector.extract_strided_slice %4 {offsets = [0, 0], sizes = [1, 32], strides = [1, 1]} : vector<1x128xf32> to vector<1x32xf32>
    %9 = vector.extract_strided_slice %4 {offsets = [0, 32], sizes = [1, 32], strides = [1, 1]} : vector<1x128xf32> to vector<1x32xf32>
    %10 = arith.addf %8, %9 : vector<1x32xf32>
    %11 = vector.extract_strided_slice %4 {offsets = [0, 64], sizes = [1, 32], strides = [1, 1]} : vector<1x128xf32> to vector<1x32xf32>
    %12 = arith.addf %10, %11 : vector<1x32xf32>
    %13 = vector.extract_strided_slice %4 {offsets = [0, 96], sizes = [1, 32], strides = [1, 1]} : vector<1x128xf32> to vector<1x32xf32>
    %14 = arith.addf %12, %13 : vector<1x32xf32>
    %15 = vector.extract_strided_slice %7 {offsets = [0, 0], sizes = [1, 32], strides = [1, 1]} : vector<1x128xf32> to vector<1x32xf32>
    %16 = vector.extract_strided_slice %7 {offsets = [0, 32], sizes = [1, 32], strides = [1, 1]} : vector<1x128xf32> to vector<1x32xf32>
    %17 = arith.addf %15, %16 : vector<1x32xf32>
    %18 = vector.extract_strided_slice %7 {offsets = [0, 64], sizes = [1, 32], strides = [1, 1]} : vector<1x128xf32> to vector<1x32xf32>
    %19 = arith.addf %17, %18 : vector<1x32xf32>
    %20 = vector.extract_strided_slice %7 {offsets = [0, 96], sizes = [1, 32], strides = [1, 1]} : vector<1x128xf32> to vector<1x32xf32>
    %21 = arith.addf %19, %20 : vector<1x32xf32>
    %cst_5 = arith.constant 1.280000e+02 : f32
    %22 = vector.broadcast %cst_5 : f32 to vector<1x32xf32>
    %23 = arith.divf %14, %22 : vector<1x32xf32>
    %cst_6 = arith.constant 1.280000e+02 : f32
    %24 = vector.broadcast %cst_6 : f32 to vector<1x32xf32>
    %25 = arith.divf %21, %24 : vector<1x32xf32>
    %26 = arith.mulf %23, %23 : vector<1x32xf32>
    %27 = arith.subf %25, %26 : vector<1x32xf32>
    %c0_7 = arith.constant 0 : index
    %c0_8 = arith.constant 0 : index
    %28 = vector.load %arg3[%c0_7, %c0_8] : memref<1x32xf32, #tpu.memory_space<vmem>>, vector<1x32xf32>
    %cst_9 = arith.constant 9.99999974E-6 : f32
    %29 = vector.broadcast %cst_9 : f32 to vector<1x32xf32>
    %30 = arith.addf %27, %29 : vector<1x32xf32>
    %31 = math.rsqrt %30 : vector<1x32xf32>
    %32 = arith.mulf %28, %31 : vector<1x32xf32>
    %c0_10 = arith.constant 0 : index
    %c0_11 = arith.constant 0 : index
    %33 = vector.load %arg4[%c0_10, %c0_11] : memref<1x32xf32, #tpu.memory_space<vmem>>, vector<1x32xf32>
    %34 = arith.mulf %23, %32 : vector<1x32xf32>
    %35 = arith.subf %33, %34 : vector<1x32xf32>
    %36 = tpu.concatenate %32, %32, %32, %32 in 1 : vector<1x32xf32>, vector<1x32xf32>, vector<1x32xf32>, vector<1x32xf32> -> vector<1x128xf32>
    %37 = tpu.concatenate %35, %35, %35, %35 in 1 : vector<1x32xf32>, vector<1x32xf32>, vector<1x32xf32>, vector<1x32xf32> -> vector<1x128xf32>
    %38 = vector.broadcast %36 : vector<1x128xf32> to vector<32x128xf32>
    %39 = arith.mulf %2, %38 : vector<32x128xf32>
    %40 = vector.broadcast %37 : vector<1x128xf32> to vector<32x128xf32>
    %41 = arith.addf %39, %40 : vector<32x128xf32>
    %cst_12 = arith.constant 0.000000e+00 : f32
    %42 = vector.broadcast %cst_12 : f32 to vector<32x128xf32>
    %43 = arith.cmpf ogt, %41, %42 : vector<32x128xf32>
    %cst_13 = arith.constant 0.000000e+00 : f32
    %44 = vector.broadcast %cst_13 : f32 to vector<32x128xf32>
    %45 = arith.minimumf %41, %44 : vector<32x128xf32>
    %46 = math.exp %45 : vector<32x128xf32>
    %cst_14 = arith.constant 1.000000e+00 : f32
    %47 = vector.broadcast %cst_14 : f32 to vector<32x128xf32>
    %48 = arith.subf %46, %47 : vector<32x128xf32>
    %49 = arith.select %43, %41, %48 : vector<32x128xi1>, vector<32x128xf32>
    %50 = arith.truncf %49 : vector<32x128xf32> to vector<32x128xbf16>
    %c0_15 = arith.constant 0 : index
    %c0_16 = arith.constant 0 : index
    %51 = vector.load %arg5[%c0_15, %c0_16] : memref<128x864xbf16, #tpu.memory_space<vmem>>, vector<128x864xbf16>
    %cst_17 = arith.constant dense<0.000000e+00> : vector<32x864xf32>
    %52 = tpu.matmul %50, %51, %cst_17 {dimension_numbers = #tpu.dot_dimension_numbers<[1], [0], [0], [1], [0, 0, 1, 1], [], []>} : vector<32x128xbf16>, vector<128x864xbf16>, vector<32x864xf32> -> vector<32x864xf32>
    %53 = vector.extract_strided_slice %52 {offsets = [0, 0], sizes = [4, 864], strides = [1, 1]} : vector<32x864xf32> to vector<4x864xf32>
    %c0_18 = arith.constant 0 : index
    %c0_19 = arith.constant 0 : index
    %c0_20 = arith.constant 0 : index
    %c0_21 = arith.constant 0 : index
    %54 = vector.load %arg10[%c0_18, %c0_19, %c0_20, %c0_21] : memref<2x4x4x864xf32, #tpu.memory_space<vmem>>, vector<1x1x4x864xf32>
    %55 = vector.shape_cast %54 : vector<1x1x4x864xf32> to vector<4x864xf32>
    %56 = vector.shape_cast %53 : vector<4x864xf32> to vector<1x1x4x864xf32>
    tpu.vector_store %arg10[%c0_18, %c0_19, %c0_20, %c0_21], %56 {strides = array<i32>} : memref<2x4x4x864xf32, #tpu.memory_space<vmem>>, vector<1x1x4x864xf32>,
    %57 = vector.extract_strided_slice %52 {offsets = [4, 0], sizes = [4, 864], strides = [1, 1]} : vector<32x864xf32> to vector<4x864xf32>
    %c0_22 = arith.constant 0 : index
    %c1 = arith.constant 1 : index
    %c0_23 = arith.constant 0 : index
    %c0_24 = arith.constant 0 : index
    %58 = vector.load %arg10[%c0_22, %c1, %c0_23, %c0_24] : memref<2x4x4x864xf32, #tpu.memory_space<vmem>>, vector<1x1x4x864xf32>
    %59 = vector.shape_cast %58 : vector<1x1x4x864xf32> to vector<4x864xf32>
    %60 = vector.shape_cast %57 : vector<4x864xf32> to vector<1x1x4x864xf32>
    tpu.vector_store %arg10[%c0_22, %c1, %c0_23, %c0_24], %60 {strides = array<i32>} : memref<2x4x4x864xf32, #tpu.memory_space<vmem>>, vector<1x1x4x864xf32>,
    %61 = vector.extract_strided_slice %52 {offsets = [8, 0], sizes = [4, 864], strides = [1, 1]} : vector<32x864xf32> to vector<4x864xf32>
    %c0_25 = arith.constant 0 : index
    %c2 = arith.constant 2 : index
    %c0_26 = arith.constant 0 : index
    %c0_27 = arith.constant 0 : index
    %62 = vector.load %arg10[%c0_25, %c2, %c0_26, %c0_27] : memref<2x4x4x864xf32, #tpu.memory_space<vmem>>, vector<1x1x4x864xf32>
    %63 = vector.shape_cast %62 : vector<1x1x4x864xf32> to vector<4x864xf32>
    %64 = vector.shape_cast %61 : vector<4x864xf32> to vector<1x1x4x864xf32>
    tpu.vector_store %arg10[%c0_25, %c2, %c0_26, %c0_27], %64 {strides = array<i32>} : memref<2x4x4x864xf32, #tpu.memory_space<vmem>>, vector<1x1x4x864xf32>,
    %65 = vector.extract_strided_slice %52 {offsets = [12, 0], sizes = [4, 864], strides = [1, 1]} : vector<32x864xf32> to vector<4x864xf32>
    %c0_28 = arith.constant 0 : index
    %c3 = arith.constant 3 : index
    %c0_29 = arith.constant 0 : index
    %c0_30 = arith.constant 0 : index
    %66 = vector.load %arg10[%c0_28, %c3, %c0_29, %c0_30] : memref<2x4x4x864xf32, #tpu.memory_space<vmem>>, vector<1x1x4x864xf32>
    %67 = vector.shape_cast %66 : vector<1x1x4x864xf32> to vector<4x864xf32>
    %68 = vector.shape_cast %65 : vector<4x864xf32> to vector<1x1x4x864xf32>
    tpu.vector_store %arg10[%c0_28, %c3, %c0_29, %c0_30], %68 {strides = array<i32>} : memref<2x4x4x864xf32, #tpu.memory_space<vmem>>, vector<1x1x4x864xf32>,
    %69 = vector.extract_strided_slice %52 {offsets = [16, 0], sizes = [4, 864], strides = [1, 1]} : vector<32x864xf32> to vector<4x864xf32>
    %c1_31 = arith.constant 1 : index
    %c0_32 = arith.constant 0 : index
    %c0_33 = arith.constant 0 : index
    %c0_34 = arith.constant 0 : index
    %70 = vector.load %arg10[%c1_31, %c0_32, %c0_33, %c0_34] : memref<2x4x4x864xf32, #tpu.memory_space<vmem>>, vector<1x1x4x864xf32>
    %71 = vector.shape_cast %70 : vector<1x1x4x864xf32> to vector<4x864xf32>
    %72 = vector.shape_cast %69 : vector<4x864xf32> to vector<1x1x4x864xf32>
    tpu.vector_store %arg10[%c1_31, %c0_32, %c0_33, %c0_34], %72 {strides = array<i32>} : memref<2x4x4x864xf32, #tpu.memory_space<vmem>>, vector<1x1x4x864xf32>,
    %73 = vector.extract_strided_slice %52 {offsets = [20, 0], sizes = [4, 864], strides = [1, 1]} : vector<32x864xf32> to vector<4x864xf32>
    %c1_35 = arith.constant 1 : index
    %c1_36 = arith.constant 1 : index
    %c0_37 = arith.constant 0 : index
    %c0_38 = arith.constant 0 : index
    %74 = vector.load %arg10[%c1_35, %c1_36, %c0_37, %c0_38] : memref<2x4x4x864xf32, #tpu.memory_space<vmem>>, vector<1x1x4x864xf32>
    %75 = vector.shape_cast %74 : vector<1x1x4x864xf32> to vector<4x864xf32>
    %76 = vector.shape_cast %73 : vector<4x864xf32> to vector<1x1x4x864xf32>
    tpu.vector_store %arg10[%c1_35, %c1_36, %c0_37, %c0_38], %76 {strides = array<i32>} : memref<2x4x4x864xf32, #tpu.memory_space<vmem>>, vector<1x1x4x864xf32>,
    %77 = vector.extract_strided_slice %52 {offsets = [24, 0], sizes = [4, 864], strides = [1, 1]} : vector<32x864xf32> to vector<4x864xf32>
    %c1_39 = arith.constant 1 : index
    %c2_40 = arith.constant 2 : index
    %c0_41 = arith.constant 0 : index
    %c0_42 = arith.constant 0 : index
    %78 = vector.load %arg10[%c1_39, %c2_40, %c0_41, %c0_42] : memref<2x4x4x864xf32, #tpu.memory_space<vmem>>, vector<1x1x4x864xf32>
    %79 = vector.shape_cast %78 : vector<1x1x4x864xf32> to vector<4x864xf32>
    %80 = vector.shape_cast %77 : vector<4x864xf32> to vector<1x1x4x864xf32>
    tpu.vector_store %arg10[%c1_39, %c2_40, %c0_41, %c0_42], %80 {strides = array<i32>} : memref<2x4x4x864xf32, #tpu.memory_space<vmem>>, vector<1x1x4x864xf32>,
    %81 = vector.extract_strided_slice %52 {offsets = [28, 0], sizes = [4, 864], strides = [1, 1]} : vector<32x864xf32> to vector<4x864xf32>
    %c1_43 = arith.constant 1 : index
    %c3_44 = arith.constant 3 : index
    %c0_45 = arith.constant 0 : index
    %c0_46 = arith.constant 0 : index
    %82 = vector.load %arg10[%c1_43, %c3_44, %c0_45, %c0_46] : memref<2x4x4x864xf32, #tpu.memory_space<vmem>>, vector<1x1x4x864xf32>
    %83 = vector.shape_cast %82 : vector<1x1x4x864xf32> to vector<4x864xf32>
    %84 = vector.shape_cast %81 : vector<4x864xf32> to vector<1x1x4x864xf32>
    tpu.vector_store %arg10[%c1_43, %c3_44, %c0_45, %c0_46], %84 {strides = array<i32>} : memref<2x4x4x864xf32, #tpu.memory_space<vmem>>, vector<1x1x4x864xf32>,
    %cst_47 = arith.constant 0.000000e+00 : f32
    %85 = vector.broadcast %cst_47 : f32 to vector<2x6x6x96xf32>
    %c0_48 = arith.constant 0 : index
    %c0_49 = arith.constant 0 : index
    %c0_50 = arith.constant 0 : index
    %c0_51 = arith.constant 0 : index
    %86 = vector.load %arg11[%c0_48, %c0_49, %c0_50, %c0_51] : memref<2x6x6x96xf32, #tpu.memory_space<vmem>>, vector<2x6x6x96xf32>
    tpu.vector_store %arg11[%c0_48, %c0_49, %c0_50, %c0_51], %85 {strides = array<i32>} : memref<2x6x6x96xf32, #tpu.memory_space<vmem>>, vector<2x6x6x96xf32>,
    %c0_52 = arith.constant 0 : index
    %c0_53 = arith.constant 0 : index
    %c0_54 = arith.constant 0 : index
    %c0_55 = arith.constant 0 : index
    %87 = vector.load %arg11[%c0_52, %c0_53, %c0_54, %c0_55] : memref<2x6x6x96xf32, #tpu.memory_space<vmem>>, vector<2x4x4x96xf32>
    %c0_56 = arith.constant 0 : index
    %c0_57 = arith.constant 0 : index
    %c0_58 = arith.constant 0 : index
    %c0_59 = arith.constant 0 : index
    %88 = vector.load %arg10[%c0_56, %c0_57, %c0_58, %c0_59] : memref<2x4x4x864xf32, #tpu.memory_space<vmem>>, vector<2x4x4x96xf32>
    %89 = arith.addf %87, %88 : vector<2x4x4x96xf32>
    %c0_60 = arith.constant 0 : index
    %c0_61 = arith.constant 0 : index
    %c0_62 = arith.constant 0 : index
    %c0_63 = arith.constant 0 : index
    %90 = vector.load %arg11[%c0_60, %c0_61, %c0_62, %c0_63] : memref<2x6x6x96xf32, #tpu.memory_space<vmem>>, vector<2x4x4x96xf32>
    tpu.vector_store %arg11[%c0_60, %c0_61, %c0_62, %c0_63], %89 {strides = array<i32>} : memref<2x6x6x96xf32, #tpu.memory_space<vmem>>, vector<2x4x4x96xf32>,
    %c0_64 = arith.constant 0 : index
    %c0_65 = arith.constant 0 : index
    %c1_66 = arith.constant 1 : index
    %c0_67 = arith.constant 0 : index
    %91 = vector.load %arg11[%c0_64, %c0_65, %c1_66, %c0_67] : memref<2x6x6x96xf32, #tpu.memory_space<vmem>>, vector<2x4x4x96xf32>
    %c0_68 = arith.constant 0 : index
    %c0_69 = arith.constant 0 : index
    %c0_70 = arith.constant 0 : index
    %c96 = arith.constant 96 : index
    %92 = vector.load %arg10[%c0_68, %c0_69, %c0_70, %c96] : memref<2x4x4x864xf32, #tpu.memory_space<vmem>>, vector<2x4x4x96xf32>
    %93 = arith.addf %91, %92 : vector<2x4x4x96xf32>
    %c0_71 = arith.constant 0 : index
    %c0_72 = arith.constant 0 : index
    %c1_73 = arith.constant 1 : index
    %c0_74 = arith.constant 0 : index
    %94 = vector.load %arg11[%c0_71, %c0_72, %c1_73, %c0_74] : memref<2x6x6x96xf32, #tpu.memory_space<vmem>>, vector<2x4x4x96xf32>
    tpu.vector_store %arg11[%c0_71, %c0_72, %c1_73, %c0_74], %93 {strides = array<i32>} : memref<2x6x6x96xf32, #tpu.memory_space<vmem>>, vector<2x4x4x96xf32>,
    %c0_75 = arith.constant 0 : index
    %c0_76 = arith.constant 0 : index
    %c2_77 = arith.constant 2 : index
    %c0_78 = arith.constant 0 : index
    %95 = vector.load %arg11[%c0_75, %c0_76, %c2_77, %c0_78] : memref<2x6x6x96xf32, #tpu.memory_space<vmem>>, vector<2x4x4x96xf32>
    %c0_79 = arith.constant 0 : index
    %c0_80 = arith.constant 0 : index
    %c0_81 = arith.constant 0 : index
    %c192 = arith.constant 192 : index
    %96 = vector.load %arg10[%c0_79, %c0_80, %c0_81, %c192] : memref<2x4x4x864xf32, #tpu.memory_space<vmem>>, vector<2x4x4x96xf32>
    %97 = arith.addf %95, %96 : vector<2x4x4x96xf32>
    %c0_82 = arith.constant 0 : index
    %c0_83 = arith.constant 0 : index
    %c2_84 = arith.constant 2 : index
    %c0_85 = arith.constant 0 : index
    %98 = vector.load %arg11[%c0_82, %c0_83, %c2_84, %c0_85] : memref<2x6x6x96xf32, #tpu.memory_space<vmem>>, vector<2x4x4x96xf32>
    tpu.vector_store %arg11[%c0_82, %c0_83, %c2_84, %c0_85], %97 {strides = array<i32>} : memref<2x6x6x96xf32, #tpu.memory_space<vmem>>, vector<2x4x4x96xf32>,
    %c0_86 = arith.constant 0 : index
    %c1_87 = arith.constant 1 : index
    %c0_88 = arith.constant 0 : index
    %c0_89 = arith.constant 0 : index
    %99 = vector.load %arg11[%c0_86, %c1_87, %c0_88, %c0_89] : memref<2x6x6x96xf32, #tpu.memory_space<vmem>>, vector<2x4x4x96xf32>
    %c0_90 = arith.constant 0 : index
    %c0_91 = arith.constant 0 : index
    %c0_92 = arith.constant 0 : index
    %c288 = arith.constant 288 : index
    %100 = vector.load %arg10[%c0_90, %c0_91, %c0_92, %c288] : memref<2x4x4x864xf32, #tpu.memory_space<vmem>>, vector<2x4x4x96xf32>
    %101 = arith.addf %99, %100 : vector<2x4x4x96xf32>
    %c0_93 = arith.constant 0 : index
    %c1_94 = arith.constant 1 : index
    %c0_95 = arith.constant 0 : index
    %c0_96 = arith.constant 0 : index
    %102 = vector.load %arg11[%c0_93, %c1_94, %c0_95, %c0_96] : memref<2x6x6x96xf32, #tpu.memory_space<vmem>>, vector<2x4x4x96xf32>
    tpu.vector_store %arg11[%c0_93, %c1_94, %c0_95, %c0_96], %101 {strides = array<i32>} : memref<2x6x6x96xf32, #tpu.memory_space<vmem>>, vector<2x4x4x96xf32>,
    %c0_97 = arith.constant 0 : index
    %c1_98 = arith.constant 1 : index
    %c1_99 = arith.constant 1 : index
    %c0_100 = arith.constant 0 : index
    %103 = vector.load %arg11[%c0_97, %c1_98, %c1_99, %c0_100] : memref<2x6x6x96xf32, #tpu.memory_space<vmem>>, vector<2x4x4x96xf32>
    %c0_101 = arith.constant 0 : index
    %c0_102 = arith.constant 0 : index
    %c0_103 = arith.constant 0 : index
    %c384 = arith.constant 384 : index
    %104 = vector.load %arg10[%c0_101, %c0_102, %c0_103, %c384] : memref<2x4x4x864xf32, #tpu.memory_space<vmem>>, vector<2x4x4x96xf32>
    %105 = arith.addf %103, %104 : vector<2x4x4x96xf32>
    %c0_104 = arith.constant 0 : index
    %c1_105 = arith.constant 1 : index
    %c1_106 = arith.constant 1 : index
    %c0_107 = arith.constant 0 : index
    %106 = vector.load %arg11[%c0_104, %c1_105, %c1_106, %c0_107] : memref<2x6x6x96xf32, #tpu.memory_space<vmem>>, vector<2x4x4x96xf32>
    tpu.vector_store %arg11[%c0_104, %c1_105, %c1_106, %c0_107], %105 {strides = array<i32>} : memref<2x6x6x96xf32, #tpu.memory_space<vmem>>, vector<2x4x4x96xf32>,
    %c0_108 = arith.constant 0 : index
    %c1_109 = arith.constant 1 : index
    %c2_110 = arith.constant 2 : index
    %c0_111 = arith.constant 0 : index
    %107 = vector.load %arg11[%c0_108, %c1_109, %c2_110, %c0_111] : memref<2x6x6x96xf32, #tpu.memory_space<vmem>>, vector<2x4x4x96xf32>
    %c0_112 = arith.constant 0 : index
    %c0_113 = arith.constant 0 : index
    %c0_114 = arith.constant 0 : index
    %c480 = arith.constant 480 : index
    %108 = vector.load %arg10[%c0_112, %c0_113, %c0_114, %c480] : memref<2x4x4x864xf32, #tpu.memory_space<vmem>>, vector<2x4x4x96xf32>
    %109 = arith.addf %107, %108 : vector<2x4x4x96xf32>
    %c0_115 = arith.constant 0 : index
    %c1_116 = arith.constant 1 : index
    %c2_117 = arith.constant 2 : index
    %c0_118 = arith.constant 0 : index
    %110 = vector.load %arg11[%c0_115, %c1_116, %c2_117, %c0_118] : memref<2x6x6x96xf32, #tpu.memory_space<vmem>>, vector<2x4x4x96xf32>
    tpu.vector_store %arg11[%c0_115, %c1_116, %c2_117, %c0_118], %109 {strides = array<i32>} : memref<2x6x6x96xf32, #tpu.memory_space<vmem>>, vector<2x4x4x96xf32>,
    %c0_119 = arith.constant 0 : index
    %c2_120 = arith.constant 2 : index
    %c0_121 = arith.constant 0 : index
    %c0_122 = arith.constant 0 : index
    %111 = vector.load %arg11[%c0_119, %c2_120, %c0_121, %c0_122] : memref<2x6x6x96xf32, #tpu.memory_space<vmem>>, vector<2x4x4x96xf32>
    %c0_123 = arith.constant 0 : index
    %c0_124 = arith.constant 0 : index
    %c0_125 = arith.constant 0 : index
    %c576 = arith.constant 576 : index
    %112 = vector.load %arg10[%c0_123, %c0_124, %c0_125, %c576] : memref<2x4x4x864xf32, #tpu.memory_space<vmem>>, vector<2x4x4x96xf32>
    %113 = arith.addf %111, %112 : vector<2x4x4x96xf32>
    %c0_126 = arith.constant 0 : index
    %c2_127 = arith.constant 2 : index
    %c0_128 = arith.constant 0 : index
    %c0_129 = arith.constant 0 : index
    %114 = vector.load %arg11[%c0_126, %c2_127, %c0_128, %c0_129] : memref<2x6x6x96xf32, #tpu.memory_space<vmem>>, vector<2x4x4x96xf32>
    tpu.vector_store %arg11[%c0_126, %c2_127, %c0_128, %c0_129], %113 {strides = array<i32>} : memref<2x6x6x96xf32, #tpu.memory_space<vmem>>, vector<2x4x4x96xf32>,
    %c0_130 = arith.constant 0 : index
    %c2_131 = arith.constant 2 : index
    %c1_132 = arith.constant 1 : index
    %c0_133 = arith.constant 0 : index
    %115 = vector.load %arg11[%c0_130, %c2_131, %c1_132, %c0_133] : memref<2x6x6x96xf32, #tpu.memory_space<vmem>>, vector<2x4x4x96xf32>
    %c0_134 = arith.constant 0 : index
    %c0_135 = arith.constant 0 : index
    %c0_136 = arith.constant 0 : index
    %c672 = arith.constant 672 : index
    %116 = vector.load %arg10[%c0_134, %c0_135, %c0_136, %c672] : memref<2x4x4x864xf32, #tpu.memory_space<vmem>>, vector<2x4x4x96xf32>
    %117 = arith.addf %115, %116 : vector<2x4x4x96xf32>
    %c0_137 = arith.constant 0 : index
    %c2_138 = arith.constant 2 : index
    %c1_139 = arith.constant 1 : index
    %c0_140 = arith.constant 0 : index
    %118 = vector.load %arg11[%c0_137, %c2_138, %c1_139, %c0_140] : memref<2x6x6x96xf32, #tpu.memory_space<vmem>>, vector<2x4x4x96xf32>
    tpu.vector_store %arg11[%c0_137, %c2_138, %c1_139, %c0_140], %117 {strides = array<i32>} : memref<2x6x6x96xf32, #tpu.memory_space<vmem>>, vector<2x4x4x96xf32>,
    %c0_141 = arith.constant 0 : index
    %c2_142 = arith.constant 2 : index
    %c2_143 = arith.constant 2 : index
    %c0_144 = arith.constant 0 : index
    %119 = vector.load %arg11[%c0_141, %c2_142, %c2_143, %c0_144] : memref<2x6x6x96xf32, #tpu.memory_space<vmem>>, vector<2x4x4x96xf32>
    %c0_145 = arith.constant 0 : index
    %c0_146 = arith.constant 0 : index
    %c0_147 = arith.constant 0 : index
    %c768 = arith.constant 768 : index
    %120 = vector.load %arg10[%c0_145, %c0_146, %c0_147, %c768] : memref<2x4x4x864xf32, #tpu.memory_space<vmem>>, vector<2x4x4x96xf32>
    %121 = arith.addf %119, %120 : vector<2x4x4x96xf32>
    %c0_148 = arith.constant 0 : index
    %c2_149 = arith.constant 2 : index
    %c2_150 = arith.constant 2 : index
    %c0_151 = arith.constant 0 : index
    %122 = vector.load %arg11[%c0_148, %c2_149, %c2_150, %c0_151] : memref<2x6x6x96xf32, #tpu.memory_space<vmem>>, vector<2x4x4x96xf32>
    tpu.vector_store %arg11[%c0_148, %c2_149, %c2_150, %c0_151], %121 {strides = array<i32>} : memref<2x6x6x96xf32, #tpu.memory_space<vmem>>, vector<2x4x4x96xf32>,
    %c0_152 = arith.constant 0 : index
    %c0_153 = arith.constant 0 : index
    %c0_154 = arith.constant 0 : index
    %c0_155 = arith.constant 0 : index
    %123 = vector.load %arg11[%c0_152, %c0_153, %c0_154, %c0_155] : memref<2x6x6x96xf32, #tpu.memory_space<vmem>>, vector<2x6x6x96xf32>
    %cst_156 = arith.constant dense<0.000000e+00> : vector<6x6x96xf32>
    %124 = vector.multi_reduction <add>, %123, %cst_156 [0] : vector<2x6x6x96xf32> to vector<6x6x96xf32>
    %cst_157 = arith.constant dense<0.000000e+00> : vector<6x96xf32>
    %125 = vector.multi_reduction <add>, %124, %cst_157 [0] : vector<6x6x96xf32> to vector<6x96xf32>
    %126 = arith.mulf %123, %123 : vector<2x6x6x96xf32>
    %cst_158 = arith.constant dense<0.000000e+00> : vector<6x6x96xf32>
    %127 = vector.multi_reduction <add>, %126, %cst_158 [0] : vector<2x6x6x96xf32> to vector<6x6x96xf32>
    %cst_159 = arith.constant dense<0.000000e+00> : vector<6x96xf32>
    %128 = vector.multi_reduction <add>, %127, %cst_159 [0] : vector<6x6x96xf32> to vector<6x96xf32>
    %cst_160 = arith.constant dense<0.000000e+00> : vector<96xf32>
    %129 = vector.multi_reduction <add>, %125, %cst_160 [0] : vector<6x96xf32> to vector<96xf32>
    %130 = vector.shape_cast %129 : vector<96xf32> to vector<1x96xf32>
    %cst_161 = arith.constant dense<0.000000e+00> : vector<96xf32>
    %131 = vector.multi_reduction <add>, %128, %cst_161 [0] : vector<6x96xf32> to vector<96xf32>
    %132 = vector.shape_cast %131 : vector<96xf32> to vector<1x96xf32>
    %133 = vector.extract_strided_slice %130 {offsets = [0, 0], sizes = [1, 16], strides = [1, 1]} : vector<1x96xf32> to vector<1x16xf32>
    %134 = vector.extract_strided_slice %130 {offsets = [0, 16], sizes = [1, 16], strides = [1, 1]} : vector<1x96xf32> to vector<1x16xf32>
    %135 = arith.addf %133, %134 : vector<1x16xf32>
    %136 = vector.extract_strided_slice %130 {offsets = [0, 32], sizes = [1, 16], strides = [1, 1]} : vector<1x96xf32> to vector<1x16xf32>
    %137 = arith.addf %135, %136 : vector<1x16xf32>
    %138 = vector.extract_strided_slice %130 {offsets = [0, 48], sizes = [1, 16], strides = [1, 1]} : vector<1x96xf32> to vector<1x16xf32>
    %139 = arith.addf %137, %138 : vector<1x16xf32>
    %140 = vector.extract_strided_slice %130 {offsets = [0, 64], sizes = [1, 16], strides = [1, 1]} : vector<1x96xf32> to vector<1x16xf32>
    %141 = arith.addf %139, %140 : vector<1x16xf32>
    %142 = vector.extract_strided_slice %130 {offsets = [0, 80], sizes = [1, 16], strides = [1, 1]} : vector<1x96xf32> to vector<1x16xf32>
    %143 = arith.addf %141, %142 : vector<1x16xf32>
    %144 = vector.extract_strided_slice %132 {offsets = [0, 0], sizes = [1, 16], strides = [1, 1]} : vector<1x96xf32> to vector<1x16xf32>
    %145 = vector.extract_strided_slice %132 {offsets = [0, 16], sizes = [1, 16], strides = [1, 1]} : vector<1x96xf32> to vector<1x16xf32>
    %146 = arith.addf %144, %145 : vector<1x16xf32>
    %147 = vector.extract_strided_slice %132 {offsets = [0, 32], sizes = [1, 16], strides = [1, 1]} : vector<1x96xf32> to vector<1x16xf32>
    %148 = arith.addf %146, %147 : vector<1x16xf32>
    %149 = vector.extract_strided_slice %132 {offsets = [0, 48], sizes = [1, 16], strides = [1, 1]} : vector<1x96xf32> to vector<1x16xf32>
    %150 = arith.addf %148, %149 : vector<1x16xf32>
    %151 = vector.extract_strided_slice %132 {offsets = [0, 64], sizes = [1, 16], strides = [1, 1]} : vector<1x96xf32> to vector<1x16xf32>
    %152 = arith.addf %150, %151 : vector<1x16xf32>
    %153 = vector.extract_strided_slice %132 {offsets = [0, 80], sizes = [1, 16], strides = [1, 1]} : vector<1x96xf32> to vector<1x16xf32>
    %154 = arith.addf %152, %153 : vector<1x16xf32>
    %cst_162 = arith.constant 4.320000e+02 : f32
    %155 = vector.broadcast %cst_162 : f32 to vector<1x16xf32>
    %156 = arith.divf %143, %155 : vector<1x16xf32>
    %cst_163 = arith.constant 4.320000e+02 : f32
    %157 = vector.broadcast %cst_163 : f32 to vector<1x16xf32>
    %158 = arith.divf %154, %157 : vector<1x16xf32>
    %159 = arith.mulf %156, %156 : vector<1x16xf32>
    %160 = arith.subf %158, %159 : vector<1x16xf32>
    %c0_164 = arith.constant 0 : index
    %c0_165 = arith.constant 0 : index
    %161 = vector.load %arg6[%c0_164, %c0_165] : memref<1x16xf32, #tpu.memory_space<vmem>>, vector<1x16xf32>
    %cst_166 = arith.constant 9.99999974E-6 : f32
    %162 = vector.broadcast %cst_166 : f32 to vector<1x16xf32>
    %163 = arith.addf %160, %162 : vector<1x16xf32>
    %164 = math.rsqrt %163 : vector<1x16xf32>
    %165 = arith.mulf %161, %164 : vector<1x16xf32>
    %c0_167 = arith.constant 0 : index
    %c0_168 = arith.constant 0 : index
    %166 = vector.load %arg7[%c0_167, %c0_168] : memref<1x16xf32, #tpu.memory_space<vmem>>, vector<1x16xf32>
    %167 = arith.mulf %156, %165 : vector<1x16xf32>
    %168 = arith.subf %166, %167 : vector<1x16xf32>
    %169 = tpu.concatenate %165, %165, %165, %165 in 1 : vector<1x16xf32>, vector<1x16xf32>, vector<1x16xf32>, vector<1x16xf32> -> vector<1x64xf32>
    %170 = tpu.concatenate %168, %168, %168, %168 in 1 : vector<1x16xf32>, vector<1x16xf32>, vector<1x16xf32>, vector<1x16xf32> -> vector<1x64xf32>
    %c0_169 = arith.constant 0 : index
    %c1_170 = arith.constant 1 : index
    %c1_171 = arith.constant 1 : index
    %c16 = arith.constant 16 : index
    %171 = vector.load %arg11[%c0_169, %c1_170, %c1_171, %c16] : memref<2x6x6x96xf32, #tpu.memory_space<vmem>>, vector<1x1x4x64xf32>
    %172 = vector.shape_cast %171 : vector<1x1x4x64xf32> to vector<4x64xf32>
    %c0_172 = arith.constant 0 : index
    %c2_173 = arith.constant 2 : index
    %c1_174 = arith.constant 1 : index
    %c16_175 = arith.constant 16 : index
    %173 = vector.load %arg11[%c0_172, %c2_173, %c1_174, %c16_175] : memref<2x6x6x96xf32, #tpu.memory_space<vmem>>, vector<1x1x4x64xf32>
    %174 = vector.shape_cast %173 : vector<1x1x4x64xf32> to vector<4x64xf32>
    %c0_176 = arith.constant 0 : index
    %c3_177 = arith.constant 3 : index
    %c1_178 = arith.constant 1 : index
    %c16_179 = arith.constant 16 : index
    %175 = vector.load %arg11[%c0_176, %c3_177, %c1_178, %c16_179] : memref<2x6x6x96xf32, #tpu.memory_space<vmem>>, vector<1x1x4x64xf32>
    %176 = vector.shape_cast %175 : vector<1x1x4x64xf32> to vector<4x64xf32>
    %c0_180 = arith.constant 0 : index
    %c4 = arith.constant 4 : index
    %c1_181 = arith.constant 1 : index
    %c16_182 = arith.constant 16 : index
    %177 = vector.load %arg11[%c0_180, %c4, %c1_181, %c16_182] : memref<2x6x6x96xf32, #tpu.memory_space<vmem>>, vector<1x1x4x64xf32>
    %178 = vector.shape_cast %177 : vector<1x1x4x64xf32> to vector<4x64xf32>
    %c1_183 = arith.constant 1 : index
    %c1_184 = arith.constant 1 : index
    %c1_185 = arith.constant 1 : index
    %c16_186 = arith.constant 16 : index
    %179 = vector.load %arg11[%c1_183, %c1_184, %c1_185, %c16_186] : memref<2x6x6x96xf32, #tpu.memory_space<vmem>>, vector<1x1x4x64xf32>
    %180 = vector.shape_cast %179 : vector<1x1x4x64xf32> to vector<4x64xf32>
    %c1_187 = arith.constant 1 : index
    %c2_188 = arith.constant 2 : index
    %c1_189 = arith.constant 1 : index
    %c16_190 = arith.constant 16 : index
    %181 = vector.load %arg11[%c1_187, %c2_188, %c1_189, %c16_190] : memref<2x6x6x96xf32, #tpu.memory_space<vmem>>, vector<1x1x4x64xf32>
    %182 = vector.shape_cast %181 : vector<1x1x4x64xf32> to vector<4x64xf32>
    %c1_191 = arith.constant 1 : index
    %c3_192 = arith.constant 3 : index
    %c1_193 = arith.constant 1 : index
    %c16_194 = arith.constant 16 : index
    %183 = vector.load %arg11[%c1_191, %c3_192, %c1_193, %c16_194] : memref<2x6x6x96xf32, #tpu.memory_space<vmem>>, vector<1x1x4x64xf32>
    %184 = vector.shape_cast %183 : vector<1x1x4x64xf32> to vector<4x64xf32>
    %c1_195 = arith.constant 1 : index
    %c4_196 = arith.constant 4 : index
    %c1_197 = arith.constant 1 : index
    %c16_198 = arith.constant 16 : index
    %185 = vector.load %arg11[%c1_195, %c4_196, %c1_197, %c16_198] : memref<2x6x6x96xf32, #tpu.memory_space<vmem>>, vector<1x1x4x64xf32>
    %186 = vector.shape_cast %185 : vector<1x1x4x64xf32> to vector<4x64xf32>
    %187 = tpu.concatenate %172, %174, %176, %178, %180, %182, %184, %186 in 0 : vector<4x64xf32>, vector<4x64xf32>, vector<4x64xf32>, vector<4x64xf32>, vector<4x64xf32>, vector<4x64xf32>, vector<4x64xf32>, vector<4x64xf32> -> vector<32x64xf32>
    %188 = vector.broadcast %169 : vector<1x64xf32> to vector<32x64xf32>
    %189 = arith.mulf %187, %188 : vector<32x64xf32>
    %190 = vector.broadcast %170 : vector<1x64xf32> to vector<32x64xf32>
    %191 = arith.addf %189, %190 : vector<32x64xf32>
    %cst_199 = arith.constant 0.000000e+00 : f32
    %192 = vector.broadcast %cst_199 : f32 to vector<32x64xf32>
    %193 = arith.cmpf ogt, %191, %192 : vector<32x64xf32>
    %cst_200 = arith.constant 0.000000e+00 : f32
    %194 = vector.broadcast %cst_200 : f32 to vector<32x64xf32>
    %195 = arith.minimumf %191, %194 : vector<32x64xf32>
    %196 = math.exp %195 : vector<32x64xf32>
    %cst_201 = arith.constant 1.000000e+00 : f32
    %197 = vector.broadcast %cst_201 : f32 to vector<32x64xf32>
    %198 = arith.subf %196, %197 : vector<32x64xf32>
    %199 = arith.select %193, %191, %198 : vector<32x64xi1>, vector<32x64xf32>
    %200 = arith.truncf %199 : vector<32x64xf32> to vector<32x64xbf16>
    %c0_202 = arith.constant 0 : index
    %c0_203 = arith.constant 0 : index
    %201 = vector.load %arg8[%c0_202, %c0_203] : memref<64x32xbf16, #tpu.memory_space<vmem>>, vector<64x32xbf16>
    %cst_204 = arith.constant dense<0.000000e+00> : vector<32x32xf32>
    %202 = tpu.matmul %200, %201, %cst_204 {dimension_numbers = #tpu.dot_dimension_numbers<[1], [0], [0], [1], [0, 0, 1, 1], [], []>} : vector<32x64xbf16>, vector<64x32xbf16>, vector<32x32xf32> -> vector<32x32xf32>
    %203 = math.absf %202 : vector<32x32xf32>
    %cst_205 = arith.constant 0.000000e+00 : f32
    %204 = vector.broadcast %cst_205 : f32 to vector<32x32xf32>
    %205 = arith.subf %204, %203 : vector<32x32xf32>
    %206 = math.exp %205 : vector<32x32xf32>
    %cst_206 = arith.constant 0.000000e+00 : f32
    %207 = vector.broadcast %cst_206 : f32 to vector<32x32xf32>
    %208 = arith.cmpf oge, %202, %207 : vector<32x32xf32>
    %cst_207 = arith.constant 1.000000e+00 : f32
    %209 = vector.broadcast %cst_207 : f32 to vector<32x32xf32>
    %210 = arith.addf %209, %206 : vector<32x32xf32>
    %cst_208 = arith.constant 1.000000e+00 : f32
    %211 = vector.broadcast %cst_208 : f32 to vector<32x32xf32>
    %212 = arith.divf %211, %210 : vector<32x32xf32>
    %cst_209 = arith.constant 1.000000e+00 : f32
    %213 = vector.broadcast %cst_209 : f32 to vector<32x32xf32>
    %214 = arith.addf %213, %206 : vector<32x32xf32>
    %215 = arith.divf %206, %214 : vector<32x32xf32>
    %216 = arith.select %208, %212, %215 : vector<32x32xi1>, vector<32x32xf32>
    %cst_210 = arith.constant 1.000000e-07 : f32
    %cst_211 = arith.constant 0.99999988 : f32
    %217 = vector.broadcast %cst_210 : f32 to vector<32x32xf32>
    %218 = arith.maximumf %217, %216 : vector<32x32xf32>
    %219 = vector.broadcast %cst_211 : f32 to vector<32x32xf32>
    %220 = arith.minimumf %219, %218 : vector<32x32xf32>
    %c0_212 = arith.constant 0 : index
    %c0_213 = arith.constant 0 : index
    %221 = vector.load %arg9[%c0_212, %c0_213] : memref<32x32xf32, #tpu.memory_space<vmem>>, vector<32x32xf32>
    tpu.vector_store %arg9[%c0_212, %c0_213], %220 {strides = array<i32>} : memref<32x32xf32, #tpu.memory_space<vmem>>, vector<32x32xf32>,
    return
  }
  func.func @transform_0(%arg0: i32) -> (i32, i32) {
    %c0_i32 = arith.constant 0 : i32
    %c0_i32_0 = arith.constant 0 : i32
    %c0_i32_1 = arith.constant 0 : i32
    return %c0_i32, %c0_i32_0 : i32, i32
  }
  func.func @transform_1(%arg0: i32) -> (i32, i32) {
    %c0_i32 = arith.constant 0 : i32
    %c0_i32_0 = arith.constant 0 : i32
    %c0_i32_1 = arith.constant 0 : i32
    return %c0_i32, %c0_i32_0 : i32, i32
  }
  func.func @transform_2(%arg0: i32) -> (i32, i32) {
    %c0_i32 = arith.constant 0 : i32
    %c0_i32_0 = arith.constant 0 : i32
    %c0_i32_1 = arith.constant 0 : i32
    return %c0_i32, %c0_i32_0 : i32, i32
  }
  func.func @transform_3(%arg0: i32) -> (i32, i32) {
    %c0_i32 = arith.constant 0 : i32
    %c0_i32_0 = arith.constant 0 : i32
    %c0_i32_1 = arith.constant 0 : i32
    return %c0_i32, %c0_i32_0 : i32, i32
  }
  func.func @transform_4(%arg0: i32) -> (i32, i32) {
    %c0_i32 = arith.constant 0 : i32
    %c0_i32_0 = arith.constant 0 : i32
    %c0_i32_1 = arith.constant 0 : i32
    return %c0_i32, %c0_i32_0 : i32, i32
  }
  func.func @transform_5(%arg0: i32) -> (i32, i32) {
    %c0_i32 = arith.constant 0 : i32
    %c0_i32_0 = arith.constant 0 : i32
    %c0_i32_1 = arith.constant 0 : i32
    return %c0_i32, %c0_i32_0 : i32, i32
  }
  func.func @transform_6(%arg0: i32) -> (i32, i32) {
    %c0_i32 = arith.constant 0 : i32
    %c0_i32_0 = arith.constant 0 : i32
    %c0_i32_1 = arith.constant 0 : i32
    return %c0_i32, %c0_i32_0 : i32, i32
  }
  func.func @transform_7(%arg0: i32) -> (i32, i32) {
    %c0_i32 = arith.constant 0 : i32
    %c0_i32_0 = arith.constant 0 : i32
    %c0_i32_1 = arith.constant 0 : i32
    return %c0_i32, %c0_i32_0 : i32, i32
  }
  func.func @transform_8(%arg0: i32) -> (i32, i32) {
    %c0_i32 = arith.constant 0 : i32
    %c0_i32_0 = arith.constant 0 : i32
    %c0_i32_1 = arith.constant 0 : i32
    return %c0_i32, %c0_i32_0 : i32, i32
  }
}

</mosaic_0001>

<bundles_post_ra>
// kernel: leaf_decoder_forward.1
= control target key start
LH: loop header
LB: loop body
LE: loop exit
PB: predicated region body
PF: predicated region fallthrough
CT: control target
= control target key end

     0   :  { %s2678_s30 = smov 64   ;;  %s2679_s9 = smov 32   ;;  %v2680_v62 = vmov 128.0   ;;  %vm306_vm4 = vcmask 261120   ;;  %vm308_vm5 = vcmask 523264   ;;  %vm310_vm6 = vcmask 785408   ;;  %s3761_s1 = inlined_call_operand.vmem [shape: bf16[256,128], index: 1, kind: input, shape index: {}]   ;;  %s3762_s0 = inlined_call_operand.vmem [shape: bf16[32,256], index: 0, kind: input, shape index: {}]   ;;  %s3763_s2 = inlined_call_operand.vmem [shape: f32[1,32], index: 2, kind: input, shape index: {}]   ;;  %s3764_s3 = inlined_call_operand.vmem [shape: f32[1,32], index: 3, kind: input, shape index: {}]   ;;  %s3765_s4 = inlined_call_operand.vmem [shape: bf16[128,864], index: 4, kind: input, shape index: {}]   ;;  %s3766_s5 = inlined_call_operand.vmem [shape: f32[1,16], index: 5, kind: input, shape index: {}]   ;;  %s3767_s6 = inlined_call_operand.vmem [shape: f32[1,16], index: 6, kind: input, shape index: {}]   ;;  %s3768_s7 = inlined_call_operand.vmem [shape: bf16[64,32], index: 7, kind: input, shape index: {}]   ;;  %s3769_s8 = inlined_call_operand.vmem [shape: f32[32,32], index: 8, kind: output, shape index: {}]  }
   0x1   :  { %v2546_v0 = vld [vmem:[%s3761_s1 + $0x38] sm:$0xff]  ;;  %v2545_v2 = vld [vmem:[%s3761_s1 + $0x30] sm:$0xff]  ;;  %v2544_v4 = vld [vmem:[%s3761_s1 + $0x28] sm:$0xff]  ;;  %2637 = vrcp.f32 %v2680_v62  ;;  %vm856_vm11 = vcmask 1043456   ;;  %vm1028_vm12 = vcmask 783360   ;;  %vm866_vm13 = vcmask 781312  }
   0x2   :  { %v2554_v1 = vld [vmem:[%s3761_s1 + $0x78] sm:$0xff]  ;;  %182 = vmatpush.bf16.msra.mxu0 %v2546_v0  ;;  %v2553_v3 = vld [vmem:[%s3761_s1 + $0x70] sm:$0xff]  ;;  %v2552_v5 = vld [vmem:[%s3761_s1 + $0x68] sm:$0xff]  ;;  %s2683_s28 = smov 80   ;;  %s2684_s29 = smov 48  }
   0x3   :  { %201 = vmatpush.bf16.msra.mxu1 %v2554_v1  ;;  %v2543_v6 = vld [vmem:[%s3761_s1 + $0x20] sm:$0xff]  ;;  %v2542_v8 = vld [vmem:[%s3761_s1 + $0x18] sm:$0xff]  ;;  %v2541_v10 = vld [vmem:[%s3761_s1 + $0x10] sm:$0xff]  ;;  %s2686_s12 = smov 16  }
   0x4   :  { %v2551_v7 = vld [vmem:[%s3761_s1 + $0x60] sm:$0xff]  ;;  %v2550_v9 = vld [vmem:[%s3761_s1 + $0x58] sm:$0xff]  ;;  %v2549_v11 = vld [vmem:[%s3761_s1 + $0x50] sm:$0xff] }
   0x5   :  { %v2540_v12 = vld [vmem:[%s3761_s1 + $0x8] sm:$0xff]  ;;  %v2539_v14 = vld [vmem:[%s3761_s1] sm:$0xff]  ;;  %v2215_v22 = vld [vmem:[%s3762_s0 + $0x10] sm:$0xf] }
   0x6   :  { %183 = vmatpush.bf16.msra.mxu0 %v2545_v2  ;;  %v2548_v13 = vld [vmem:[%s3761_s1 + $0x48] sm:$0xff]  ;;  %v2547_v15 = vld [vmem:[%s3761_s1 + $0x40] sm:$0xff]  ;;  %v2538_v23 = vld [vmem:[%s3762_s0 + $0x14] sm:$0xf0] }
   0x7   :  { %202 = vmatpush.bf16.msra.mxu1 %v2553_v3  ;;  %v2207_v16 = vld [vmem:[%s3762_s0] sm:$0xf]  ;;  %v2536_v17 = vld [vmem:[%s3762_s0 + $0x4] sm:$0xf0]  ;;  %v2535_v18 = vld [vmem:[%s3762_s0 + $0x4] sm:$0xf]  ;;  %v2216_v26 = vor.u32 %v2538_v23, %v2215_v22  ;;  %v2638_v63 = vpop.eup %2637 }
   0x8   :  { %v2209_v19 = vld [vmem:[%s3762_s0 + $0x8] sm:$0xf0]  ;;  %v2208_v20 = vor.u32 %v2536_v17, %v2207_v16  ;;  %v2537_v24 = vld [vmem:[%s3762_s0 + $0x14] sm:$0xf]  ;;  %v2217_v25 = vld [vmem:[%s3762_s0 + $0x18] sm:$0xf0]  ;;  %vm273_vm0 = vweird.f32 %v2638_v63 }
   0x9   :  { %v2212_v21 = vor.u32 %v2535_v18, %v2209_v19  ;;  %v2220_v27 = vor.u32 %v2537_v24, %v2217_v25  ;;  %s2677_s0 = smov 96   ;;  %v269_v0 = vmul.f32 128.0, %v2638_v63  ;;  %v2469_v62 = vld [vmem:[%s3765_s4 + $0x174] sm:$0xf0] }
   0xa   :  { %184 = vmatpush.bf16.msra.mxu0 %v2544_v4 }
   0xb   :  { %203 = vmatpush.bf16.msra.mxu1 %v2552_v5  ;;  %v270_v3 = vsub.f32 1.0, %v269_v0  ;;  %v2431_v0 = vld [vmem:[%s3765_s4 + $0x118] sm:$0xf] }
   0xe   :  { %185 = vmatpush.bf16.msra.mxu0 %v2543_v6  ;;  %v271_v6 = vmul.f32 %v2638_v63, %v270_v3 }
   0xf   :  { %204 = vmatpush.bf16.msra.mxu1 %v2551_v7 }
  0x12   :  { %186 = vmatpush.bf16.msra.mxu0 %v2542_v8 }
  0x13   :  { %205 = vmatpush.bf16.msra.mxu1 %v2550_v9 }
  0x16   :  { %187 = vmatpush.bf16.msra.mxu0 %v2541_v10  ;;  %v272_v10 = vadd.f32 %v2638_v63, %v271_v6  ;;  %v2594_v6 = vld [vmem:[%s3765_s4 + $0x138] sm:$0xf0] }
  0x17   :  { %206 = vmatpush.bf16.msra.mxu1 %v2549_v11 }
  0x18   :  { %v274_v16 = vsel %vm273_vm0, %v2638_v63, %v272_v10  ;;  %v2441_v10 = vld [vmem:[%s3765_s4 + $0x13c] sm:$0xf0] }
  0x1a   :  { %188 = vmatpush.bf16.msra.mxu0 %v2540_v12 }
  0x1b   :  { %207 = vmatpush.bf16.msra.mxu1 %v2548_v13 }
  0x1e   :  { %189 = vmatpush.bf16.msra.mxu0 %v2539_v14 }
  0x1f   :  { %208 = vmatpush.bf16.msra.mxu1 %v2547_v15 }
  0x21   :  { %190 = vmatmul.bf16.vlgmr.msra.gmra.mxu0 %v2208_v20 }
  0x22   :  { %209 = vmatmul.bf16.vlgmr.msra.gmra.mxu1 %v2212_v21 }
  0x31   :  { %195 = vmatmul.bf16.gmra.mxu0 %v2216_v26 }
  0x32   :  { %214 = vmatmul.bf16.gmra.mxu1 %v2220_v27  ;;  %v279_v27 = vld [vmem:[%s3763_s2] sm:$0x1] }
  0x9e   :  { %v191_v28 = vpop.f32.mrf.mxu0 }
  0x9f   :  { %v210_v29 = vpop.f32.mrf.mxu1 }
  0xa0   :  { %v2806_v35 = vadd.f32 %v210_v29, %v191_v28 }
  0xa2   :  { %v229_v38 = vmul.f32 %v2806_v35, %v2806_v35 }
  0xa6   :  { %v193_v30 = vpop.f32.mrf.mxu0 }
  0xa7   :  { %v212_v31 = vpop.f32.mrf.mxu1 }
  0xa8   :  { %v2804_v34 = vadd.f32 %v212_v31, %v193_v30 }
  0xaa   :  { %v230_v37 = vmul.f32 %v2804_v34, %v2804_v34  ;;  %v220_v39 = vadd.f32 %v2804_v34, %v2806_v35 }
  0xac   :  { %v233_v43 = vadd.f32 %v230_v37, %v229_v38 }
  0xae   :  { %v196_v32 = vpop.f32.mrf.mxu0 }
  0xaf   :  { %v215_v33 = vpop.f32.mrf.mxu1 }
  0xb0   :  { %v2808_v36 = vadd.f32 %v215_v33, %v196_v32  ;;  %v292_v33 = vld [vmem:[%s3764_s3] sm:$0x1] }
  0xb2   :  { %v231_v40 = vmul.f32 %v2808_v36, %v2808_v36  ;;  %v221_v44 = vadd.f32 %v220_v39, %v2808_v36  ;;  %v2487_v39 = vld [vmem:[%s3765_s4 + $0x188] sm:$0xf] }
  0xb4   :  { %v234_v46 = vadd.f32 %v233_v43, %v231_v40  ;;  %v2607_v40 = vld [vmem:[%s3765_s4 + $0x1a0] sm:$0xf0]  ;;  %v2489_v43 = vld [vmem:[%s3765_s4 + $0x1a4] sm:$0xf0] }
  0xb6   :  { %v198_v41 = vpop.f32.mrf.mxu0 }
  0xb7   :  { %v217_v42 = vpop.f32.mrf.mxu1 }
  0xb8   :  { %v2819_v45 = vadd.f32 %v217_v42, %v198_v41  ;;  %v2604_v41 = vld [vmem:[%s3765_s4 + $0x18c] sm:$0xf]  ;;  %v2488_v42 = vor.u32 %v2607_v40, %v2487_v39  ;;  %v2385_v39 = vld [vmem:[%s3765_s4 + $0xcc] sm:$0xf0] }
  0xba   :  { %v222_v47 = vadd.f32 %v221_v44, %v2819_v45  ;;  %v232_v48 = vmul.f32 %v2819_v45, %v2819_v45  ;;  %v2492_v44 = vor.u32 %v2604_v41, %v2489_v43  ;;  %714 = vmatpush.bf16.msra.mxu2 %v2488_v42  ;;  %v2347_v41 = vld [vmem:[%s3765_s4 + $0x70] sm:$0xf]  ;;  %v2572_v42 = vld [vmem:[%s3765_s4 + $0x88] sm:$0xf0]  ;;  %v2569_v43 = vld [vmem:[%s3765_s4 + $0x74] sm:$0xf] }
  0xbc   :  { %v223_v49 = vrot.slane %v222_v47, 4  ;;  %v235_v50 = vadd.f32 %v234_v46, %v232_v48  ;;  %v2495_v46 = vld [vmem:[%s3765_s4 + $0x190] sm:$0xf]  ;;  %v2605_v48 = vld [vmem:[%s3765_s4 + $0x194] sm:$0xf]  ;;  %733 = vmatpush.bf16.msra.mxu3 %v2492_v44  ;;  %v2348_v44 = vor.u32 %v2572_v42, %v2347_v41 }
  0xbd   :  { %v2595_v41 = vld [vmem:[%s3765_s4 + $0x140] sm:$0xf0] }
  0xbe   :  { %v224_v51 = vadd.f32 %v223_v49, %v222_v47  ;;  %v236_v52 = vrot.slane %v235_v50, 4  ;;  %v2608_v47 = vld [vmem:[%s3765_s4 + $0x1a8] sm:$0xf0] }
  0xbf   :  { %v2496_v49 = vor.u32 %v2608_v47, %v2495_v46  ;;  %v2349_v46 = vld [vmem:[%s3765_s4 + $0x8c] sm:$0xf0]  ;;  %v2355_v47 = vld [vmem:[%s3765_s4 + $0x78] sm:$0xf] }
  0xc0   :  { %v225_v53 = vrot.slane %v224_v51, 2  ;;  %v237_v54 = vadd.f32 %v236_v52, %v235_v50  ;;  %v2497_v50 = vld [vmem:[%s3765_s4 + $0x1ac] sm:$0xf0] }
  0xc1   :  { %v2459_v52 = vld [vmem:[%s3765_s4 + $0x150] sm:$0xf]  ;;  %752 = vmatpush.bf16.msrb.mxu0 %v2496_v49  ;;  %v2352_v49 = vor.u32 %v2569_v43, %v2349_v46  ;;  %v2592_v46 = vld [vmem:[%s3765_s4 + $0x12c] sm:$0xf] }
  0xc2   :  { %v226_v55 = vadd.f32 %v225_v53, %v224_v51  ;;  %v238_v56 = vrot.slane %v237_v54, 2  ;;  %v2500_v51 = vor.u32 %v2605_v48, %v2497_v50  ;;  %v2600_v53 = vld [vmem:[%s3765_s4 + $0x168] sm:$0xf0]  ;;  %v2573_v48 = vld [vmem:[%s3765_s4 + $0x90] sm:$0xf0] }
  0xc3   :  { %v2356_v50 = vor.u32 %v2573_v48, %v2355_v47  ;;  %v2449_v47 = vld [vmem:[%s3765_s4 + $0x144] sm:$0xf0] }
  0xc4   :  { %v227_v57 = vrot.slane %v226_v55, 1  ;;  %v239_v58 = vadd.f32 %v238_v56, %v237_v54  ;;  %v2597_v54 = vld [vmem:[%s3765_s4 + $0x154] sm:$0xf]  ;;  %v2461_v56 = vld [vmem:[%s3765_s4 + $0x16c] sm:$0xf0]  ;;  %771 = vmatpush.bf16.msrb.mxu1 %v2500_v51 }
  0xc5   :  { %v2570_v51 = vld [vmem:[%s3765_s4 + $0x7c] sm:$0xf] }
  0xc6   :  { %v228_v59 = vadd.f32 %v227_v57, %v226_v55  ;;  %v240_v60 = vrot.slane %v239_v58, 1  ;;  %v2460_v55 = vor.u32 %v2600_v53, %v2459_v52  ;;  %v2467_v57 = vld [vmem:[%s3765_s4 + $0x158] sm:$0xf] }
  0xc7   :  { %v2357_v52 = vld [vmem:[%s3765_s4 + $0x94] sm:$0xf0] }
  0xc8   :  { %243 = vrot.lane.b32.xlu0 %v228_v59, %s2677_s0  ;;  %v241_v61 = vadd.f32 %v240_v60, %v239_v58  ;;  %v2601_v58 = vld [vmem:[%s3765_s4 + $0x170] sm:$0xf0]  ;;  %715 = vmatpush.bf16.msra.mxu2 %v2460_v55  ;;  %v2360_v53 = vor.u32 %v2570_v51, %v2357_v52  ;;  %v2596_v51 = vld [vmem:[%s3765_s4 + $0x148] sm:$0xf0] }
  0xc9   :  { %v2468_v60 = vor.u32 %v2601_v58, %v2467_v57  ;;  %v2565_v55 = vld [vmem:[%s3765_s4 + $0x50] sm:$0xf0]  ;;  %v2321_v58 = vld [vmem:[%s3765_s4 + $0x54] sm:$0xf0] }
  0xca   :  { %260 = vrot.lane.b32.xlu2 %v241_v61, %s2678_s30  ;;  %256 = vrot.lane.b32.xlu1 %v241_v61, %s2677_s0 }
  0xcb   :  { %753 = vmatpush.bf16.msrb.mxu0 %v2468_v60  ;;  %v2566_v60 = vld [vmem:[%s3765_s4 + $0x58] sm:$0xf0] }
  0xd0   :  { %247 = vrot.lane.b32.xlu0 %v228_v59, %s2678_s30 }
  0xd2   :  { %264 = vrot.lane.b32.xlu2 %v241_v61, %s2679_s9  ;;  %251 = vrot.lane.b32.xlu1 %v228_v59, %s2679_s9 }
 0x124   :  { %v261_v1 = vpop.permute.xlu2 %260 }
 0x12c   :  { %v265_v12 = vpop.permute.xlu2 %264 }
 0x13a   :  { %v244_v2 = vpop.permute.xlu0 %243 }
 0x13b   :  { %v246_v7 = vadd.f32 %v244_v2, %v228_v59  ;;  %v2464_v59 = vor.u32 %v2597_v54, %v2461_v56  ;;  %v2590_v2 = vld [vmem:[%s3765_s4 + $0x11c] sm:$0xf]  ;;  %v2319_v54 = vld [vmem:[%s3765_s4 + $0x38] sm:$0xf] }
 0x13c   :  { %v257_v4 = vpop.permute.xlu1 %256  ;;  %v2562_v56 = vld [vmem:[%s3765_s4 + $0x3c] sm:$0xf]  ;;  %v2320_v57 = vor.u32 %v2565_v55, %v2319_v54 }
 0x13d   :  { %v259_v5 = vadd.f32 %v257_v4, %v241_v61  ;;  %v2598_v61 = vld [vmem:[%s3765_s4 + $0x15c] sm:$0xf]  ;;  %734 = vmatpush.bf16.msra.mxu3 %v2464_v59  ;;  %v2433_v4 = vld [vmem:[%s3765_s4 + $0x134] sm:$0xf0]  ;;  %v2327_v59 = vld [vmem:[%s3765_s4 + $0x40] sm:$0xf] }
 0x13e   :  { %v2472_v63 = vor.u32 %v2598_v61, %v2469_v62  ;;  %v2324_v61 = vor.u32 %v2562_v56, %v2321_v58  ;;  %v2328_v62 = vor.u32 %v2566_v60, %v2327_v59  ;;  %v2452_v56 = vor.u32 %v2592_v46, %v2449_v47  ;;  %v2588_v58 = vld [vmem:[%s3765_s4 + $0x108] sm:$0xf0]  ;;  %v2585_v60 = vld [vmem:[%s3765_s4 + $0xf4] sm:$0xf]  ;;  %v2307_v46 = vld [vmem:[%s3765_s4 + $0x10] sm:$0xf] }
 0x13f   :  { %v263_v8 = vadd.f32 %v261_v1, %v259_v5  ;;  %v2593_v1 = vld [vmem:[%s3765_s4 + $0x130] sm:$0xf0]  ;;  %v2439_v5 = vld [vmem:[%s3765_s4 + $0x120] sm:$0xf]  ;;  %v2560_v47 = vld [vmem:[%s3765_s4 + $0x28] sm:$0xf0] }
 0x140   :  { %772 = vmatpush.bf16.msrb.mxu1 %v2472_v63  ;;  %v2432_v3 = vor.u32 %v2593_v1, %v2431_v0  ;;  %v2563_v63 = vld [vmem:[%s3765_s4 + $0x44] sm:$0xf]  ;;  %v2329_v0 = vld [vmem:[%s3765_s4 + $0x5c] sm:$0xf0] }
 0x141   :  { %v267_v14 = vadd.f32 %v265_v12, %v263_v8  ;;  %v2440_v8 = vor.u32 %v2594_v6, %v2439_v5  ;;  %v2403_v12 = vld [vmem:[%s3765_s4 + $0xe0] sm:$0xf]  ;;  %v2332_v1 = vor.u32 %v2563_v63, %v2329_v0 }
 0x142   :  { %v248_v9 = vpop.permute.xlu0 %247  ;;  %716 = vmatpush.bf16.msra.mxu2 %v2432_v3  ;;  %v2558_v3 = vld [vmem:[%s3765_s4 + $0x18] sm:$0xf0] }
 0x143   :  { %v250_v11 = vadd.f32 %v248_v9, %v246_v7  ;;  %v276_v18 = vmul.f32 %v274_v16, %v267_v14  ;;  %v2436_v7 = vor.u32 %v2590_v2, %v2433_v4  ;;  %v2591_v9 = vld [vmem:[%s3765_s4 + $0x124] sm:$0xf]  ;;  %754 = vmatpush.bf16.msrb.mxu0 %v2440_v8  ;;  %v2291_v2 = vld [vmem:[%s3765_s4] sm:$0xf]  ;;  %v2299_v8 = vld [vmem:[%s3765_s4 + $0x8] sm:$0xf] }
 0x144   :  { %v252_v13 = vpop.permute.xlu1 %251  ;;  %v2583_v14 = vld [vmem:[%s3765_s4 + $0xe4] sm:$0xf]  ;;  %v2292_v6 = vor.u32 %v2558_v3, %v2291_v2  ;;  %v2589_v2 = vld [vmem:[%s3765_s4 + $0x110] sm:$0xf0] }
 0x145   :  { %v254_v15 = vadd.f32 %v252_v13, %v250_v11  ;;  %v2444_v11 = vor.u32 %v2591_v9, %v2441_v10  ;;  %735 = vmatpush.bf16.msra.mxu3 %v2436_v7  ;;  %v2586_v13 = vld [vmem:[%s3765_s4 + $0xf8] sm:$0xf0]  ;;  %v2555_v4 = vld [vmem:[%s3765_s4 + $0x4] sm:$0xf]  ;;  %v2293_v7 = vld [vmem:[%s3765_s4 + $0x1c] sm:$0xf0] }
 0x146   :  { %v2559_v9 = vld [vmem:[%s3765_s4 + $0x20] sm:$0xf0] }
 0x147   :  { %v275_v17 = vmul.f32 %v274_v16, %v254_v15  ;;  %773 = vmatpush.bf16.msrb.mxu1 %v2444_v11  ;;  %v2404_v15 = vor.u32 %v2586_v13, %v2403_v12  ;;  %v2405_v16 = vld [vmem:[%s3765_s4 + $0xfc] sm:$0xf0]  ;;  %v2296_v12 = vor.u32 %v2555_v4, %v2293_v7  ;;  %v2300_v13 = vor.u32 %v2559_v9, %v2299_v8 }
 0x149   :  { %v277_v19 = vmul.f32 %v275_v17, %v275_v17  ;;  %717 = vmatpush.bf16.msra.mxu2 %v2404_v15  ;;  %v2301_v15 = vld [vmem:[%s3765_s4 + $0x24] sm:$0xf0] }
 0x14b   :  { %v278_v20 = vsub.f32 %v276_v18, %v277_v19  ;;  %v2587_v18 = vld [vmem:[%s3765_s4 + $0x100] sm:$0xf0]  ;;  %v2408_v19 = vor.u32 %v2583_v14, %v2405_v16  ;;  %v2556_v14 = vld [vmem:[%s3765_s4 + $0xc] sm:$0xf] }
 0x14d   :  { %v280_v21 = vadd.f32 1e-05, %v278_v20  ;;  %736 = vmatpush.bf16.msra.mxu3 %v2408_v19  ;;  %v2503_v19 = vld [vmem:[%s3765_s4 + $0x198] sm:$0xf] }
 0x14f   :  { %2639 = vrsqrt.f32 %v280_v21  ;;  %vm287_vm2 = vweird.f32 %v280_v21 }
 0x155   :  { %v2640_v22 = vpop.eup %2639 }
 0x156   :  { %v282_v23 = vmul.f32 %v2640_v22, %v280_v21  ;;  %vm288_vm1 = vweird.f32 %v2640_v22  ;;  %v2584_v21 = vld [vmem:[%s3765_s4 + $0xec] sm:$0xf] }
 0x157   :  { %vm289_vm3 = vmor %vm287_vm2, %vm288_vm1  ;;  %vm1941_vm2 = vcmask 130048  }
 0x158   :  { %v283_v24 = vmul.f32 %v2640_v22, %v282_v23 }
 0x15a   :  { %v284_v25 = vmul.f32 0.5, %v283_v24  ;;  %v2375_v24 = vld [vmem:[%s3765_s4 + $0xa8] sm:$0xf] }
 0x15c   :  { %v285_v26 = vsub.f32 1.5, %v284_v25  ;;  %v2579_v25 = vld [vmem:[%s3765_s4 + $0xc0] sm:$0xf0] }
 0x15e   :  { %v286_v28 = vmul.f32 %v2640_v22, %v285_v26  ;;  %v2576_v26 = vld [vmem:[%s3765_s4 + $0xac] sm:$0xf] }
 0x160   :  { %v290_v29 = vsel %vm289_vm3, %v2640_v22, %v286_v28  ;;  %v2413_v22 = vld [vmem:[%s3765_s4 + $0x104] sm:$0xf0]  ;;  %vm1944_vm3 = vcmask 392192  }
 0x161   :  { %v2833_v30 = vmul.f32 %v290_v29, %v279_v27  ;;  %v2416_v23 = vor.u32 %v2584_v21, %v2413_v22  ;;  %v2376_v27 = vor.u32 %v2579_v25, %v2375_v24  ;;  %v2377_v28 = vld [vmem:[%s3765_s4 + $0xc4] sm:$0xf0]  ;;  %v2383_v29 = vld [vmem:[%s3765_s4 + $0xb0] sm:$0xf]  ;;  %v2606_v21 = vld [vmem:[%s3765_s4 + $0x19c] sm:$0xf] }
 0x162   :  { %v2505_v22 = vld [vmem:[%s3765_s4 + $0x1b4] sm:$0xf0]  ;;  %v2610_v24 = vld [vmem:[%s3765_s4 + $0x1b8] sm:$0xf0] }
 0x163   :  { %v293_v31 = vmul.f32 %v2833_v30, %v275_v17  ;;  %v296_v32 = vperm.slane %v2833_v30, 0  ;;  %v2411_v17 = vld [vmem:[%s3765_s4 + $0xe8] sm:$0xf]  ;;  %774 = vmatpush.bf16.msrb.mxu1 %v2416_v23  ;;  %718 = vmatpush.bf16.msra.mxu2 %v2376_v27  ;;  %v2511_v23 = vld [vmem:[%s3765_s4 + $0x1a0] sm:$0xf]  ;;  %v2508_v25 = vor.u32 %v2606_v21, %v2505_v22 }
 0x164   :  { %v2412_v20 = vor.u32 %v2587_v18, %v2411_v17  ;;  %v2304_v17 = vor.u32 %v2556_v14, %v2301_v15  ;;  %v2475_v27 = vld [vmem:[%s3765_s4 + $0x160] sm:$0xf]  ;;  %v2582_v21 = vld [vmem:[%s3765_s4 + $0xd8] sm:$0xf0] }
 0x165   :  { %303 = vrot.lane.b32.xlu2 %v296_v32, %s2677_s0  ;;  %300 = vrot.lane.b32.xlu1 %v296_v32, %s2678_s30  ;;  %v2843_v37 = vsub.f32 %v292_v33, %v293_v31  ;;  %v2580_v31 = vld [vmem:[%s3765_s4 + $0xc8] sm:$0xf0]  ;;  %v2574_v22 = vld [vmem:[%s3765_s4 + $0x98] sm:$0xf0] }
 0x166   :  { %297 = vrot.lane.b32.xlu0 %v296_v32, %s2679_s9  ;;  %755 = vmatpush.bf16.msrb.mxu0 %v2412_v20  ;;  %v2380_v32 = vor.u32 %v2576_v26, %v2377_v28  ;;  %v2384_v33 = vor.u32 %v2580_v31, %v2383_v29  ;;  %v2609_v20 = vld [vmem:[%s3765_s4 + $0x1b0] sm:$0xf0]  ;;  %v3062_v26 = vor.u32 %v2610_v24, %v2511_v23  ;;  %v2602_v28 = vld [vmem:[%s3765_s4 + $0x178] sm:$0xf0] }
 0x167   :  { %v313_v38 = vperm.slane %v2843_v37, 0  ;;  %719 = vmatpush.bf16.msra.mxu2 %v2348_v44  ;;  %v2476_v31 = vor.u32 %v2602_v28, %v2475_v27  ;;  %v2365_v27 = vld [vmem:[%s3765_s4 + $0x9c] sm:$0xf0]  ;;  %v2371_v28 = vld [vmem:[%s3765_s4 + $0x88] sm:$0xf] }
 0x168   :  { %737 = vmatpush.bf16.msra.mxu3 %v2380_v32  ;;  %v2599_v32 = vld [vmem:[%s3765_s4 + $0x164] sm:$0xf] }
 0x16a   :  { %756 = vmatpush.bf16.msrb.mxu0 %v2384_v33  ;;  %v2477_v33 = vld [vmem:[%s3765_s4 + $0x17c] sm:$0xf0] }
 0x16b   :  { %720 = vmatpush.bf16.msra.mxu2 %v2320_v57  ;;  %v2480_v43 = vor.u32 %v2599_v32, %v2477_v33  ;;  %v2419_v57 = vld [vmem:[%s3765_s4 + $0xf0] sm:$0xf]  ;;  %v2335_v32 = vld [vmem:[%s3765_s4 + $0x48] sm:$0xf]  ;;  %v2567_v33 = vld [vmem:[%s3765_s4 + $0x60] sm:$0xf0] }
 0x16c   :  { %738 = vmatpush.bf16.msra.mxu3 %v2352_v49  ;;  %v2420_v4 = vor.u32 %v2588_v58, %v2419_v57  ;;  %v2308_v58 = vor.u32 %v2560_v47, %v2307_v46 }
 0x16d   :  { %320 = vrot.lane.b32.xlu2 %v313_v38, %s2677_s0  ;;  %317 = vrot.lane.b32.xlu1 %v313_v38, %s2678_s30 }
 0x16e   :  { %314 = vrot.lane.b32.xlu0 %v313_v38, %s2679_s9  ;;  %v2577_v38 = vld [vmem:[%s3765_s4 + $0xb4] sm:$0xf]  ;;  %757 = vmatpush.bf16.msrb.mxu0 %v2356_v50  ;;  %v2455_v50 = vld [vmem:[%s3765_s4 + $0x130] sm:$0xf] }
 0x16f   :  { %v2388_v40 = vor.u32 %v2577_v38, %v2385_v39  ;;  %721 = vmatpush.bf16.msra.mxu2 %v2292_v6  ;;  %v2483_v38 = vld [vmem:[%s3765_s4 + $0x168] sm:$0xf]  ;;  %v2603_v39 = vld [vmem:[%s3765_s4 + $0x180] sm:$0xf0] }
 0x170   :  { %739 = vmatpush.bf16.msra.mxu3 %v2324_v61  ;;  %v3090_v44 = vor.u32 %v2603_v39, %v2483_v38  ;;  %v2421_v61 = vld [vmem:[%s3765_s4 + $0x10c] sm:$0xf0]  ;;  %v2564_v39 = vld [vmem:[%s3765_s4 + $0x4c] sm:$0xf] }
 0x171   :  { %775 = vmatpush.bf16.msrb.mxu1 %v2388_v40  ;;  %v2447_v40 = vld [vmem:[%s3765_s4 + $0x128] sm:$0xf] }
 0x172   :  { %758 = vmatpush.bf16.msrb.mxu0 %v2328_v62 }
 0x174   :  { %740 = vmatpush.bf16.msra.mxu3 %v2296_v12  ;;  %v2578_v12 = vld [vmem:[%s3765_s4 + $0xbc] sm:$0xf] }
 0x175   :  { %776 = vmatpush.bf16.msrb.mxu1 %v2360_v53  ;;  %v2448_v53 = vor.u32 %v2595_v41, %v2447_v40  ;;  %v2337_v40 = vld [vmem:[%s3765_s4 + $0x64] sm:$0xf0]  ;;  %v2336_v41 = vor.u32 %v2567_v33, %v2335_v32 }
 0x176   :  { %759 = vmatpush.bf16.msrb.mxu0 %v2300_v13 }
 0x178   :  { %809 = vmatpush.bf16.msrb.mxu3 %v2508_v25  ;;  %v2571_v25 = vld [vmem:[%s3765_s4 + $0x84] sm:$0xf] }
 0x179   :  { %777 = vmatpush.bf16.msrb.mxu1 %v2332_v1  ;;  %v2427_v1 = vld [vmem:[%s3765_s4 + $0xf8] sm:$0xf] }
 0x17a   :  { %828 = vmatpush.bf16.msra.mxu0 %v3062_v26  ;;  %v3138_v7 = vor.u32 %v2589_v2, %v2427_v1 }
 0x17c   :  { %810 = vmatpush.bf16.msrb.mxu3 %v2480_v43  ;;  %v2568_v43 = vld [vmem:[%s3765_s4 + $0x68] sm:$0xf0] }
 0x17d   :  { %778 = vmatpush.bf16.msrb.mxu1 %v2304_v17 }
 0x17e   :  { %829 = vmatpush.bf16.msra.mxu0 %v3090_v44 }
 0x180   :  { %811 = vmatpush.bf16.msrb.mxu3 %v2452_v56  ;;  %v2309_v56 = vld [vmem:[%s3765_s4 + $0x2c] sm:$0xf0] }
 0x1bf   :  { %v304_v10 = vpop.permute.xlu2 %303 }
 0x1c7   :  { %v321_v54 = vpop.permute.xlu2 %320 }
 0x1d7   :  { %v301_v5 = vpop.permute.xlu1 %300 }
 0x1d8   :  { %v298_v11 = vpop.permute.xlu0 %297 }
 0x1d9   :  { %v307_v16 = vsel %vm306_vm4, %v2833_v30, %v298_v11  ;;  %v2504_v30 = vor.u32 %v2609_v20, %v2503_v19  ;;  %v2581_v11 = vld [vmem:[%s3765_s4 + $0xd0] sm:$0xf0]  ;;  %v2399_v19 = vld [vmem:[%s3765_s4 + $0xc0] sm:$0xf] }
 0x1da   :  { %v309_v18 = vsel %vm308_vm5, %v307_v16, %v301_v5  ;;  %v3173_v23 = vor.u32 %v2582_v21, %v2399_v19 }
 0x1db   :  { %v311_v29 = vsel %vm310_vm6, %v309_v18, %v304_v10  ;;  %790 = vmatpush.bf16.msrb.mxu2 %v2504_v30  ;;  %v2393_v18 = vld [vmem:[%s3765_s4 + $0xd4] sm:$0xf0]  ;;  %v2363_v30 = vld [vmem:[%s3765_s4 + $0x80] sm:$0xf] }
 0x1dc   :  { %v326_v48 = vperm.slane %v311_v29, 0  ;;  %v2396_v20 = vor.u32 %v2578_v12, %v2393_v18  ;;  %v2364_v24 = vor.u32 %v2574_v22, %v2363_v30  ;;  %v2368_v29 = vor.u32 %v2571_v25, %v2365_v27 }
 0x1de   :  { %v327_v62 = vmul.f32 %v326_v48, %v2806_v35  ;;  %v328_v63 = vmul.f32 %v326_v48, %v2804_v34  ;;  %v329_v3 = vmul.f32 %v326_v48, %v2808_v36  ;;  %v330_v5 = vmul.f32 %v326_v48, %v2819_v45  ;;  %v2391_v45 = vld [vmem:[%s3765_s4 + $0xb8] sm:$0xf] }
 0x1df   :  { %v318_v42 = vpop.permute.xlu1 %317  ;;  %791 = vmatpush.bf16.msrb.mxu2 %v2476_v31  ;;  %v2424_v34 = vor.u32 %v2585_v60, %v2421_v61  ;;  %v2392_v15 = vor.u32 %v2581_v11, %v2391_v45  ;;  %v2575_v31 = vld [vmem:[%s3765_s4 + $0xa0] sm:$0xf0]  ;;  %v2561_v60 = vld [vmem:[%s3765_s4 + $0x30] sm:$0xf0] }
 0x1e0   :  { %v315_v49 = vpop.permute.xlu0 %314  ;;  %v2372_v38 = vor.u32 %v2575_v31, %v2371_v28 }
 0x1e1   :  { %v323_v52 = vsel %vm306_vm4, %v2843_v37, %v315_v49  ;;  %v3115_v37 = vor.u32 %v2596_v51, %v2455_v50  ;;  %812 = vmatpush.bf16.msrb.mxu3 %v2424_v34  ;;  %v2340_v51 = vor.u32 %v2564_v39, %v2337_v40 }
 0x1e2   :  { %v324_v55 = vsel %vm308_vm5, %v323_v52, %v318_v42  ;;  %v2343_v42 = vld [vmem:[%s3765_s4 + $0x50] sm:$0xf] }
 0x1e3   :  { %v325_v59 = vsel %vm310_vm6, %v324_v55, %v321_v54  ;;  %792 = vmatpush.bf16.msrb.mxu2 %v2448_v53  ;;  %830 = vmatpush.bf16.msra.mxu0 %v3115_v37  ;;  %v2344_v54 = vor.u32 %v2568_v43, %v2343_v42  ;;  %v2557_v55 = vld [vmem:[%s3765_s4 + $0x14] sm:$0xf] }
 0x1e4   :  { %v331_v0 = vperm.slane %v325_v59, 0  ;;  %v2315_v59 = vld [vmem:[%s3765_s4 + $0x18] sm:$0xf]  ;;  %s2682_s4 = smov 112  }
 0x1e5   :  { %813 = vmatpush.bf16.msrb.mxu3 %v2396_v20  ;;  %v2316_v1 = vor.u32 %v2561_v60, %v2315_v59 }
 0x1e6   :  { %v3133_v6 = vadd.f32 %v331_v0, %v327_v62  ;;  %v3135_v35 = vadd.f32 %v331_v0, %v328_v63  ;;  %v3140_v8 = vadd.f32 %v331_v0, %v329_v3  ;;  %v3142_v9 = vadd.f32 %v331_v0, %v330_v5 }
 0x1e7   :  { %793 = vmatpush.bf16.msrb.mxu2 %v2420_v4  ;;  %831 = vmatpush.bf16.msra.mxu0 %v3138_v7  ;;  %v2312_v0 = vor.u32 %v2557_v55, %v2309_v56 }
 0x1e8   :  { %v340_v36 = vmin.f32 %v3133_v6, 0.0  ;;  %v341_v10 = vmin.f32 %v3135_v35, 0.0  ;;  %v342_v16 = vmin.f32 %v3140_v8, 0.0  ;;  %v343_v17 = vmin.f32 %v3142_v9, 0.0 }
 0x1e9   :  { %814 = vmatpush.bf16.msrb.mxu3 %v2368_v29  ;;  %vm336_vm7 = vcmp.gt.f32.partialorder %v3133_v6, 0.0  ;;  %vm337_vm8 = vcmp.gt.f32.partialorder %v3135_v35, 0.0  ;;  %vm338_vm9 = vcmp.gt.f32.partialorder %v3140_v8, 0.0  ;;  %vm339_vm10 = vcmp.gt.f32.partialorder %v3142_v9, 0.0 }
 0x1ea   :  { %v344_v13 = vmul.f32 1.442695, %v340_v36  ;;  %v346_v14 = vmul.f32 1.442695, %v341_v10  ;;  %v348_v49 = vmul.f32 1.442695, %v342_v16 }
 0x1eb   :  { %794 = vmatpush.bf16.msrb.mxu2 %v2392_v15  ;;  %832 = vmatpush.bf16.msra.mxu0 %v3173_v23  ;;  %v350_v50 = vmul.f32 1.442695, %v343_v17 }
 0x1ec   :  { %2641 = vpow2.f32 %v344_v13 }
 0x1ed   :  { %2643 = vpow2.f32 %v346_v14  ;;  %815 = vmatpush.bf16.msrb.mxu3 %v2340_v51 }
 0x1ee   :  { %2645 = vpow2.f32 %v348_v49 }
 0x1ef   :  { %795 = vmatpush.bf16.msrb.mxu2 %v2364_v24  ;;  %833 = vmatpush.bf16.msra.mxu0 %v2372_v38  ;;  %2647 = vpow2.f32 %v350_v50 }
 0x1f1   :  { %816 = vmatpush.bf16.msrb.mxu3 %v2312_v0 }
 0x1f2   :  { %v2642_v48 = vpop.eup %2641 }
 0x1f3   :  { %v2644_v52 = vpop.eup %2643  ;;  %v2285_v53 = vadd.f32 -1.0, %v2642_v48  ;;  %796 = vmatpush.bf16.msrb.mxu2 %v2336_v41  ;;  %834 = vmatpush.bf16.msra.mxu0 %v2344_v54 }
 0x1f4   :  { %v2286_v57 = vadd.f32 -1.0, %v2644_v52  ;;  %v2646_v2 = vpop.eup %2645 }
 0x1f5   :  { %v356_v61 = vsel %vm336_vm7, %v3133_v6, %v2285_v53  ;;  %v2648_v3 = vpop.eup %2647  ;;  %v2287_v4 = vadd.f32 -1.0, %v2646_v2 }
 0x1f6   :  { %v357_v62 = vsel %vm337_vm8, %v3135_v35, %v2286_v57  ;;  %v2288_v5 = vadd.f32 -1.0, %v2648_v3 }
 0x1f7   :  { %v360_v63 = vpack.c.bf16 %v357_v62, %v356_v61  ;;  %797 = vmatpush.bf16.msrb.mxu2 %v2308_v58  ;;  %835 = vmatpush.bf16.msra.mxu0 %v2316_v1  ;;  %v358_v6 = vsel %vm338_vm9, %v3140_v8, %v2287_v4  ;;  %v2681_v8 = vmov 0.0  }
 0x1f8   :  { %v359_v35 = vsel %vm339_vm10, %v3142_v9, %v2288_v5  ;;  %1030 = vst.msk [vmem:[#allocation3 + $0x8] sm:$0x3f] %vm1028_vm12, %v2681_v8 }
 0x1f9   :  { %722 = vmatmul.bf16.vlgmr.msra.gmra.mxu2 %v360_v63  ;;  %741 = vmatmul.bf16.vlgmr.msra.gmra.mxu3 %v360_v63  ;;  %v361_v34 = vpack.c.bf16 %v359_v35, %v358_v6  ;;  %1029 = vst.msk [vmem:[#allocation3] sm:$0x3f] %vm1028_vm12, %v2681_v8 }
 0x1fa   :  { %760 = vmatmul.bf16.vlgmr.msrb.gmra.mxu0 %v360_v63  ;;  %779 = vmatmul.bf16.vlgmr.msrb.gmra.mxu1 %v360_v63  ;;  %1031 = vst.msk [vmem:[#allocation3 + $0x10] sm:$0x3f] %vm1028_vm12, %v2681_v8 }
 0x1fb   :  { %2615 = vmatpush.bf16.msra.mxu2 %v3062_v26  ;;  %1032 = vst.msk [vmem:[#allocation3 + $0x18] sm:$0x3f] %vm1028_vm12, %v2681_v8 }
 0x1fc   :  { %1033 = vst.msk [vmem:[#allocation3 + $0x20] sm:$0x3f] %vm1028_vm12, %v2681_v8 }
 0x1fd   :  { %1034 = vst.msk [vmem:[#allocation3 + $0x28] sm:$0x3f] %vm1028_vm12, %v2681_v8 }
 0x1fe   :  { %1035 = vst.msk [vmem:[#allocation3 + $0x30] sm:$0x3f] %vm1028_vm12, %v2681_v8 }
 0x1ff   :  { %2616 = vmatpush.bf16.msra.mxu2 %v3090_v44  ;;  %v1042_v24 = vld [vmem:[#allocation3 + $0x8] sm:$0xf]  ;;  %1036 = vst.msk [vmem:[#allocation3 + $0x38] sm:$0x3f] %vm1028_vm12, %v2681_v8 }
 0x200   :  { %1037 = vst.msk [vmem:[#allocation3 + $0x40] sm:$0x3f] %vm1028_vm12, %v2681_v8 }
 0x201   :  { %1038 = vst.msk [vmem:[#allocation3 + $0x48] sm:$0x3f] %vm1028_vm12, %v2681_v8 }
 0x202   :  { %1039 = vst.msk [vmem:[#allocation3 + $0x50] sm:$0x3f] %vm1028_vm12, %v2681_v8 }
 0x203   :  { %2617 = vmatpush.bf16.msra.mxu2 %v3115_v37  ;;  %1040 = vst.msk [vmem:[#allocation3 + $0x58] sm:$0x3f] %vm1028_vm12, %v2681_v8 }
 0x207   :  { %2618 = vmatpush.bf16.msra.mxu2 %v3138_v7 }
 0x209   :  { %727 = vmatmul.bf16.gmra.mxu2 %v361_v34  ;;  %746 = vmatmul.bf16.gmra.mxu3 %v361_v34 }
 0x20a   :  { %765 = vmatmul.bf16.gmra.mxu0 %v361_v34  ;;  %784 = vmatmul.bf16.gmra.mxu1 %v361_v34 }
 0x20b   :  { %2619 = vmatpush.bf16.msra.mxu2 %v3173_v23 }
 0x20f   :  { %2620 = vmatpush.bf16.msra.mxu2 %v2372_v38 }
 0x213   :  { %2621 = vmatpush.bf16.msra.mxu2 %v2344_v54 }
 0x217   :  { %2622 = vmatpush.bf16.msra.mxu2 %v2316_v1 }
 0x219   :  { %798 = vmatmul.bf16.vlgmr.msrb.gmra.mxu2 %v360_v63  ;;  %817 = vmatmul.bf16.vlgmr.msrb.gmra.mxu3 %v360_v63 }
 0x21a   :  { %836 = vmatmul.bf16.vlgmr.msra.gmra.mxu0 %v360_v63 }
 0x229   :  { %803 = vmatmul.bf16.gmra.mxu2 %v361_v34  ;;  %822 = vmatmul.bf16.gmra.mxu3 %v361_v34 }
 0x239   :  { %841 = vmatmul.bf16.vlgmr.msra.gmra.mxu2 %v361_v34 }
 0x277   :  { %v761_v26 = vpop.f32.mrf.mxu0  ;;  %v780_v44 = vpop.f32.mrf.mxu1 }
 0x278   :  { %871 = vst.sshfl [vmem:[#allocation1 + $0x10] sm:$0xff pattern:$0x75316420] %v761_v26  ;;  %v854_v37 = vrot.slane %v780_v44, 4 }
 0x279   :  { %872 = vst.sshfl [vmem:[#allocation1 + $0x18] sm:$0xff pattern:$0x75316420] %v780_v44 }
 0x27a   :  { %v858_v7 = vsel %vm856_vm11, %v761_v26, %v854_v37 }
 0x27b   :  { %864 = vst [vmem:[#allocation2 + $0x8] sm:$0xff] %v858_v7 }
 0x27c   :  { %v723_v9 = vpop.f32.mrf.mxu2  ;;  %v742_v36 = vpop.f32.mrf.mxu3 }
 0x27d   :  { %869 = vst.sshfl [vmem:[#allocation1] sm:$0xff pattern:$0x75316420] %v723_v9  ;;  %v853_v10 = vrot.slane %v742_v36, 4 }
 0x27e   :  { %870 = vst.sshfl [vmem:[#allocation1 + $0x8] sm:$0xff pattern:$0x75316420] %v742_v36 }
 0x27f   :  { %v3243_v45 = vsel %vm856_vm11, %v723_v9, %v853_v10  ;;  %v763_v11 = vpop.f32.mrf.mxu0  ;;  %v782_v12 = vpop.f32.mrf.mxu1 }
 0x280   :  { %863 = vst [vmem:[#allocation2] sm:$0xff] %v3243_v45  ;;  %v879_v13 = vld [vmem:[#allocation1 + $0x11] ss:$2 sm:$0xff]  ;;  %v900_v14 = vrot.slane %v782_v12, 4 }
 0x281   :  { %890 = vst [vmem:[#allocation2 + $0x24] sm:$0xff] %v879_v13 }
 0x282   :  { %v903_v15 = vsel %vm856_vm11, %v763_v11, %v900_v14  ;;  %916 = vst.sshfl [vmem:[#allocation1 + $0x10] sm:$0xff pattern:$0x75316420] %v763_v11 }
 0x283   :  { %910 = vst [vmem:[#allocation2 + $0x40] sm:$0xff] %v903_v15 }
 0x284   :  { %v725_v16 = vpop.f32.mrf.mxu2  ;;  %v744_v17 = vpop.f32.mrf.mxu3  ;;  %917 = vst.sshfl [vmem:[#allocation1 + $0x18] sm:$0xff pattern:$0x75316420] %v782_v12 }
 0x285   :  { %v877_v18 = vld [vmem:[#allocation1 + $0x1] ss:$2 sm:$0xff]  ;;  %v899_v19 = vrot.slane %v744_v17, 4 }
 0x286   :  { %889 = vst [vmem:[#allocation2 + $0x1c] sm:$0xff] %v877_v18 }
 0x287   :  { %914 = vst.sshfl [vmem:[#allocation1] sm:$0xff pattern:$0x75316420] %v725_v16  ;;  %v3252_v20 = vsel %vm856_vm11, %v725_v16, %v899_v19  ;;  %v766_v21 = vpop.f32.mrf.mxu0  ;;  %v785_v30 = vpop.f32.mrf.mxu1  ;;  %v1196_v36 = vld [vmem:[#allocation2 + $0x4] sm:$0xff] }
 0x288   :  { %909 = vst [vmem:[#allocation2 + $0x38] sm:$0xff] %v3252_v20  ;;  %v945_v22 = vrot.slane %v785_v30, 4 }
 0x289   :  { %915 = vst.sshfl [vmem:[#allocation1 + $0x8] sm:$0xff pattern:$0x75316420] %v744_v17 }
 0x28a   :  { %v948_v23 = vsel %vm856_vm11, %v766_v21, %v945_v22 }
 0x28b   :  { %955 = vst [vmem:[#allocation2 + $0x78] sm:$0xff] %v948_v23  ;;  %v924_v25 = vld [vmem:[#allocation1 + $0x11] ss:$2 sm:$0xff] }
 0x28c   :  { %v728_v27 = vpop.f32.mrf.mxu2  ;;  %v747_v28 = vpop.f32.mrf.mxu3  ;;  %935 = vst [vmem:[#allocation2 + $0x5c] sm:$0xff] %v924_v25 }
 0x28d   :  { %v944_v29 = vrot.slane %v747_v28, 4  ;;  %v1050_v31 = vld [vmem:[#allocation2 + $0x1c] sm:$0xf]  ;;  %961 = vst.sshfl [vmem:[#allocation1 + $0x10] sm:$0xff pattern:$0x75316420] %v766_v21 }
 0x28e   :  { %v1058_v32 = vadd.f32 %v1050_v31, %v1042_v24  ;;  %962 = vst.sshfl [vmem:[#allocation1 + $0x18] sm:$0xff pattern:$0x75316420] %v785_v30  ;;  %v1197_v34 = vld [vmem:[#allocation2 + $0x20] sm:$0xff] }
 0x28f   :  { %v947_v33 = vsel %vm856_vm11, %v728_v27, %v944_v29  ;;  %v787_v38 = vpop.f32.mrf.mxu1  ;;  %v768_v41 = vpop.f32.mrf.mxu0  ;;  %v1313_v30 = vld [vmem:[#allocation2 + $0x24] sm:$0xf]  ;;  %v1049_v31 = vld [vmem:[#allocation2] sm:$0xf] }
 0x290   :  { %v3261_v39 = vld [vmem:[#allocation1 + $0x1] ss:$2 sm:$0xff]  ;;  %954 = vst [vmem:[#allocation2 + $0x70] sm:$0xff] %v947_v33  ;;  %v990_v40 = vrot.slane %v787_v38, 4 }
 0x291   :  { %934 = vst [vmem:[#allocation2 + $0x54] sm:$0xff] %v3261_v39 }
 0x292   :  { %v993_v42 = vsel %vm856_vm11, %v768_v41, %v990_v40  ;;  %1066 = vst.msk [vmem:[#allocation3 + $0x8] sm:$0xf] %vm866_vm13, %v1058_v32 }
 0x293   :  { %959 = vst.sshfl [vmem:[#allocation1] sm:$0xff pattern:$0x75316420] %v728_v27 }
 0x294   :  { %960 = vst.sshfl [vmem:[#allocation1 + $0x8] sm:$0xff pattern:$0x75316420] %v747_v28  ;;  %v730_v43 = vpop.f32.mrf.mxu2  ;;  %v749_v46 = vpop.f32.mrf.mxu3  ;;  %v1041_v28 = vld [vmem:[#allocation3] sm:$0xf] }
 0x295   :  { %1000 = vst [vmem:[#allocation2 + $0xb0] sm:$0xff] %v993_v42  ;;  %v989_v47 = vrot.slane %v749_v46, 4  ;;  %v969_v48 = vld [vmem:[#allocation1 + $0x11] ss:$2 sm:$0xff]  ;;  %v1057_v40 = vadd.f32 %v1049_v31, %v1041_v28 }
 0x296   :  { %980 = vst [vmem:[#allocation2 + $0x94] sm:$0xff] %v969_v48 }
 0x297   :  { %1006 = vst.sshfl [vmem:[#allocation1 + $0x10] sm:$0xff pattern:$0x75316420] %v768_v41  ;;  %v3269_v49 = vsel %vm856_vm11, %v730_v43, %v989_v47  ;;  %v837_v51 = vpop.f32.mrf.mxu0  ;;  %v1200_v24 = vld [vmem:[#allocation2 + $0x74] sm:$0xff]  ;;  %v1312_v41 = vld [vmem:[#allocation2 + $0x8] sm:$0xf] }
 0x298   :  { %1007 = vst.sshfl [vmem:[#allocation1 + $0x18] sm:$0xff pattern:$0x75316420] %v787_v38 }
 0x299   :  { %1101 = vst [vmem:[#allocation1 + $0x10] ss:$2 sm:$0xff] %v877_v18 }
 0x29a   :  { %999 = vst [vmem:[#allocation2 + $0xa8] sm:$0xff] %v3269_v49 }
 0x29b   :  { %v967_v50 = vld [vmem:[#allocation1 + $0x1] ss:$2 sm:$0xff]  ;;  %867 = vst.msk [vmem:[#allocation2 + $0x18] sm:$0xf] %vm866_vm13, %v837_v51 }
 0x29c   :  { %979 = vst [vmem:[#allocation2 + $0x8c] sm:$0xff] %v967_v50  ;;  %v799_v52 = vpop.f32.mrf.mxu2  ;;  %v818_v53 = vpop.f32.mrf.mxu3 }
 0x29d   :  { %1004 = vst.sshfl [vmem:[#allocation1] sm:$0xff pattern:$0x75316420] %v730_v43  ;;  %v855_v54 = vrot.slane %v818_v53, 4  ;;  %v1317_v32 = vld [vmem:[#allocation2 + $0x94] sm:$0xf] }
 0x29e   :  { %1005 = vst.sshfl [vmem:[#allocation1 + $0x8] sm:$0xff pattern:$0x75316420] %v749_v46 }
 0x29f   :  { %v1014_v55 = vld [vmem:[#allocation1 + $0x11] ss:$2 sm:$0xff]  ;;  %1097 = vst [vmem:[#allocation1] ss:$2 sm:$0xff] %v3243_v45  ;;  %v3277_v58 = vsel %vm856_vm11, %v799_v52, %v855_v54  ;;  %v839_v2 = vpop.f32.mrf.mxu0 }
 0x2a0   :  { %1025 = vst [vmem:[#allocation2 + $0xcc] sm:$0xff] %v1014_v55  ;;  %v1102_v56 = vld.sshfl [vmem:[#allocation1 + $0x10] sm:$0xff pattern:$0x75316420] }
 0x2a1   :  { %v1103_v57 = vld.sshfl [vmem:[#allocation1 + $0x18] sm:$0xff pattern:$0x75316420]  ;;  %1128 = vrot.lane.b32.xlu1 %v1102_v56, %s2679_s9  ;;  %875 = vst.sshfl [vmem:[#allocation1 + $0x30] sm:$0xff pattern:$0x75316420] %v837_v51 }
 0x2a2   :  { %1115 = vst [vmem:[#allocation1 + $0x10] ss:$2 sm:$0xff] %v967_v50  ;;  %1130 = vrot.lane.b32.xlu2 %v1103_v57, %s2679_s9  ;;  %v1045_v51 = vld [vmem:[#allocation3 + $0x30] sm:$0xf] }
 0x2a3   :  { %873 = vst.sshfl [vmem:[#allocation1 + $0x20] sm:$0xff pattern:$0x75316420] %v799_v52  ;;  %v1201_v14 = vld [vmem:[#allocation2 + $0x90] sm:$0xff]  ;;  %v1054_v46 = vld [vmem:[#allocation2 + $0x8c] sm:$0xf] }
 0x2a4   :  { %v801_v59 = vpop.f32.mrf.mxu2  ;;  %v820_v60 = vpop.f32.mrf.mxu3  ;;  %865 = vst [vmem:[#allocation2 + $0x10] sm:$0xff] %v3277_v58  ;;  %v1316_v52 = vld [vmem:[#allocation2 + $0x78] sm:$0xf] }
 0x2a5   :  { %v901_v61 = vrot.slane %v820_v60, 4  ;;  %v3279_v62 = vld [vmem:[#allocation1 + $0x1] ss:$2 sm:$0xff]  ;;  %874 = vst.sshfl [vmem:[#allocation1 + $0x28] sm:$0xff pattern:$0x75316420] %v818_v53 }
 0x2a6   :  { %1024 = vst [vmem:[#allocation2 + $0xc4] sm:$0xff] %v3279_v62  ;;  %v1098_v63 = vld.sshfl [vmem:[#allocation1] sm:$0xff pattern:$0x75316420]  ;;  %v1053_v53 = vld [vmem:[#allocation2 + $0x70] sm:$0xf] }
 0x2a7   :  { %v3284_v0 = vsel %vm856_vm11, %v801_v59, %v901_v61  ;;  %v1099_v1 = vld.sshfl [vmem:[#allocation1 + $0x8] sm:$0xff pattern:$0x75316420]  ;;  %1124 = vrot.lane.b32.xlu0 %v1098_v63, %s2679_s9  ;;  %912 = vst.msk [vmem:[#allocation2 + $0x50] sm:$0xf] %vm866_vm13, %v839_v2 }
 0x2a8   :  { %911 = vst [vmem:[#allocation2 + $0x48] sm:$0xff] %v3284_v0  ;;  %v883_v4 = vld [vmem:[#allocation1 + $0x31] ss:$2 sm:$0xff]  ;;  %v1198_v61 = vld [vmem:[#allocation2 + $0x3c] sm:$0xff] }
 0x2a9   :  { %1112 = vst [vmem:[#allocation1] ss:$2 sm:$0xff] %v947_v33  ;;  %1126 = vrot.lane.b32.xlu1 %v1099_v1, %s2679_s9  ;;  %v1116_v3 = vld.sshfl [vmem:[#allocation1 + $0x10] sm:$0xff pattern:$0x75316420] }
 0x2aa   :  { %892 = vst.msk [vmem:[#allocation2 + $0x34] sm:$0xf] %vm866_vm13, %v883_v4  ;;  %v1117_v5 = vld.sshfl [vmem:[#allocation1 + $0x18] sm:$0xff pattern:$0x75316420] }
 0x2ab   :  { %920 = vst.sshfl [vmem:[#allocation1 + $0x30] sm:$0xff pattern:$0x75316420] %v839_v2 }
 0x2ac   :  { %v804_v6 = vpop.f32.mrf.mxu2  ;;  %v823_v35 = vpop.f32.mrf.mxu3  ;;  %1216 = vst [vmem:[#allocation1 + $0x10] ss:$2 sm:$0xff] %v1197_v34  ;;  %v3297_v7 = vld [vmem:[#allocation1 + $0x21] ss:$2 sm:$0xff] }
 0x2ad   :  { %v946_v26 = vrot.slane %v823_v35, 4  ;;  %891 = vst [vmem:[#allocation2 + $0x2c] sm:$0xff] %v3297_v7  ;;  %v1199_v34 = vld [vmem:[#allocation2 + $0x58] sm:$0xff]  ;;  %v1056_v31 = vld [vmem:[#allocation2 + $0xc4] sm:$0xf] }
 0x2ae   :  { %918 = vst.sshfl [vmem:[#allocation1 + $0x20] sm:$0xff pattern:$0x75316420] %v801_v59  ;;  %v1051_v59 = vld [vmem:[#allocation2 + $0x38] sm:$0xf] }
 0x2af   :  { %1144 = vrot.lane.b32.xlu0 %v1116_v3, %s2679_s9  ;;  %v3295_v37 = vsel %vm856_vm11, %v804_v6, %v946_v26  ;;  %919 = vst.sshfl [vmem:[#allocation1 + $0x28] sm:$0xff pattern:$0x75316420] %v820_v60  ;;  %v1043_v60 = vld [vmem:[#allocation3 + $0x10] sm:$0xf] }
 0x2b0   :  { %v1113_v44 = vld.sshfl [vmem:[#allocation1] sm:$0xff pattern:$0x75316420]  ;;  %956 = vst [vmem:[#allocation2 + $0x80] sm:$0xff] %v3295_v37  ;;  %v1059_v2 = vadd.f32 %v1051_v59, %v1043_v60 }
 0x2b1   :  { %1140 = vrot.lane.b32.xlu2 %v1113_v44, %s2679_s9  ;;  %1146 = vrot.lane.b32.xlu1 %v1117_v5, %s2679_s9  ;;  %v1114_v9 = vld.sshfl [vmem:[#allocation1 + $0x8] sm:$0xff pattern:$0x75316420]  ;;  %1065 = vst.msk [vmem:[#allocation3] sm:$0xf] %vm866_vm13, %v1057_v40  ;;  %v1202_v44 = vld [vmem:[#allocation2 + $0xac] sm:$0xff] }
 0x2b2   :  { %v928_v11 = vld [vmem:[#allocation1 + $0x31] ss:$2 sm:$0xff]  ;;  %1212 = vst [vmem:[#allocation1] ss:$2 sm:$0xff] %v1196_v36 }
 0x2b3   :  { %v1217_v12 = vld.sshfl [vmem:[#allocation1 + $0x10] sm:$0xff pattern:$0x75316420]  ;;  %v1218_v15 = vld.sshfl [vmem:[#allocation1 + $0x18] sm:$0xff pattern:$0x75316420] }
 0x2b4   :  { %v806_v10 = vpop.f32.mrf.mxu2  ;;  %v825_v45 = vpop.f32.mrf.mxu3  ;;  %937 = vst.msk [vmem:[#allocation2 + $0x6c] sm:$0xf] %vm866_vm13, %v928_v11  ;;  %v1428_v50 = vld [vmem:[#allocation2 + $0x28] sm:$0xff] }
 0x2b5   :  { %v991_v13 = vrot.slane %v825_v45, 4  ;;  %1230 = vst [vmem:[#allocation1 + $0x10] ss:$2 sm:$0xff] %v1201_v14  ;;  %v1203_v14 = vld [vmem:[#allocation2 + $0xc8] sm:$0xff] }
 0x2b6   :  { %v3314_v17 = vld [vmem:[#allocation1 + $0x21] ss:$2 sm:$0xff]  ;;  %1067 = vst.msk [vmem:[#allocation3 + $0x10] sm:$0xf] %vm866_vm13, %v1059_v2 }
 0x2b7   :  { %v3305_v16 = vsel %vm856_vm11, %v806_v10, %v991_v13  ;;  %1142 = vrot.lane.b32.xlu0 %v1114_v9, %s2679_s9  ;;  %936 = vst [vmem:[#allocation2 + $0x64] sm:$0xff] %v3314_v17  ;;  %v1431_v11 = vld [vmem:[#allocation2 + $0x7c] sm:$0xff]  ;;  %v1662_v59 = vld [vmem:[#allocation2 + $0x84] sm:$0xf] }
 0x2b8   :  { %1001 = vst [vmem:[#allocation2 + $0xb8] sm:$0xff] %v3305_v16 }
 0x2b9   :  { %1243 = vrot.lane.b32.xlu2 %v1217_v12, %s2678_s30  ;;  %v1214_v18 = vld.sshfl [vmem:[#allocation1 + $0x8] sm:$0xff pattern:$0x75316420]  ;;  %963 = vst.sshfl [vmem:[#allocation1 + $0x20] sm:$0xff pattern:$0x75316420] %v804_v6 }
 0x2ba   :  { %1241 = vrot.lane.b32.xlu1 %v1214_v18, %s2678_s30  ;;  %964 = vst.sshfl [vmem:[#allocation1 + $0x28] sm:$0xff pattern:$0x75316420] %v823_v35  ;;  %v1213_v23 = vld.sshfl [vmem:[#allocation1] sm:$0xff pattern:$0x75316420] }
 0x2bb   :  { %1227 = vst [vmem:[#allocation1] ss:$2 sm:$0xff] %v1200_v24  ;;  %v1427_v6 = vld [vmem:[#allocation2 + $0xc] sm:$0xff]  ;;  %v1052_v24 = vld [vmem:[#allocation2 + $0x54] sm:$0xf] }
 0x2bc   :  { %v842_v19 = vpop.f32.mrf.mxu2  ;;  %v1232_v21 = vld.sshfl [vmem:[#allocation1 + $0x18] sm:$0xff pattern:$0x75316420]  ;;  %v1231_v22 = vld.sshfl [vmem:[#allocation1 + $0x10] sm:$0xff pattern:$0x75316420] }
 0x2bd   :  { %1331 = vst [vmem:[#allocation1 + $0x10] ss:$2 sm:$0xff] %v1313_v30 }
 0x2be   :  { %957 = vst.msk [vmem:[#allocation2 + $0x88] sm:$0xf] %vm866_vm13, %v842_v19 }
 0x2bf   :  { %1245 = vrot.lane.b32.xlu0 %v1218_v15, %s2678_s30  ;;  %965 = vst.sshfl [vmem:[#allocation1 + $0x30] sm:$0xff pattern:$0x75316420] %v842_v19  ;;  %v1314_v19 = vld [vmem:[#allocation2 + $0x40] sm:$0xf]  ;;  %v1433_v2 = vld [vmem:[#allocation2 + $0xb4] sm:$0xff] }
 0x2c1   :  { %1261 = vrot.lane.b32.xlu2 %v1232_v21, %s2678_s30  ;;  %v3325_v27 = vld [vmem:[#allocation1 + $0x21] ss:$2 sm:$0xff]  ;;  %v1055_v21 = vld [vmem:[#allocation2 + $0xa8] sm:$0xf] }
 0x2c2   :  { %1259 = vrot.lane.b32.xlu1 %v1231_v22, %s2678_s30  ;;  %981 = vst [vmem:[#allocation2 + $0x9c] sm:$0xff] %v3325_v27  ;;  %v1228_v8 = vld.sshfl [vmem:[#allocation1] sm:$0xff pattern:$0x75316420] }
 0x2c3   :  { %1008 = vst.sshfl [vmem:[#allocation1 + $0x20] sm:$0xff pattern:$0x75316420] %v806_v10  ;;  %v1229_v38 = vld.sshfl [vmem:[#allocation1 + $0x8] sm:$0xff pattern:$0x75316420] }
 0x2c4   :  { %v844_v25 = vpop.f32.mrf.mxu2  ;;  %v1332_v29 = vld.sshfl [vmem:[#allocation1 + $0x10] sm:$0xff pattern:$0x75316420]  ;;  %1009 = vst.sshfl [vmem:[#allocation1 + $0x28] sm:$0xff pattern:$0x75316420] %v825_v45 }
 0x2c5   :  { %1002 = vst.msk [vmem:[#allocation2 + $0xc0] sm:$0xf] %vm866_vm13, %v844_v25 }
 0x2c6   :  { %1105 = vst [vmem:[#allocation1 + $0x20] ss:$2 sm:$0xff] %v3252_v20  ;;  %v973_v33 = vld [vmem:[#allocation1 + $0x31] ss:$2 sm:$0xff]  ;;  %v1046_v20 = vld [vmem:[#allocation3 + $0x38] sm:$0xf] }
 0x2c7   :  { %1239 = vrot.lane.b32.xlu0 %v1213_v23, %s2678_s30  ;;  %1341 = vst [vmem:[#allocation1 + $0x10] ss:$2 sm:$0xff] %v1317_v32  ;;  %v1062_v55 = vadd.f32 %v1054_v46, %v1046_v20  ;;  %v1044_v23 = vld [vmem:[#allocation3 + $0x18] sm:$0xf] }
 0x2c8   :  { %982 = vst.msk [vmem:[#allocation2 + $0xa4] sm:$0xf] %vm866_vm13, %v973_v33  ;;  %v1060_v20 = vadd.f32 %v1052_v24, %v1044_v23 }
 0x2c9   :  { %1255 = vrot.lane.b32.xlu2 %v1228_v8, %s2678_s30  ;;  %1010 = vst.sshfl [vmem:[#allocation1 + $0x30] sm:$0xff pattern:$0x75316420] %v844_v25  ;;  %v1432_v4 = vld [vmem:[#allocation2 + $0x98] sm:$0xff]  ;;  %v1663_v60 = vld [vmem:[#allocation2 + $0xa0] sm:$0xf] }
 0x2ca   :  { %1349 = vrot.lane.b32.xlu1 %v1332_v29, %s2677_s0  ;;  %1109 = vst [vmem:[#allocation1 + $0x30] ss:$2 sm:$0xff] %v3261_v39  ;;  %v1048_v29 = vld [vmem:[#allocation3 + $0x48] sm:$0xf] }
 0x2cb   :  { %1328 = vst [vmem:[#allocation1] ss:$2 sm:$0xff] %v1312_v41  ;;  %v3336_v42 = vld [vmem:[#allocation1 + $0x21] ss:$2 sm:$0xff] }
 0x2cc   :  { %1026 = vst [vmem:[#allocation2 + $0xd4] sm:$0xff] %v3336_v42 }
 0x2cd   :  { %v1106_v43 = vld.sshfl [vmem:[#allocation1 + $0x20] sm:$0xff pattern:$0x75316420]  ;;  %v1107_v47 = vld.sshfl [vmem:[#allocation1 + $0x28] sm:$0xff pattern:$0x75316420] }
 0x2ce   :  { %v1342_v48 = vld.sshfl [vmem:[#allocation1 + $0x10] sm:$0xff pattern:$0x75316420]  ;;  %1118 = vst [vmem:[#allocation1 + $0x20] ss:$2 sm:$0xff] %v3269_v49  ;;  %v1061_v49 = vadd.f32 %v1053_v53, %v1045_v51 }
 0x2cf   :  { %1257 = vrot.lane.b32.xlu0 %v1229_v38, %s2678_s30  ;;  %1447 = vst [vmem:[#allocation1 + $0x10] ss:$2 sm:$0xff] %v1428_v50  ;;  %v1315_v38 = vld [vmem:[#allocation2 + $0x5c] sm:$0xf]  ;;  %v1319_v51 = vld [vmem:[#allocation2 + $0xcc] sm:$0xf] }
 0x2d0   :  { %v1018_v39 = vld [vmem:[#allocation1 + $0x31] ss:$2 sm:$0xff]  ;;  %1070 = vst.msk [vmem:[#allocation3 + $0x38] sm:$0xf] %vm866_vm13, %v1062_v55 }
 0x2d1   :  { %1357 = vrot.lane.b32.xlu2 %v1342_v48, %s2677_s0  ;;  %1027 = vst.msk [vmem:[#allocation2 + $0xdc] sm:$0xf] %vm866_vm13, %v1018_v39  ;;  %v1111_v54 = vld.sshfl [vmem:[#allocation1 + $0x38] sm:$0xff pattern:$0x75316420]  ;;  %v1429_v48 = vld [vmem:[#allocation2 + $0x44] sm:$0xff] }
 0x2d2   :  { %1134 = vrot.lane.b32.xlu1 %v1107_v47, %s2679_s9  ;;  %v1329_v56 = vld.sshfl [vmem:[#allocation1] sm:$0xff pattern:$0x75316420]  ;;  %v3345_v57 = vld.sshfl [vmem:[#allocation1 + $0x30] sm:$0xff pattern:$0x75316420] }
 0x2d3   :  { %1339 = vst [vmem:[#allocation1] ss:$2 sm:$0xff] %v1316_v52  ;;  %v1658_v53 = vld [vmem:[#allocation2 + $0x14] sm:$0xf]  ;;  %v1659_v55 = vld [vmem:[#allocation2 + $0x30] sm:$0xf] }
 0x2d4   :  { %1121 = vst [vmem:[#allocation1 + $0x30] ss:$2 sm:$0xff] %v3279_v62 }
 0x2d5   :  { %v1119_v63 = vld.sshfl [vmem:[#allocation1 + $0x20] sm:$0xff pattern:$0x75316420]  ;;  %v1120_v1 = vld.sshfl [vmem:[#allocation1 + $0x28] sm:$0xff pattern:$0x75316420] }
 0x2d6   :  { %v1449_v3 = vld.sshfl [vmem:[#allocation1 + $0x18] sm:$0xff pattern:$0x75316420]  ;;  %1220 = vst [vmem:[#allocation1 + $0x20] ss:$2 sm:$0xff] %v1198_v61 }
 0x2d7   :  { %1132 = vrot.lane.b32.xlu0 %v1106_v43, %s2679_s9  ;;  %v1448_v5 = vld.sshfl [vmem:[#allocation1 + $0x10] sm:$0xff pattern:$0x75316420]  ;;  %1069 = vst.msk [vmem:[#allocation3 + $0x30] sm:$0xf] %vm866_vm13, %v1061_v49 }
 0x2d8   :  { %1461 = vst [vmem:[#allocation1 + $0x10] ss:$2 sm:$0xff] %v1432_v4  ;;  %v1318_v43 = vld [vmem:[#allocation2 + $0xb0] sm:$0xf] }
 0x2d9   :  { %1148 = vrot.lane.b32.xlu2 %v1119_v63, %s2679_s9  ;;  %1068 = vst.msk [vmem:[#allocation3 + $0x18] sm:$0xf] %vm866_vm13, %v1060_v20 }
 0x2da   :  { %v1340_v62 = vld.sshfl [vmem:[#allocation1] sm:$0xff pattern:$0x75316420] }
 0x2db   :  { %1355 = vrot.lane.b32.xlu1 %v1340_v62, %s2677_s0  ;;  %1443 = vst [vmem:[#allocation1] ss:$2 sm:$0xff] %v1427_v6  ;;  %v3354_v35 = vld.sshfl [vmem:[#allocation1 + $0x38] sm:$0xff pattern:$0x75316420] }
 0x2dc   :  { %v3356_v26 = vld.sshfl [vmem:[#allocation1 + $0x30] sm:$0xff pattern:$0x75316420] }
 0x2dd   :  { %1224 = vst [vmem:[#allocation1 + $0x30] ss:$2 sm:$0xff] %v1199_v34  ;;  %v1221_v9 = vld.sshfl [vmem:[#allocation1 + $0x20] sm:$0xff pattern:$0x75316420] }
 0x2de   :  { %v1222_v36 = vld.sshfl [vmem:[#allocation1 + $0x28] sm:$0xff pattern:$0x75316420]  ;;  %v1074_v6 = vld [vmem:[#allocation3 + $0x9] sm:$0xf] }
 0x2df   :  { %1347 = vrot.lane.b32.xlu0 %v1329_v56, %s2677_s0  ;;  %1233 = vst [vmem:[#allocation1 + $0x20] ss:$2 sm:$0xff] %v1202_v44  ;;  %v1462_v10 = vld.sshfl [vmem:[#allocation1 + $0x10] sm:$0xff pattern:$0x75316420]  ;;  %v1430_v44 = vld [vmem:[#allocation2 + $0x60] sm:$0xff] }
 0x2e0   :  { %v1463_v45 = vld.sshfl [vmem:[#allocation1 + $0x18] sm:$0xff pattern:$0x75316420] }
 0x2e1   :  { %1138 = vrot.lane.b32.xlu2 %v1111_v54, %s2679_s9  ;;  %1563 = vst [vmem:[#allocation1 + $0x10] ss:$2 sm:$0xff] %v3297_v7  ;;  %v1047_v7 = vld [vmem:[#allocation3 + $0x40] sm:$0xf] }
 0x2e2   :  { %v1444_v12 = vld.sshfl [vmem:[#allocation1] sm:$0xff pattern:$0x75316420]  ;;  %v3361_v13 = vld.sshfl [vmem:[#allocation1 + $0x8] sm:$0xff pattern:$0x75316420]  ;;  %v1063_v8 = vadd.f32 %v1055_v21, %v1047_v7 }
 0x2e3   :  { %1476 = vrot.lane.b32.xlu1 %v1449_v3, %s2679_s9  ;;  %1458 = vst [vmem:[#allocation1] ss:$2 sm:$0xff] %v1431_v11  ;;  %v1073_v11 = vld [vmem:[#allocation3 + $0x1] sm:$0xf] }
 0x2e4   :  { %v3364_v15 = vld.sshfl [vmem:[#allocation1 + $0x30] sm:$0xff pattern:$0x75316420]  ;;  %v3366_v18 = vld.sshfl [vmem:[#allocation1 + $0x38] sm:$0xff pattern:$0x75316420] }
 0x2e5   :  { %1236 = vst [vmem:[#allocation1 + $0x30] ss:$2 sm:$0xff] %v1203_v14  ;;  %v1434_v14 = vld [vmem:[#allocation2 + $0xd0] sm:$0xff] }
 0x2e6   :  { %v1235_v30 = vld.sshfl [vmem:[#allocation1 + $0x28] sm:$0xff pattern:$0x75316420]  ;;  %v1234_v22 = vld.sshfl [vmem:[#allocation1 + $0x20] sm:$0xff pattern:$0x75316420] }
 0x2e7   :  { %1150 = vrot.lane.b32.xlu0 %v1120_v1, %s2679_s9  ;;  %1334 = vst [vmem:[#allocation1 + $0x20] ss:$2 sm:$0xff] %v1314_v19 }
 0x2e8   :  { %v1564_v25 = vld.sshfl [vmem:[#allocation1 + $0x10] sm:$0xff pattern:$0x75316420]  ;;  %v1565_v28 = vld.sshfl [vmem:[#allocation1 + $0x18] sm:$0xff pattern:$0x75316420] }
 0x2e9   :  { %1247 = vrot.lane.b32.xlu2 %v1221_v9, %s2678_s30  ;;  %1577 = vst [vmem:[#allocation1 + $0x10] ss:$2 sm:$0xff] %v3325_v27  ;;  %v1064_v27 = vadd.f32 %v1056_v31, %v1048_v29 }
 0x2ea   :  { %v3371_v32 = vld.sshfl [vmem:[#allocation1] sm:$0xff pattern:$0x75316420]  ;;  %v3373_v33 = vld.sshfl [vmem:[#allocation1 + $0x8] sm:$0xff pattern:$0x75316420] }
 0x2eb   :  { %1136 = vrot.lane.b32.xlu1 %v3345_v57, %s2679_s9  ;;  %1559 = vst [vmem:[#allocation1] ss:$2 sm:$0xff] %v3277_v58 }
 0x2ec   :  { %v1237_v40 = vld.sshfl [vmem:[#allocation1 + $0x30] sm:$0xff pattern:$0x75316420]  ;;  %v3378_v41 = vld.sshfl [vmem:[#allocation1 + $0x38] sm:$0xff pattern:$0x75316420] }
 0x2ed   :  { %1337 = vst [vmem:[#allocation1 + $0x30] ss:$2 sm:$0xff] %v1315_v38 }
 0x2ee   :  { %v3381_v46 = vld.sshfl [vmem:[#allocation1 + $0x20] sm:$0xff pattern:$0x75316420]  ;;  %1071 = vst.msk [vmem:[#allocation3 + $0x40] sm:$0xf] %vm866_vm13, %v1063_v8 }
 0x2ef   :  { %1474 = vrot.lane.b32.xlu0 %v1448_v5, %s2679_s9  ;;  %1343 = vst [vmem:[#allocation1 + $0x20] ss:$2 sm:$0xff] %v1318_v43  ;;  %v1077_v8 = vld [vmem:[#allocation3 + $0x31] sm:$0xf]  ;;  %v1660_v43 = vld [vmem:[#allocation2 + $0x4c] sm:$0xf] }
 0x2f0   :  { %1072 = vst.msk [vmem:[#allocation3 + $0x48] sm:$0xf] %vm866_vm13, %v1064_v27  ;;  %v1578_v39 = vld.sshfl [vmem:[#allocation1 + $0x10] sm:$0xff pattern:$0x75316420] }
 0x2f1   :  { %1490 = vrot.lane.b32.xlu2 %v1462_v10, %s2679_s9  ;;  %v3397_v56 = vld.sshfl [vmem:[#allocation1 + $0x18] sm:$0xff pattern:$0x75316420] }
 0x2f2   :  { %v3387_v58 = vld.sshfl [vmem:[#allocation1 + $0x8] sm:$0xff pattern:$0x75316420]  ;;  %v1560_v47 = vld.sshfl [vmem:[#allocation1] sm:$0xff pattern:$0x75316420] }
 0x2f3   :  { %1470 = vrot.lane.b32.xlu1 %v1444_v12, %s2679_s9  ;;  %1574 = vst [vmem:[#allocation1] ss:$2 sm:$0xff] %v3295_v37 }
 0x2f4   :  { %v1338_v52 = vld.sshfl [vmem:[#allocation1 + $0x30] sm:$0xff pattern:$0x75316420]  ;;  %1677 = vst [vmem:[#allocation1 + $0x10] ss:$2 sm:$0xff] %v1659_v55 }
 0x2f5   :  { %1345 = vst [vmem:[#allocation1 + $0x30] ss:$2 sm:$0xff] %v1319_v51 }
 0x2f6   :  { %v1344_v50 = vld.sshfl [vmem:[#allocation1 + $0x20] sm:$0xff pattern:$0x75316420] }
 0x2f7   :  { %1249 = vrot.lane.b32.xlu0 %v1222_v36, %s2678_s30  ;;  %1451 = vst [vmem:[#allocation1 + $0x20] ss:$2 sm:$0xff] %v1429_v48 }
 0x2f9   :  { %1265 = vrot.lane.b32.xlu2 %v1235_v30, %s2678_s30 }
 0x2fa   :  { %v1576_v37 = vld.sshfl [vmem:[#allocation1 + $0x8] sm:$0xff pattern:$0x75316420]  ;;  %v1575_v57 = vld.sshfl [vmem:[#allocation1] sm:$0xff pattern:$0x75316420] }
 0x2fb   :  { %1154 = vrot.lane.b32.xlu1 %v3354_v35, %s2679_s9  ;;  %1674 = vst [vmem:[#allocation1] ss:$2 sm:$0xff] %v1658_v53  ;;  %v3403_v63 = vld.sshfl [vmem:[#allocation1 + $0x10] sm:$0xff pattern:$0x75316420] }
 0x2fc   :  { %v1131_v54 = vpop.permute.xlu2 %1130  ;;  %1687 = vst [vmem:[#allocation1 + $0x10] ss:$2 sm:$0xff] %v1663_v60  ;;  %v3423_v36 = vld.sshfl [vmem:[#allocation1 + $0x30] sm:$0xff pattern:$0x75316420] }
 0x2fd   :  { %1455 = vst [vmem:[#allocation1 + $0x30] ss:$2 sm:$0xff] %v1430_v44  ;;  %v1661_v44 = vld [vmem:[#allocation2 + $0x68] sm:$0xf] }
 0x2fe   :  { %v1453_v61 = vld.sshfl [vmem:[#allocation1 + $0x28] sm:$0xff pattern:$0x75316420]  ;;  %v1452_v3 = vld.sshfl [vmem:[#allocation1 + $0x20] sm:$0xff pattern:$0x75316420] }
 0x2ff   :  { %1492 = vrot.lane.b32.xlu0 %v1463_v45, %s2679_s9  ;;  %1464 = vst [vmem:[#allocation1 + $0x20] ss:$2 sm:$0xff] %v1433_v2 }
 0x301   :  { %1586 = vrot.lane.b32.xlu2 %v1560_v47, %s2678_s30 }
 0x302   :  { %v3405_v1 = vld.sshfl [vmem:[#allocation1] sm:$0xff pattern:$0x75316420] }
 0x303   :  { %1263 = vrot.lane.b32.xlu1 %v1234_v22, %s2678_s30  ;;  %1685 = vst [vmem:[#allocation1] ss:$2 sm:$0xff] %v1662_v59  ;;  %v1078_v22 = vld [vmem:[#allocation3 + $0x39] sm:$0xf] }
 0x304   :  { %v3431_v19 = vld.sshfl [vmem:[#allocation1 + $0x38] sm:$0xff pattern:$0x75316420]  ;;  %v1688_v2 = vld.sshfl [vmem:[#allocation1 + $0x10] sm:$0xff pattern:$0x75316420] }
 0x306   :  { %v3415_v34 = vld.sshfl [vmem:[#allocation1 + $0x20] sm:$0xff pattern:$0x75316420] }
 0x307   :  { %1152 = vrot.lane.b32.xlu0 %v3356_v26, %s2679_s9  ;;  %v3417_v26 = vld.sshfl [vmem:[#allocation1 + $0x28] sm:$0xff pattern:$0x75316420] }
 0x308   :  { %1567 = vst [vmem:[#allocation1 + $0x20] ss:$2 sm:$0xff] %v3284_v0 }
 0x309   :  { %1606 = vrot.lane.b32.xlu2 %v1578_v39, %s2678_s30 }
 0x30b   :  { %v1141_v49 = vpop.permute.xlu2 %1140  ;;  %1592 = vrot.lane.b32.xlu1 %v1565_v28, %s2678_s30 }
 0x30f   :  { %1590 = vrot.lane.b32.xlu0 %v1564_v25, %s2678_s30  ;;  %v1569_v24 = vld.sshfl [vmem:[#allocation1 + $0x28] sm:$0xff pattern:$0x75316420]  ;;  %v3441_v25 = vld.sshfl [vmem:[#allocation1 + $0x20] sm:$0xff pattern:$0x75316420] }
 0x310   :  { %1580 = vst [vmem:[#allocation1 + $0x20] ss:$2 sm:$0xff] %v3305_v16 }
 0x311   :  { %1267 = vrot.lane.b32.xlu2 %v1237_v40, %s2678_s30 }
 0x313   :  { %v3410_v4 = vpop.permute.xlu2 %1243  ;;  %v1129_v5 = vpop.permute.xlu1 %1128  ;;  %1253 = vrot.lane.b32.xlu1 %v3366_v18, %s2678_s30  ;;  %v1456_v18 = vld.sshfl [vmem:[#allocation1 + $0x30] sm:$0xff pattern:$0x75316420] }
 0x314   :  { %v1157_v62 = vsel %vm306_vm4, %v1129_v5, %v1131_v54  ;;  %1467 = vst [vmem:[#allocation1 + $0x30] ss:$2 sm:$0xff] %v1434_v14 }
 0x315   :  { %v1173_v35 = vadd.f32 %v1157_v62, %v1074_v6 }
 0x317   :  { %1181 = vst.msk [vmem:[#allocation3 + $0x9] sm:$0xf] %vm866_vm13, %v1173_v35  ;;  %1251 = vrot.lane.b32.xlu0 %v3364_v15, %s2678_s30  ;;  %v3455_v27 = vld.sshfl [vmem:[#allocation1 + $0x20] sm:$0xff pattern:$0x75316420] }
 0x319   :  { %v1125_v9 = vpop.permute.xlu0 %1124  ;;  %1604 = vrot.lane.b32.xlu2 %v1576_v37, %s2678_s30 }
 0x31b   :  { %v1262_v10 = vpop.permute.xlu2 %1261  ;;  %v1127_v45 = vpop.permute.xlu1 %1126  ;;  %1359 = vrot.lane.b32.xlu1 %v1344_v50, %s2677_s0  ;;  %v3444_v29 = vld.sshfl [vmem:[#allocation1 + $0x30] sm:$0xff pattern:$0x75316420]  ;;  %v1469_v31 = vld.sshfl [vmem:[#allocation1 + $0x38] sm:$0xff pattern:$0x75316420] }
 0x31c   :  { %v1156_v12 = vsel %vm306_vm4, %v1125_v9, %v1127_v45  ;;  %1571 = vst [vmem:[#allocation1 + $0x30] ss:$2 sm:$0xff] %v3314_v17 }
 0x31d   :  { %v1172_v0 = vadd.f32 %v1156_v12, %v1073_v11  ;;  %v1665_v12 = vld [vmem:[#allocation2 + $0xd8] sm:$0xf] }
 0x31e   :  { %v1189_v17 = vld [vmem:[#allocation3 + $0xa] sm:$0xf] }
 0x31f   :  { %1180 = vst.msk [vmem:[#allocation3 + $0x1] sm:$0xf] %vm866_vm13, %v1172_v0  ;;  %1351 = vrot.lane.b32.xlu0 %v3381_v46, %s2677_s0  ;;  %v3457_v46 = vld.sshfl [vmem:[#allocation1 + $0x28] sm:$0xff pattern:$0x75316420] }
 0x320   :  { %1680 = vst [vmem:[#allocation1 + $0x20] ss:$2 sm:$0xff] %v1660_v43 }
 0x321   :  { %v1145_v15 = vpop.permute.xlu0 %1144  ;;  %1353 = vrot.lane.b32.xlu2 %v1338_v52, %s2677_s0 }
 0x323   :  { %v1147_v21 = vpop.permute.xlu1 %1146  ;;  %v3434_v30 = vpop.permute.xlu2 %1255  ;;  %1602 = vrot.lane.b32.xlu1 %v1575_v57, %s2678_s30  ;;  %v3467_v52 = vld.sshfl [vmem:[#allocation1 + $0x38] sm:$0xff pattern:$0x75316420]  ;;  %v1572_v37 = vld.sshfl [vmem:[#allocation1 + $0x30] sm:$0xff pattern:$0x75316420] }
 0x324   :  { %v1161_v7 = vsel %vm306_vm4, %v1145_v15, %v1147_v21  ;;  %1583 = vst [vmem:[#allocation1 + $0x30] ss:$2 sm:$0xff] %v3336_v42 }
 0x325   :  { %v1177_v23 = vadd.f32 %v1161_v7, %v1078_v22 }
 0x326   :  { %v1188_v60 = vld [vmem:[#allocation3 + $0x2] sm:$0xf] }
 0x327   :  { %1185 = vst.msk [vmem:[#allocation3 + $0x39] sm:$0xf] %vm866_vm13, %v1177_v23  ;;  %1588 = vrot.lane.b32.xlu0 %v3387_v58, %s2678_s30  ;;  %v1686_v58 = vld.sshfl [vmem:[#allocation1] sm:$0xff pattern:$0x75316420] }
 0x328   :  { %v1681_v55 = vld.sshfl [vmem:[#allocation1 + $0x20] sm:$0xff pattern:$0x75316420] }
 0x329   :  { %v1143_v28 = vpop.permute.xlu0 %1142  ;;  %1480 = vrot.lane.b32.xlu2 %v1453_v61, %s2679_s9  ;;  %v1399_v23 = vld [vmem:[#allocation2 + $0x7c] sm:$0xf] }
 0x32a   :  { %v1160_v38 = vsel %vm306_vm4, %v1141_v49, %v1143_v28  ;;  %v1079_v28 = vld [vmem:[#allocation3 + $0x41] sm:$0xf] }
 0x32b   :  { %v1176_v40 = vadd.f32 %v1160_v38, %v1077_v8  ;;  %v3449_v20 = vpop.permute.xlu2 %1357  ;;  %1478 = vrot.lane.b32.xlu1 %v1452_v3, %s2679_s9  ;;  %v1585_v6 = vld.sshfl [vmem:[#allocation1 + $0x38] sm:$0xff pattern:$0x75316420]  ;;  %v1584_v35 = vld.sshfl [vmem:[#allocation1 + $0x30] sm:$0xff pattern:$0x75316420] }
 0x32c   :  { %v1242_v16 = vpop.permute.xlu1 %1241  ;;  %1683 = vst [vmem:[#allocation1 + $0x30] ss:$2 sm:$0xff] %v1661_v44  ;;  %v1395_v8 = vld [vmem:[#allocation2 + $0xc] sm:$0xf]  ;;  %v1398_v44 = vld [vmem:[#allocation2 + $0x60] sm:$0xf] }
 0x32d   :  { %1184 = vst.msk [vmem:[#allocation3 + $0x31] sm:$0xf] %vm866_vm13, %v1176_v40 }
 0x32e   :  { %v1193_v39 = vld [vmem:[#allocation3 + $0x3a] sm:$0xf] }
 0x32f   :  { %1608 = vrot.lane.b32.xlu0 %v3397_v56, %s2678_s30  ;;  %v1664_v56 = vld [vmem:[#allocation2 + $0xbc] sm:$0xf] }
 0x330   :  { %1689 = vst [vmem:[#allocation1 + $0x20] ss:$2 sm:$0xff] %v1664_v56 }
 0x331   :  { %v1246_v47 = vpop.permute.xlu0 %1245  ;;  %1701 = vrot.lane.b32.xlu2 %v1686_v58, %s2677_s0 }
 0x332   :  { %v1272_v48 = vsel %vm308_vm5, %v3410_v4, %v1246_v47 }
 0x333   :  { %v1288_v50 = vadd.f32 %v1272_v48, %v1189_v17  ;;  %v3462_v51 = vpop.permute.xlu2 %1148  ;;  %1693 = vrot.lane.b32.xlu1 %v3405_v1, %s2677_s0 }
 0x334   :  { %v1260_v53 = vpop.permute.xlu1 %1259  ;;  %v1192_v3 = vld [vmem:[#allocation3 + $0x32] sm:$0xf] }
 0x335   :  { %1296 = vst.msk [vmem:[#allocation3 + $0xa] sm:$0xf] %vm866_vm13, %v1288_v50  ;;  %v1276_v54 = vsel %vm308_vm5, %v1260_v53, %v1262_v10  ;;  %v1075_v10 = vld [vmem:[#allocation3 + $0x11] sm:$0xf] }
 0x336   :  { %v1292_v57 = vadd.f32 %v1276_v54, %v1193_v39 }
 0x337   :  { %1269 = vrot.lane.b32.xlu0 %v3378_v41, %s2678_s30 }
 0x338   :  { %1300 = vst.msk [vmem:[#allocation3 + $0x3a] sm:$0xf] %vm866_vm13, %v1292_v57 }
 0x339   :  { %v1240_v59 = vpop.permute.xlu0 %1239  ;;  %1482 = vrot.lane.b32.xlu2 %v1456_v18, %s2679_s9 }
 0x33a   :  { %v1271_v49 = vsel %vm308_vm5, %v1240_v59, %v1242_v16  ;;  %v1076_v16 = vld [vmem:[#allocation3 + $0x19] sm:$0xf] }
 0x33b   :  { %v1287_v61 = vadd.f32 %v1271_v49, %v1188_v60  ;;  %v3476_v1 = vpop.permute.xlu2 %1138  ;;  %1703 = vrot.lane.b32.xlu1 %v1688_v2, %s2677_s0  ;;  %v1080_v2 = vld [vmem:[#allocation3 + $0x49] sm:$0xf] }
 0x33c   :  { %v3480_v41 = vpop.permute.xlu1 %1349  ;;  %v1304_v18 = vld [vmem:[#allocation3 + $0x8] sm:$0xf] }
 0x33d   :  { %1295 = vst.msk [vmem:[#allocation3 + $0x2] sm:$0xf] %vm866_vm13, %v1287_v61 }
 0x33f   :  { %1695 = vrot.lane.b32.xlu0 %v3403_v63, %s2677_s0  ;;  %v1308_v14 = vld [vmem:[#allocation3 + $0x38] sm:$0xf] }
 0x341   :  { %v1258_v42 = vpop.permute.xlu0 %1257  ;;  %1596 = vrot.lane.b32.xlu2 %v1569_v24, %s2678_s30 }
 0x342   :  { %v1275_v4 = vsel %vm308_vm5, %v3434_v30, %v1258_v42 }
 0x343   :  { %v1291_v5 = vadd.f32 %v1275_v4, %v1192_v3  ;;  %v3487_v62 = vpop.permute.xlu2 %1247  ;;  %1496 = vrot.lane.b32.xlu1 %v3417_v26, %s2679_s9  ;;  %v1684_v26 = vld.sshfl [vmem:[#allocation1 + $0x30] sm:$0xff pattern:$0x75316420]  ;;  %v1307_v3 = vld [vmem:[#allocation3 + $0x20] sm:$0xf] }
 0x344   :  { %v1135_v9 = vpop.permute.xlu1 %1134  ;;  %1691 = vst [vmem:[#allocation1 + $0x30] ss:$2 sm:$0xff] %v1665_v12 }
 0x345   :  { %1299 = vst.msk [vmem:[#allocation3 + $0x32] sm:$0xf] %vm866_vm13, %v1291_v5 }
 0x347   :  { %1361 = vrot.lane.b32.xlu0 %v3423_v36, %s2677_s0 }
 0x349   :  { %v1133_v63 = vpop.permute.xlu0 %1132  ;;  %1500 = vrot.lane.b32.xlu2 %v1469_v31, %s2679_s9 }
 0x34a   :  { %v1158_v45 = vsel %vm306_vm4, %v1133_v63, %v1135_v9 }
 0x34b   :  { %v1174_v11 = vadd.f32 %v1158_v45, %v1075_v10  ;;  %v3496_v0 = vpop.permute.xlu2 %1490  ;;  %1594 = vrot.lane.b32.xlu1 %v3441_v25, %s2678_s30 }
 0x34d   :  { %1182 = vst.msk [vmem:[#allocation3 + $0x11] sm:$0xf] %vm866_vm13, %v1174_v11  ;;  %v1356_v15 = vpop.permute.xlu1 %1355 }
 0x34e   :  { %v1375_v36 = vadd.f32 %v1356_v15, %v1308_v14  ;;  %v1400_v14 = vld [vmem:[#allocation2 + $0x98] sm:$0xf] }
 0x34f   :  { %1494 = vrot.lane.b32.xlu0 %v3415_v34, %s2679_s9 }
 0x350   :  { %1383 = vst.msk [vmem:[#allocation3 + $0x38] sm:$0xf] %vm866_vm13, %v1375_v36 }
 0x351   :  { %v1348_v21 = vpop.permute.xlu0 %1347  ;;  %1598 = vrot.lane.b32.xlu2 %v1572_v37, %s2678_s30 }
 0x352   :  { %v1371_v30 = vadd.f32 %v1348_v21, %v1304_v18 }
 0x353   :  { %v1266_v22 = vpop.permute.xlu2 %1265  ;;  %1498 = vrot.lane.b32.xlu1 %v3444_v29, %s2679_s9 }
 0x354   :  { %1379 = vst.msk [vmem:[#allocation3 + $0x8] sm:$0xf] %vm866_vm13, %v1371_v30  ;;  %v1190_v39 = vld [vmem:[#allocation3 + $0x12] sm:$0xf] }
 0x355   :  { %v1477_v7 = vpop.permute.xlu1 %1476 }
 0x357   :  { %1484 = vrot.lane.b32.xlu0 %v3431_v19, %s2679_s9  ;;  %v1391_v34 = vld [vmem:[#allocation3 + $0x39] sm:$0xf] }
 0x358   :  { %v1407_v25 = vadd.f32 %v1399_v23, %v1391_v34 }
 0x359   :  { %v1151_v24 = vpop.permute.xlu0 %1150  ;;  %1697 = vrot.lane.b32.xlu2 %v1681_v55, %s2677_s0  ;;  %v1690_v55 = vld.sshfl [vmem:[#allocation1 + $0x20] sm:$0xff pattern:$0x75316420] }
 0x35a   :  { %v1162_v31 = vsel %vm306_vm4, %v3462_v51, %v1151_v24  ;;  %1415 = vst.msk [vmem:[#allocation3 + $0x39] sm:$0xf] %vm866_vm13, %v1407_v25 }
 0x35b   :  { %v1387_v38 = vld [vmem:[#allocation3 + $0x9] sm:$0xf]  ;;  %v1178_v40 = vadd.f32 %v1162_v31, %v1079_v28  ;;  %v3514_v43 = vpop.permute.xlu2 %1586  ;;  %1612 = vrot.lane.b32.xlu1 %v3457_v46, %s2678_s30 }
 0x35c   :  { %v1403_v29 = vadd.f32 %v1395_v8, %v1387_v38 }
 0x35d   :  { %1186 = vst.msk [vmem:[#allocation3 + $0x41] sm:$0xf] %vm866_vm13, %v1178_v40  ;;  %v1137_v19 = vpop.permute.xlu1 %1136  ;;  %v1397_v40 = vld [vmem:[#allocation2 + $0x44] sm:$0xf] }
 0x35e   :  { %1411 = vst.msk [vmem:[#allocation3 + $0x9] sm:$0xf] %vm866_vm13, %v1403_v29  ;;  %v1159_v58 = vsel %vm306_vm4, %v1137_v19, %v3476_v1 }
 0x35f   :  { %1610 = vrot.lane.b32.xlu0 %v3455_v27, %s2678_s30  ;;  %v1175_v47 = vadd.f32 %v1159_v58, %v1076_v16  ;;  %v1692_v27 = vld.sshfl [vmem:[#allocation1 + $0x30] sm:$0xff pattern:$0x75316420] }
 0x361   :  { %v1475_v17 = vpop.permute.xlu0 %1474  ;;  %1616 = vrot.lane.b32.xlu2 %v1585_v6, %s2678_s30  ;;  %1183 = vst.msk [vmem:[#allocation3 + $0x19] sm:$0xf] %vm866_vm13, %v1175_v47  ;;  %v1396_v47 = vld [vmem:[#allocation2 + $0x28] sm:$0xf] }
 0x362   :  { %v3526_v48 = vsel %vm306_vm4, %v1475_v17, %v1477_v7 }
 0x363   :  { %v3529_v46 = vpop.permute.xlu2 %1606  ;;  %1614 = vrot.lane.b32.xlu1 %v1584_v35, %s2678_s30 }
 0x364   :  { %v1194_v60 = vld [vmem:[#allocation3 + $0x42] sm:$0xf] }
 0x365   :  { %v3532_v50 = vpop.permute.xlu1 %1470 }
 0x367   :  { %1600 = vrot.lane.b32.xlu0 %v3467_v52, %s2678_s30 }
 0x368   :  { %v1191_v11 = vld [vmem:[#allocation3 + $0x1a] sm:$0xf] }
 0x369   :  { %v1250_v51 = vpop.permute.xlu0 %1249  ;;  %1707 = vrot.lane.b32.xlu2 %v1692_v27, %s2677_s0 }
 0x36a   :  { %v1273_v53 = vsel %vm308_vm5, %v3487_v62, %v1250_v51 }
 0x36b   :  { %v1289_v54 = vadd.f32 %v1273_v53, %v1190_v39  ;;  %v3539_v37 = vpop.permute.xlu2 %1267  ;;  %1699 = vrot.lane.b32.xlu1 %v1684_v26, %s2677_s0 }
 0x36d   :  { %1297 = vst.msk [vmem:[#allocation3 + $0x12] sm:$0xf] %vm866_vm13, %v1289_v54  ;;  %v1155_v56 = vpop.permute.xlu1 %1154 }
 0x36f   :  { %1705 = vrot.lane.b32.xlu0 %v1690_v55, %s2677_s0 }
 0x371   :  { %v1493_v52 = vpop.permute.xlu0 %1492  ;;  %1472 = vrot.lane.b32.xlu2 %v3361_v13, %s2679_s9 }
 0x372   :  { %v1507_v23 = vsel %vm306_vm4, %v3496_v0, %v1493_v52 }
 0x373   :  { %v1605_v57 = vpop.permute.xlu2 %1604  ;;  %1488 = vrot.lane.b32.xlu1 %v3373_v33, %s2679_s9 }
 0x374   :  { %v1305_v28 = vld [vmem:[#allocation3 + $0x10] sm:$0xf] }
 0x375   :  { %v1264_v59 = vpop.permute.xlu1 %1263  ;;  %v1372_v31 = vadd.f32 %v3480_v41, %v1305_v28 }
 0x376   :  { %v1277_v49 = vsel %vm308_vm5, %v1264_v59, %v1266_v22 }
 0x377   :  { %1486 = vrot.lane.b32.xlu0 %v3371_v32, %s2679_s9  ;;  %v1293_v61 = vadd.f32 %v1277_v49, %v1194_v60  ;;  %1380 = vst.msk [vmem:[#allocation3 + $0x10] sm:$0xf] %vm866_vm13, %v1372_v31 }
 0x379   :  { %v1153_v1 = vpop.permute.xlu0 %1152  ;;  %1301 = vst.msk [vmem:[#allocation3 + $0x42] sm:$0xf] %vm866_vm13, %v1293_v61 }
 0x37a   :  { %v1163_v42 = vsel %vm306_vm4, %v1153_v1, %v1155_v56 }
 0x37b   :  { %v1179_v13 = vadd.f32 %v1163_v42, %v1080_v2  ;;  %v1354_v4 = vpop.permute.xlu2 %1353 }
 0x37c   :  { %v1374_v33 = vadd.f32 %v1354_v4, %v1307_v3 }
 0x37d   :  { %1187 = vst.msk [vmem:[#allocation3 + $0x49] sm:$0xf] %vm866_vm13, %v1179_v13  ;;  %v3555_v5 = vpop.permute.xlu1 %1592 }
 0x37e   :  { %1382 = vst.msk [vmem:[#allocation3 + $0x20] sm:$0xf] %vm866_vm13, %v1374_v33  ;;  %v1388_v27 = vld [vmem:[#allocation3 + $0x11] sm:$0xf] }
 0x37f   :  { %v1404_v41 = vadd.f32 %v1396_v47, %v1388_v27 }
 0x380   :  { %v1309_v6 = vld [vmem:[#allocation3 + $0x40] sm:$0xf] }
 0x381   :  { %v3557_v32 = vpop.permute.xlu0 %1590  ;;  %v1376_v62 = vadd.f32 %v3449_v20, %v1309_v6  ;;  %1412 = vst.msk [vmem:[#allocation3 + $0x11] sm:$0xf] %vm866_vm13, %v1404_v41  ;;  %v1745_v6 = vld [vmem:[#allocation2 + $0x88] sm:$0xf] }
 0x383   :  { %v1481_v35 = vpop.permute.xlu2 %1480  ;;  %1384 = vst.msk [vmem:[#allocation3 + $0x40] sm:$0xf] %vm866_vm13, %v1376_v62 }
 0x384   :  { %v1195_v61 = vld [vmem:[#allocation3 + $0x4a] sm:$0xf] }
 0x385   :  { %v1390_v9 = vld [vmem:[#allocation3 + $0x21] sm:$0xf]  ;;  %v1254_v10 = vpop.permute.xlu1 %1253 }
 0x386   :  { %v1406_v63 = vadd.f32 %v1398_v44, %v1390_v9 }
 0x388   :  { %1414 = vst.msk [vmem:[#allocation3 + $0x21] sm:$0xf] %vm866_vm13, %v1406_v63  ;;  %v1420_v59 = vld [vmem:[#allocation3 + $0x12] sm:$0xf] }
 0x389   :  { %v1252_v45 = vpop.permute.xlu0 %1251  ;;  %v1519_v60 = vadd.f32 %v3526_v48, %v1420_v59  ;;  %v1619_v48 = vsel %vm308_vm5, %v3557_v32, %v3555_v5 }
 0x38a   :  { %v1274_v12 = vsel %vm308_vm5, %v1252_v45, %v1254_v10  ;;  %v1392_v36 = vld [vmem:[#allocation3 + $0x41] sm:$0xf] }
 0x38b   :  { %v1290_v26 = vadd.f32 %v1274_v12, %v1191_v11  ;;  %v1702_v15 = vpop.permute.xlu2 %1701  ;;  %v1408_v20 = vadd.f32 %v1400_v14, %v1392_v36  ;;  %1527 = vst.msk [vmem:[#allocation3 + $0x12] sm:$0xf] %vm866_vm13, %v1519_v60  ;;  %v1401_v36 = vld [vmem:[#allocation2 + $0xb4] sm:$0xf] }
 0x38d   :  { %1298 = vst.msk [vmem:[#allocation3 + $0x1a] sm:$0xf] %vm866_vm13, %v1290_v26  ;;  %v3564_v18 = vpop.permute.xlu1 %1359 }
 0x38e   :  { %1416 = vst.msk [vmem:[#allocation3 + $0x41] sm:$0xf] %vm866_vm13, %v1408_v20 }
 0x38f   :  { %v1422_v27 = vld [vmem:[#allocation3 + $0x22] sm:$0xf] }
 0x391   :  { %v1352_v21 = vpop.permute.xlu0 %1351 }
 0x392   :  { %v1535_v44 = vld [vmem:[#allocation3 + $0x10] sm:$0xf] }
 0x393   :  { %v3567_v22 = vpop.permute.xlu2 %1482 }
 0x394   :  { %v1306_v30 = vld [vmem:[#allocation3 + $0x18] sm:$0xf] }
 0x395   :  { %v1373_v7 = vadd.f32 %v1352_v21, %v1306_v30  ;;  %v1424_v34 = vld [vmem:[#allocation3 + $0x42] sm:$0xf]  ;;  %v1603_v25 = vpop.permute.xlu1 %1602 }
 0x396   :  { %v1523_v24 = vadd.f32 %v1507_v23, %v1424_v34  ;;  %v1622_v58 = vsel %vm308_vm5, %v1603_v25, %v1605_v57  ;;  %v1742_v23 = vld [vmem:[#allocation2 + $0x34] sm:$0xf]  ;;  %v1402_v25 = vld [vmem:[#allocation2 + $0xd0] sm:$0xf] }
 0x397   :  { %1381 = vst.msk [vmem:[#allocation3 + $0x18] sm:$0xf] %vm866_vm13, %v1373_v7 }
 0x398   :  { %1531 = vst.msk [vmem:[#allocation3 + $0x42] sm:$0xf] %vm866_vm13, %v1523_v24 }
 0x399   :  { %v1589_v8 = vpop.permute.xlu0 %1588 }
 0x39a   :  { %v1618_v4 = vsel %vm308_vm5, %v3514_v43, %v1589_v8  ;;  %v1311_v43 = vld [vmem:[#allocation3 + $0x50] sm:$0xf]  ;;  %v1741_v8 = vld [vmem:[#allocation2 + $0x18] sm:$0xf] }
 0x39b   :  { %v3575_v38 = vpop.permute.xlu2 %1596  ;;  %v1634_v9 = vadd.f32 %v1618_v4, %v1535_v44  ;;  %v1542_v4 = vld [vmem:[#allocation3 + $0x58] sm:$0xf] }
 0x39d   :  { %v1479_v16 = vpop.permute.xlu1 %1478  ;;  %1642 = vst.msk [vmem:[#allocation3 + $0x10] sm:$0xf] %vm866_vm13, %v1634_v9 }
 0x39e   :  { %v1389_v29 = vld [vmem:[#allocation3 + $0x19] sm:$0xf]  ;;  %v1504_v55 = vsel %vm306_vm4, %v1479_v16, %v1481_v35 }
 0x39f   :  { %v1405_v19 = vadd.f32 %v1397_v40, %v1389_v29  ;;  %v1539_v0 = vld [vmem:[#allocation3 + $0x40] sm:$0xf] }
 0x3a0   :  { %v1638_v17 = vadd.f32 %v1622_v58, %v1539_v0 }
 0x3a1   :  { %1413 = vst.msk [vmem:[#allocation3 + $0x19] sm:$0xf] %vm866_vm13, %v1405_v19  ;;  %v3579_v51 = vpop.permute.xlu0 %1608 }
 0x3a2   :  { %1646 = vst.msk [vmem:[#allocation3 + $0x40] sm:$0xf] %vm866_vm13, %v1638_v17  ;;  %v1623_v59 = vsel %vm308_vm5, %v3529_v46, %v3579_v51 }
 0x3a3   :  { %v3583_v39 = vpop.permute.xlu2 %1500 }
 0x3a4   :  { %v1650_v14 = vld [vmem:[#allocation3 + $0x11] sm:$0xf] }
 0x3a5   :  { %v1694_v53 = vpop.permute.xlu1 %1693 }
 0x3a8   :  { %v1421_v54 = vld [vmem:[#allocation3 + $0x1a] sm:$0xf] }
 0x3a9   :  { %v1520_v56 = vadd.f32 %v1504_v55, %v1421_v54  ;;  %v1654_v52 = vld [vmem:[#allocation3 + $0x41] sm:$0xf]  ;;  %v1270_v49 = vpop.permute.xlu0 %1269 }
 0x3aa   :  { %v1721_v57 = vadd.f32 %v1702_v15, %v1654_v52  ;;  %v1278_v1 = vsel %vm308_vm5, %v3539_v37, %v1270_v49  ;;  %v1717_v15 = vadd.f32 %v1694_v53, %v1650_v14  ;;  %v1419_v49 = vld [vmem:[#allocation3 + $0xa] sm:$0xf] }
 0x3ab   :  { %1528 = vst.msk [vmem:[#allocation3 + $0x1a] sm:$0xf] %vm866_vm13, %v1520_v56  ;;  %v1294_v2 = vadd.f32 %v1278_v1, %v1195_v61  ;;  %v3592_v42 = vpop.permute.xlu2 %1598 }
 0x3ac   :  { %1729 = vst.msk [vmem:[#allocation3 + $0x41] sm:$0xf] %vm866_vm13, %v1721_v57 }
 0x3ad   :  { %v3594_v3 = vpop.permute.xlu1 %1703  ;;  %1302 = vst.msk [vmem:[#allocation3 + $0x4a] sm:$0xf] %vm866_vm13, %v1294_v2 }
 0x3ae   :  { %1725 = vst.msk [vmem:[#allocation3 + $0x11] sm:$0xf] %vm866_vm13, %v1717_v15 }
 0x3b1   :  { %v1696_v62 = vpop.permute.xlu0 %1695 }
 0x3b2   :  { %v1536_v13 = vld [vmem:[#allocation3 + $0x18] sm:$0xf] }
 0x3b3   :  { %v1635_v33 = vadd.f32 %v1619_v48, %v1536_v13  ;;  %v1737_v37 = vld [vmem:[#allocation3 + $0x42] sm:$0xf]  ;;  %v3606_v32 = vpop.permute.xlu2 %1697 }
 0x3b4   :  { %v1753_v35 = vadd.f32 %v1745_v6, %v1737_v37  ;;  %v1310_v63 = vld [vmem:[#allocation3 + $0x48] sm:$0xf] }
 0x3b5   :  { %1643 = vst.msk [vmem:[#allocation3 + $0x18] sm:$0xf] %vm866_vm13, %v1635_v33  ;;  %v1377_v5 = vadd.f32 %v3564_v18, %v1310_v63  ;;  %v1497_v10 = vpop.permute.xlu1 %1496  ;;  %v1733_v40 = vld [vmem:[#allocation3 + $0x12] sm:$0xf]  ;;  %v1538_v6 = vld [vmem:[#allocation3 + $0x28] sm:$0xf] }
 0x3b6   :  { %1761 = vst.msk [vmem:[#allocation3 + $0x42] sm:$0xf] %vm866_vm13, %v1753_v35  ;;  %v1749_v29 = vadd.f32 %v1741_v8, %v1733_v40 }
 0x3b7   :  { %1385 = vst.msk [vmem:[#allocation3 + $0x48] sm:$0xf] %vm866_vm13, %v1377_v5 }
 0x3b8   :  { %1757 = vst.msk [vmem:[#allocation3 + $0x12] sm:$0xf] %vm866_vm13, %v1749_v29 }
 0x3b9   :  { %v1362_v11 = vpop.permute.xlu0 %1361 }
 0x3ba   :  { %v1378_v26 = vadd.f32 %v1362_v11, %v1311_v43 }
 0x3bb   :  { %v1617_v21 = vpop.permute.xlu2 %1616 }
 0x3bc   :  { %v1651_v45 = vld [vmem:[#allocation3 + $0x19] sm:$0xf]  ;;  %1386 = vst.msk [vmem:[#allocation3 + $0x50] sm:$0xf] %vm866_vm13, %v1378_v26 }
 0x3bd   :  { %v1718_v12 = vadd.f32 %v1696_v62, %v1651_v45  ;;  %v1595_v30 = vpop.permute.xlu1 %1594  ;;  %v1773_v8 = vld [vmem:[#allocation3 + $0x40] sm:$0x3f] }
 0x3be   :  { %v1393_v20 = vld [vmem:[#allocation3 + $0x49] sm:$0xf] }
 0x3bf   :  { %1726 = vst.msk [vmem:[#allocation3 + $0x19] sm:$0xf] %vm866_vm13, %v1718_v12  ;;  %v1409_v18 = vadd.f32 %v1401_v36, %v1393_v20  ;;  %v1771_v20 = vld [vmem:[#allocation3 + $0x30] sm:$0x3f] }
 0x3c1   :  { %1417 = vst.msk [vmem:[#allocation3 + $0x49] sm:$0xf] %vm866_vm13, %v1409_v18  ;;  %v1495_v7 = vpop.permute.xlu0 %1494 }
 0x3c2   :  { %v1508_v16 = vsel %vm306_vm4, %v1495_v7, %v1497_v10  ;;  %v1812_v7 = vmul.f32 %v1771_v20, %v1771_v20 }
 0x3c3   :  { %v1394_v28 = vld [vmem:[#allocation3 + $0x51] sm:$0xf]  ;;  %v1708_v58 = vpop.permute.xlu2 %1707 }
 0x3c4   :  { %v1410_v31 = vadd.f32 %v1402_v25, %v1394_v28  ;;  %v1747_v25 = vld [vmem:[#allocation2 + $0xc0] sm:$0xf]  ;;  %v1423_v28 = vld [vmem:[#allocation3 + $0x3a] sm:$0xf] }
 0x3c5   :  { %v1499_v47 = vpop.permute.xlu1 %1498 }
 0x3c6   :  { %v1734_v34 = vld [vmem:[#allocation3 + $0x1a] sm:$0xf]  ;;  %1418 = vst.msk [vmem:[#allocation3 + $0x51] sm:$0xf] %vm866_vm13, %v1410_v31  ;;  %v1509_v55 = vsel %vm306_vm4, %v1499_v47, %v3583_v39  ;;  %v1620_v39 = vsel %vm308_vm5, %v1595_v30, %v3575_v38 }
 0x3c7   :  { %v1750_v24 = vadd.f32 %v1742_v23, %v1734_v34 }
 0x3c8   :  { %v1425_v19 = vld [vmem:[#allocation3 + $0x4a] sm:$0xf] }
 0x3c9   :  { %1758 = vst.msk [vmem:[#allocation3 + $0x1a] sm:$0xf] %vm866_vm13, %v1750_v24  ;;  %v1524_v0 = vadd.f32 %v1508_v16, %v1425_v19  ;;  %v1485_v17 = vpop.permute.xlu0 %1484  ;;  %v1778_v16 = vsel %vm1028_vm12, %v1771_v20, 0.0 }
 0x3ca   :  { %v1505_v41 = vsel %vm306_vm4, %v3567_v22, %v1485_v17  ;;  %v1767_v17 = vld [vmem:[#allocation3 + $0x10] sm:$0x3f] }
 0x3cb   :  { %1532 = vst.msk [vmem:[#allocation3 + $0x4a] sm:$0xf] %vm866_vm13, %v1524_v0  ;;  %v1521_v53 = vadd.f32 %v1505_v41, %v1422_v27  ;;  %v1473_v52 = vpop.permute.xlu2 %1472  ;;  %v1748_v0 = vld [vmem:[#allocation2 + $0xdc] sm:$0xf]  ;;  %v1819_v27 = vsel %vm1028_vm12, %v1812_v7, 0.0 }
 0x3cc   :  { %v1502_v22 = vsel %vm306_vm4, %v3532_v50, %v1473_v52 }
 0x3cd   :  { %v1426_v54 = vld [vmem:[#allocation3 + $0x52] sm:$0xf]  ;;  %1529 = vst.msk [vmem:[#allocation3 + $0x22] sm:$0xf] %vm866_vm13, %v1521_v53  ;;  %v1613_v57 = vpop.permute.xlu1 %1612  ;;  %v1518_v2 = vadd.f32 %v1502_v22, %v1419_v49  ;;  %v1783_v22 = vsel %vm1028_vm12, %v1767_v17, 0.0 }
 0x3ce   :  { %v1525_v56 = vadd.f32 %v1509_v55, %v1426_v54  ;;  %v1784_v54 = vsel %vm1028_vm12, %v1773_v8, 0.0 }
 0x3cf   :  { %1526 = vst.msk [vmem:[#allocation3 + $0xa] sm:$0xf] %vm866_vm13, %v1518_v2 }
 0x3d0   :  { %1533 = vst.msk [vmem:[#allocation3 + $0x52] sm:$0xf] %vm866_vm13, %v1525_v56  ;;  %v1768_v2 = vld [vmem:[#allocation3 + $0x18] sm:$0x3f] }
 0x3d1   :  { %v1611_v61 = vpop.permute.xlu0 %1610 }
 0x3d2   :  { %v1540_v60 = vld [vmem:[#allocation3 + $0x48] sm:$0xf]  ;;  %v1624_v51 = vsel %vm308_vm5, %v1611_v61, %v1613_v57  ;;  %v1814_v57 = vmul.f32 %v1773_v8, %v1773_v8 }
 0x3d3   :  { %v1639_v1 = vadd.f32 %v1623_v59, %v1540_v60 }
 0x3d4   :  { %v1537_v48 = vld [vmem:[#allocation3 + $0x20] sm:$0xf] }
 0x3d5   :  { %1647 = vst.msk [vmem:[#allocation3 + $0x48] sm:$0xf] %vm866_vm13, %v1639_v1  ;;  %v1636_v13 = vadd.f32 %v1620_v39, %v1537_v48  ;;  %v1615_v50 = vpop.permute.xlu1 %1614  ;;  %v1785_v39 = vadd.f32 %v1784_v54, %v1783_v22  ;;  %v1808_v48 = vmul.f32 %v1767_v17, %v1767_v17 }
 0x3d6   :  { %v1625_v37 = vsel %vm308_vm5, %v1615_v50, %v1617_v21  ;;  %v1743_v21 = vld [vmem:[#allocation2 + $0x50] sm:$0xf]  ;;  %v1766_v1 = vld [vmem:[#allocation3 + $0x8] sm:$0x3f] }
 0x3d7   :  { %1644 = vst.msk [vmem:[#allocation3 + $0x20] sm:$0xf] %vm866_vm13, %v1636_v13  ;;  %v1541_v46 = vld [vmem:[#allocation3 + $0x50] sm:$0xf]  ;;  %v1641_v38 = vadd.f32 %v1625_v37, %v1542_v4  ;;  %v1807_v50 = vmul.f32 %v1766_v1, %v1766_v1 }
 0x3d8   :  { %v1640_v33 = vadd.f32 %v1624_v51, %v1541_v46  ;;  %v1825_v51 = vsel %vm1028_vm12, %v1814_v57, 0.0 }
 0x3d9   :  { %v1601_v62 = vpop.permute.xlu0 %1600  ;;  %1649 = vst.msk [vmem:[#allocation3 + $0x58] sm:$0xf] %vm866_vm13, %v1641_v38  ;;  %v1780_v38 = vsel %vm1028_vm12, %v1766_v1, 0.0 }
 0x3da   :  { %1648 = vst.msk [vmem:[#allocation3 + $0x50] sm:$0xf] %vm866_vm13, %v1640_v33  ;;  %v1621_v35 = vsel %vm308_vm5, %v3592_v42, %v1601_v62 }
 0x3db   :  { %v1637_v9 = vadd.f32 %v1621_v35, %v1538_v6  ;;  %v1809_v6 = vmul.f32 %v1768_v2, %v1768_v2  ;;  %v1786_v35 = vsel %vm1028_vm12, %v1768_v2, 0.0 }
 0x3dc   :  { %v1655_v44 = vld [vmem:[#allocation3 + $0x49] sm:$0xf] }
 0x3dd   :  { %v1722_v63 = vadd.f32 %v3594_v3, %v1655_v44  ;;  %1645 = vst.msk [vmem:[#allocation3 + $0x28] sm:$0xf] %vm866_vm13, %v1637_v9  ;;  %v1700_v43 = vpop.permute.xlu1 %1699  ;;  %v1746_v3 = vld [vmem:[#allocation2 + $0xa4] sm:$0xf]  ;;  %v1798_v44 = vsel %vm1028_vm12, %v1785_v39, 0.0  ;;  %v1824_v9 = vsel %vm1028_vm12, %v1808_v48, 0.0 }
 0x3de   :  { %v1652_v5 = vld [vmem:[#allocation3 + $0x21] sm:$0xf]  ;;  %v1827_v20 = vsel %vm1028_vm12, %v1809_v6, 0.0 }
 0x3df   :  { %1730 = vst.msk [vmem:[#allocation3 + $0x49] sm:$0xf] %vm866_vm13, %v1722_v63  ;;  %v1719_v10 = vadd.f32 %v3606_v32, %v1652_v5  ;;  %v1765_v32 = vld [vmem:[#allocation3] sm:$0x3f] }
 0x3e0   :  { %v1657_v42 = vld [vmem:[#allocation3 + $0x59] sm:$0xf]  ;;  %v1806_v40 = vmul.f32 %v1765_v32, %v1765_v32  ;;  %v1777_v53 = vsel %vm1028_vm12, %v1765_v32, 0.0 }
 0x3e1   :  { %1727 = vst.msk [vmem:[#allocation3 + $0x21] sm:$0xf] %vm866_vm13, %v1719_v10  ;;  %v1656_v45 = vld [vmem:[#allocation3 + $0x51] sm:$0xf]  ;;  %v1706_v11 = vpop.permute.xlu0 %1705  ;;  %v1724_v26 = vadd.f32 %v1708_v58, %v1657_v42  ;;  %v1744_v58 = vld [vmem:[#allocation2 + $0x6c] sm:$0xf]  ;;  %v1779_v52 = vadd.f32 %v1778_v16, %v1777_v53 }
 0x3e2   :  { %v1723_v12 = vadd.f32 %v1706_v11, %v1656_v45  ;;  %v1818_v59 = vsel %vm1028_vm12, %v1806_v40, 0.0 }
 0x3e3   :  { %1732 = vst.msk [vmem:[#allocation3 + $0x59] sm:$0xf] %vm866_vm13, %v1724_v26  ;;  %v1820_v61 = vadd.f32 %v1819_v27, %v1818_v59  ;;  %v1795_v46 = vsel %vm1028_vm12, %v1779_v52, 0.0 }
 0x3e4   :  { %v1653_v14 = vld [vmem:[#allocation3 + $0x29] sm:$0xf]  ;;  %1731 = vst.msk [vmem:[#allocation3 + $0x51] sm:$0xf] %vm866_vm13, %v1723_v12 }
 0x3e5   :  { %v1720_v36 = vadd.f32 %v1700_v43, %v1653_v14  ;;  %v1489_v34 = vpop.permute.xlu1 %1488  ;;  %v1836_v37 = vsel %vm1028_vm12, %v1820_v61, 0.0  ;;  %v1826_v43 = vadd.f32 %v1825_v51, %v1824_v9 }
 0x3e6   :  { %v1738_v15 = vld [vmem:[#allocation3 + $0x4a] sm:$0xf] }
 0x3e7   :  { %v1754_v18 = vadd.f32 %v1746_v3, %v1738_v15  ;;  %1728 = vst.msk [vmem:[#allocation3 + $0x29] sm:$0xf] %vm866_vm13, %v1720_v36  ;;  %v1821_v15 = vsel %vm1028_vm12, %v1807_v50, 0.0  ;;  %v1839_v27 = vsel %vm1028_vm12, %v1826_v43, 0.0 }
 0x3e8   :  { %v1735_v30 = vld [vmem:[#allocation3 + $0x22] sm:$0xf] }
 0x3e9   :  { %1762 = vst.msk [vmem:[#allocation3 + $0x4a] sm:$0xf] %vm866_vm13, %v1754_v18  ;;  %v1751_v23 = vadd.f32 %v1743_v21, %v1735_v30  ;;  %v1487_v24 = vpop.permute.xlu0 %1486 }
 0x3ea   :  { %v1506_v31 = vsel %vm306_vm4, %v1487_v24, %v1489_v34  ;;  %v1740_v41 = vld [vmem:[#allocation3 + $0x5a] sm:$0xf] }
 0x3eb   :  { %1759 = vst.msk [vmem:[#allocation3 + $0x22] sm:$0xf] %vm866_vm13, %v1751_v23  ;;  %v1739_v29 = vld [vmem:[#allocation3 + $0x52] sm:$0xf]  ;;  %v1522_v19 = vadd.f32 %v1506_v31, %v1423_v28  ;;  %v1756_v55 = vadd.f32 %v1748_v0, %v1740_v41 }
 0x3ec   :  { %v1755_v47 = vadd.f32 %v1747_v25, %v1739_v29 }
 0x3ed   :  { %1530 = vst.msk [vmem:[#allocation3 + $0x3a] sm:$0xf] %vm866_vm13, %v1522_v19 }
 0x3ee   :  { %v1736_v56 = vld [vmem:[#allocation3 + $0x2a] sm:$0xf]  ;;  %1763 = vst.msk [vmem:[#allocation3 + $0x52] sm:$0xf] %vm866_vm13, %v1755_v47 }
 0x3ef   :  { %v1752_v60 = vadd.f32 %v1744_v58, %v1736_v56  ;;  %1764 = vst.msk [vmem:[#allocation3 + $0x5a] sm:$0xf] %vm866_vm13, %v1756_v55 }
 0x3f0   :  { %v1774_v49 = vld [vmem:[#allocation3 + $0x48] sm:$0x3f] }
 0x3f1   :  { %1760 = vst.msk [vmem:[#allocation3 + $0x2a] sm:$0xf] %vm866_vm13, %v1752_v60  ;;  %v1815_v13 = vmul.f32 %v1774_v49, %v1774_v49  ;;  %v1787_v33 = vsel %vm1028_vm12, %v1774_v49, 0.0 }
 0x3f2   :  { %v1769_v4 = vld [vmem:[#allocation3 + $0x20] sm:$0x3f]  ;;  %v1788_v12 = vadd.f32 %v1787_v33, %v1786_v35 }
 0x3f3   :  { %v1828_v45 = vsel %vm1028_vm12, %v1815_v13, 0.0  ;;  %v1810_v42 = vmul.f32 %v1769_v4, %v1769_v4  ;;  %v1789_v32 = vsel %vm1028_vm12, %v1769_v4, 0.0 }
 0x3f4   :  { %v1772_v62 = vld [vmem:[#allocation3 + $0x38] sm:$0x3f]  ;;  %v1829_v7 = vadd.f32 %v1828_v45, %v1827_v20  ;;  %v1800_v47 = vsel %vm1028_vm12, %v1788_v12, 0.0 }
 0x3f5   :  { %v1775_v63 = vld [vmem:[#allocation3 + $0x50] sm:$0x3f]  ;;  %v1781_v5 = vsel %vm1028_vm12, %v1772_v62, 0.0  ;;  %v1813_v10 = vmul.f32 %v1772_v62, %v1772_v62  ;;  %v1830_v31 = vsel %vm1028_vm12, %v1810_v42, 0.0 }
 0x3f6   :  { %v1782_v11 = vadd.f32 %v1781_v5, %v1780_v38  ;;  %v1816_v26 = vmul.f32 %v1775_v63, %v1775_v63  ;;  %v1776_v14 = vld [vmem:[#allocation3 + $0x58] sm:$0x3f]  ;;  %v1790_v3 = vsel %vm1028_vm12, %v1775_v63, 0.0  ;;  %v1841_v52 = vsel %vm1028_vm12, %v1829_v7, 0.0 }
 0x3f7   :  { %v1822_v36 = vsel %vm1028_vm12, %v1813_v10, 0.0  ;;  %v1817_v25 = vmul.f32 %v1776_v14, %v1776_v14  ;;  %v1791_v28 = vadd.f32 %v1790_v3, %v1789_v32  ;;  %v1793_v29 = vsel %vm1028_vm12, %v1776_v14, 0.0 }
 0x3f8   :  { %v1770_v18 = vld [vmem:[#allocation3 + $0x28] sm:$0x3f]  ;;  %v1796_v21 = vsel %vm1028_vm12, %v1782_v11, 0.0  ;;  %v1823_v30 = vadd.f32 %v1822_v36, %v1821_v15  ;;  %v1831_v8 = vsel %vm1028_vm12, %v1816_v26, 0.0  ;;  %v2685_v63 = vmov 432.0  }
 0x3f9   :  { %v1792_v23 = vsel %vm1028_vm12, %v1770_v18, 0.0  ;;  %v1797_v34 = vadd.f32 %v1796_v21, %v1795_v46  ;;  %v1811_v24 = vmul.f32 %v1770_v18, %v1770_v18  ;;  %v1832_v17 = vadd.f32 %v1831_v8, %v1830_v31 }
 0x3fa   :  { %v1837_v40 = vsel %vm1028_vm12, %v1823_v30, 0.0  ;;  %v1794_v58 = vadd.f32 %v1793_v29, %v1792_v23  ;;  %v1834_v53 = vsel %vm1028_vm12, %v1817_v25, 0.0  ;;  %v1802_v55 = vsel %vm1028_vm12, %v1791_v28, 0.0 }
 0x3fb   :  { %v1799_v19 = vadd.f32 %v1798_v44, %v1797_v34  ;;  %v1833_v16 = vsel %vm1028_vm12, %v1811_v24, 0.0  ;;  %v1838_v0 = vadd.f32 %v1837_v40, %v1836_v37  ;;  %v1843_v49 = vsel %vm1028_vm12, %v1832_v17, 0.0 }
 0x3fc   :  { %v1835_v56 = vadd.f32 %v1834_v53, %v1833_v16  ;;  %v1804_v60 = vsel %vm1028_vm12, %v1794_v58, 0.0  ;;  %2649 = vrcp.f32 %v2685_v63  ;;  %v1914_v53 = vld [vmem:[%s3766_s5] sm:$0x1]  ;;  %v1969_v63 = vld [vmem:[#allocation3 + $0x41] sm:$0xf] }
 0x3fd   :  { %v1801_v41 = vadd.f32 %v1800_v47, %v1799_v19  ;;  %v1840_v54 = vadd.f32 %v1839_v27, %v1838_v0 }
 0x3fe   :  { %v1845_v1 = vsel %vm1028_vm12, %v1835_v56, 0.0 }
 0x3ff   :  { %v1803_v57 = vadd.f32 %v1802_v55, %v1801_v41  ;;  %v1842_v59 = vadd.f32 %v1841_v52, %v1840_v54 }
 0x401   :  { %v1805_v22 = vadd.f32 %v1804_v60, %v1803_v57  ;;  %v1844_v61 = vadd.f32 %v1843_v49, %v1842_v59  ;;  %v1927_v59 = vld [vmem:[%s3767_s6] sm:$0x1] }
 0x402   :  { %v2650_v5 = vpop.eup %2649 }
 0x403   :  { %v1847_v2 = vsel %vm1028_vm12, %v1805_v22, 0.0  ;;  %v1846_v39 = vadd.f32 %v1845_v1, %v1844_v61  ;;  %v1904_v11 = vmul.f32 432.0, %v2650_v5  ;;  %vm1908_vm14 = vweird.f32 %v2650_v5 }
 0x404   :  { %v1848_v48 = vrot.slane %v1847_v2, 4 }
 0x405   :  { %v1854_v13 = vsel %vm1028_vm12, %v1846_v39, 0.0  ;;  %v1905_v12 = vsub.f32 1.0, %v1904_v11 }
 0x406   :  { %v1849_v46 = vadd.f32 %v1848_v48, %v1847_v2  ;;  %v1855_v51 = vrot.slane %v1854_v13, 4 }
 0x407   :  { %v1906_v36 = vmul.f32 %v2650_v5, %v1905_v12 }
 0x408   :  { %v1850_v4 = vrot.slane %v1849_v46, 2  ;;  %v1856_v33 = vadd.f32 %v1855_v51, %v1854_v13 }
 0x409   :  { %v1907_v21 = vadd.f32 %v2650_v5, %v1906_v36 }
 0x40a   :  { %v1851_v50 = vadd.f32 %v1850_v4, %v1849_v46  ;;  %v1857_v6 = vrot.slane %v1856_v33, 2 }
 0x40b   :  { %v1909_v34 = vsel %vm1908_vm14, %v2650_v5, %v1907_v21 }
 0x40c   :  { %v1852_v37 = vrot.slane %v1851_v50, 1  ;;  %v1858_v38 = vadd.f32 %v1857_v6, %v1856_v33 }
 0x40e   :  { %v1853_v62 = vadd.f32 %v1852_v37, %v1851_v50  ;;  %v1859_v35 = vrot.slane %v1858_v38, 1 }
 0x410   :  { %1874 = vrot.lane.b32.xlu1 %v1853_v62, %s2678_s30  ;;  %1866 = vrot.lane.b32.xlu0 %v1853_v62, %s2677_s0  ;;  %v1860_v44 = vadd.f32 %v1859_v35, %v1858_v38  ;;  %v1965_v38 = vld [vmem:[#allocation3 + $0x21] sm:$0xf]  ;;  %v1973_v35 = vld [vmem:[#allocation3 + $0x51] sm:$0xf] }
 0x411   :  { %1862 = vrot.lane.b32.xlu2 %v1853_v62, %s2682_s4  ;;  %v1978_v5 = vrot.slane %v1965_v38, 4 }
 0x418   :  { %1883 = vrot.lane.b32.xlu1 %v1860_v44, %s2682_s4  ;;  %1887 = vrot.lane.b32.xlu0 %v1860_v44, %s2677_s0 }
 0x419   :  { %1870 = vrot.lane.b32.xlu2 %v1853_v62, %s2683_s28 }
 0x420   :  { %1895 = vrot.lane.b32.xlu1 %v1860_v44, %s2678_s30  ;;  %1878 = vrot.lane.b32.xlu0 %v1853_v62, %s2684_s29 }
 0x421   :  { %1891 = vrot.lane.b32.xlu2 %v1860_v44, %s2683_s28 }
 0x429   :  { %1899 = vrot.lane.b32.xlu2 %v1860_v44, %s2684_s29 }
 0x46b   :  { %v1863_v9 = vpop.permute.xlu2 %1862 }
 0x46c   :  { %v1865_v42 = vadd.f32 %v1863_v9, %v1853_v62  ;;  %v2614_v62 = vld [vmem:[%s3768_s7 + $0x18] sm:$0xff] }
 0x46d   :  { %2623 = vmatpush.bf16.msra.mxu3 %v2614_v62  ;;  %2082 = vmatpush.bf16.msra.mxu1 %v2614_v62  ;;  %v1961_v9 = vld [vmem:[#allocation3 + $0x11] sm:$0xf] }
 0x46e   :  { %v1975_v12 = vrot.slane %v1961_v9, 4 }
 0x473   :  { %v1871_v10 = vpop.permute.xlu2 %1870 }
 0x47b   :  { %v1892_v26 = vpop.permute.xlu2 %1891 }
 0x482   :  { %v1875_v43 = vpop.permute.xlu1 %1874  ;;  %v1867_v45 = vpop.permute.xlu0 %1866 }
 0x483   :  { %v1869_v14 = vadd.f32 %v1867_v45, %v1865_v42  ;;  %v1900_v31 = vpop.permute.xlu2 %1899  ;;  %v1967_v45 = vld [vmem:[#allocation3 + $0x39] sm:$0xf]  ;;  %v1981_v42 = vrot.slane %v1969_v63, 4 }
 0x485   :  { %v1873_v18 = vadd.f32 %v1871_v10, %v1869_v14  ;;  %v1984_v10 = vrot.slane %v1973_v35, 4  ;;  %v1963_v14 = vld [vmem:[#allocation3 + $0x19] sm:$0xf] }
 0x486   :  { %v1987_v36 = vsel %vm856_vm11, %v1963_v14, %v1978_v5 }
 0x487   :  { %v1877_v7 = vadd.f32 %v1875_v43, %v1873_v18  ;;  %v1960_v43 = vld [vmem:[#allocation3 + $0x9] sm:$0xf] }
 0x48a   :  { %v1884_v3 = vpop.permute.xlu1 %1883  ;;  %v1888_v15 = vpop.permute.xlu0 %1887 }
 0x48b   :  { %v1886_v20 = vadd.f32 %v1884_v3, %v1860_v44  ;;  %v2613_v44 = vld [vmem:[%s3768_s7 + $0x10] sm:$0xff] }
 0x48c   :  { %2624 = vmatpush.bf16.msra.mxu3 %v2613_v44  ;;  %2083 = vmatpush.bf16.msra.mxu1 %v2613_v44  ;;  %v1971_v3 = vld [vmem:[#allocation3 + $0x49] sm:$0xf] }
 0x48d   :  { %v1890_v32 = vadd.f32 %v1888_v15, %v1886_v20  ;;  %v1986_v15 = vsel %vm856_vm11, %v1960_v43, %v1975_v12  ;;  %v1988_v20 = vsel %vm856_vm11, %v1967_v45, %v1981_v42  ;;  %v1989_v18 = vsel %vm856_vm11, %v1971_v3, %v1984_v10 }
 0x48f   :  { %v1894_v30 = vadd.f32 %v1892_v26, %v1890_v32  ;;  %v2612_v26 = vld [vmem:[%s3768_s7 + $0x8] sm:$0xff] }
 0x490   :  { %2625 = vmatpush.bf16.msra.mxu3 %v2612_v26  ;;  %2084 = vmatpush.bf16.msra.mxu1 %v2612_v26 }
 0x492   :  { %v1896_v23 = vpop.permute.xlu1 %1895  ;;  %v1879_v24 = vpop.permute.xlu0 %1878 }
 0x493   :  { %v1898_v25 = vadd.f32 %v1896_v23, %v1894_v30  ;;  %v1881_v28 = vadd.f32 %v1879_v24, %v1877_v7 }
 0x495   :  { %v1902_v8 = vadd.f32 %v1900_v31, %v1898_v25  ;;  %v1910_v40 = vmul.f32 %v1909_v34, %v1881_v28 }
 0x497   :  { %v1911_v29 = vmul.f32 %v1909_v34, %v1902_v8  ;;  %v1912_v19 = vmul.f32 %v1910_v40, %v1910_v40  ;;  %v2611_v34 = vld [vmem:[%s3768_s7] sm:$0xff] }
 0x498   :  { %2626 = vmatpush.bf16.msra.mxu3 %v2611_v34  ;;  %2085 = vmatpush.bf16.msra.mxu1 %v2611_v34 }
 0x499   :  { %v1913_v16 = vsub.f32 %v1911_v29, %v1912_v19 }
 0x49b   :  { %v1915_v0 = vadd.f32 1e-05, %v1913_v16 }
 0x49d   :  { %2651 = vrsqrt.f32 %v1915_v0  ;;  %vm1922_vm0 = vweird.f32 %v1915_v0 }
 0x4a3   :  { %v2652_v58 = vpop.eup %2651 }
 0x4a4   :  { %v1917_v47 = vmul.f32 %v2652_v58, %v1915_v0  ;;  %vm1923_vm15 = vweird.f32 %v2652_v58 }
 0x4a5   :  { %vm1924_vm1 = vmor %vm1922_vm0, %vm1923_vm15 }
 0x4a6   :  { %v1918_v17 = vmul.f32 %v2652_v58, %v1917_v47 }
 0x4a8   :  { %v1919_v27 = vmul.f32 0.5, %v1918_v17 }
 0x4aa   :  { %v1920_v41 = vsub.f32 1.5, %v1919_v27 }
 0x4ac   :  { %v1921_v54 = vmul.f32 %v2652_v58, %v1920_v41 }
 0x4ae   :  { %v1925_v55 = vsel %vm1924_vm1, %v2652_v58, %v1921_v54 }
 0x4af   :  { %v1926_v56 = vmul.f32 %v1925_v55, %v1914_v53 }
 0x4b1   :  { %v1928_v52 = vmul.f32 %v1926_v56, %v1910_v40  ;;  %v1931_v57 = vperm.slane %v1926_v56, 0 }
 0x4b3   :  { %1938 = vrot.lane.b32.xlu2 %v1931_v57, %s2684_s29  ;;  %1935 = vrot.lane.b32.xlu1 %v1931_v57, %s2679_s9  ;;  %v1929_v60 = vsub.f32 %v1927_v59, %v1928_v52 }
 0x4b4   :  { %1932 = vrot.lane.b32.xlu0 %v1931_v57, %s2686_s12 }
 0x4b5   :  { %v1947_v49 = vperm.slane %v1929_v60, 0 }
 0x4bb   :  { %1954 = vrot.lane.b32.xlu2 %v1947_v49, %s2684_s29  ;;  %1951 = vrot.lane.b32.xlu1 %v1947_v49, %s2679_s9 }
 0x4bc   :  { %1948 = vrot.lane.b32.xlu0 %v1947_v49, %s2686_s12 }
 0x50d   :  { %v1939_v61 = vpop.permute.xlu2 %1938 }
 0x515   :  { %v1955_v33 = vpop.permute.xlu2 %1954 }
 0x525   :  { %v1936_v22 = vpop.permute.xlu1 %1935 }
 0x526   :  { %v1933_v1 = vpop.permute.xlu0 %1932 }
 0x527   :  { %v1942_v2 = vsel %vm1941_vm2, %v1926_v56, %v1933_v1 }
 0x528   :  { %v1943_v39 = vsel %vm306_vm4, %v1942_v2, %v1936_v22 }
 0x529   :  { %v1945_v48 = vsel %vm1944_vm3, %v1943_v39, %v1939_v61 }
 0x52a   :  { %v1990_v13 = vperm.slane %v1945_v48, 0 }
 0x52c   :  { %1992 = vrot.lane.b32.xlu0 %v1990_v13, %s2686_s12 }
 0x52d   :  { %v1952_v46 = vpop.permute.xlu1 %1951 }
 0x52e   :  { %v1949_v51 = vpop.permute.xlu0 %1948 }
 0x52f   :  { %v1957_v4 = vsel %vm1941_vm2, %v1929_v60, %v1949_v51 }
 0x530   :  { %v1958_v50 = vsel %vm306_vm4, %v1957_v4, %v1952_v46 }
 0x531   :  { %v1959_v6 = vsel %vm1944_vm3, %v1958_v50, %v1955_v33 }
 0x532   :  { %v1999_v37 = vperm.slane %v1959_v6, 0 }
 0x534   :  { %2001 = vrot.lane.b32.xlu1 %v1999_v37, %s2686_s12 }
 0x59e   :  { %v1993_v11 = vpop.permute.xlu0 %1992 }
 0x59f   :  { %v1995_v32 = vmul.f32 %v1993_v11, %v1986_v15  ;;  %v1996_v21 = vmul.f32 %v1993_v11, %v1987_v36  ;;  %v1997_v30 = vmul.f32 %v1993_v11, %v1988_v20  ;;  %v1998_v7 = vmul.f32 %v1993_v11, %v1989_v18 }
 0x5a6   :  { %v2002_v23 = vpop.permute.xlu1 %2001 }
 0x5a7   :  { %v2004_v24 = vadd.f32 %v2002_v23, %v1995_v32  ;;  %v2005_v25 = vadd.f32 %v2002_v23, %v1996_v21  ;;  %v2006_v28 = vadd.f32 %v2002_v23, %v1997_v30  ;;  %v2007_v31 = vadd.f32 %v2002_v23, %v1998_v7 }
 0x5a9   :  { %v2012_v8 = vmin.f32 %v2004_v24, 0.0  ;;  %v2013_v40 = vmin.f32 %v2005_v25, 0.0  ;;  %v2014_v29 = vmin.f32 %v2006_v28, 0.0  ;;  %v2015_v19 = vmin.f32 %v2007_v31, 0.0 }
 0x5aa   :  { %vm2008_vm6 = vcmp.gt.f32.partialorder %v2004_v24, 0.0  ;;  %vm2009_vm7 = vcmp.gt.f32.partialorder %v2005_v25, 0.0  ;;  %vm2010_vm8 = vcmp.gt.f32.partialorder %v2006_v28, 0.0  ;;  %vm2011_vm9 = vcmp.gt.f32.partialorder %v2007_v31, 0.0 }
 0x5ab   :  { %v2016_v16 = vmul.f32 1.442695, %v2012_v8  ;;  %v2018_v0 = vmul.f32 1.442695, %v2013_v40  ;;  %v2020_v58 = vmul.f32 1.442695, %v2014_v29 }
 0x5ac   :  { %v2022_v47 = vmul.f32 1.442695, %v2015_v19 }
 0x5ad   :  { %2653 = vpow2.f32 %v2016_v16 }
 0x5ae   :  { %2655 = vpow2.f32 %v2018_v0 }
 0x5af   :  { %2657 = vpow2.f32 %v2020_v58 }
 0x5b0   :  { %2659 = vpow2.f32 %v2022_v47 }
 0x5b3   :  { %v2654_v17 = vpop.eup %2653 }
 0x5b4   :  { %v2656_v27 = vpop.eup %2655  ;;  %v2513_v41 = vadd.f32 -1.0, %v2654_v17 }
 0x5b5   :  { %v2658_v53 = vpop.eup %2657  ;;  %v2514_v54 = vadd.f32 -1.0, %v2656_v27 }
 0x5b6   :  { %v2660_v55 = vpop.eup %2659  ;;  %v2515_v56 = vadd.f32 -1.0, %v2658_v53  ;;  %v2028_v52 = vsel %vm2008_vm6, %v2004_v24, %v2513_v41 }
 0x5b7   :  { %v2516_v57 = vadd.f32 -1.0, %v2660_v55  ;;  %v2029_v59 = vsel %vm2009_vm7, %v2005_v25, %v2514_v54 }
 0x5b8   :  { %v2030_v60 = vsel %vm2010_vm8, %v2006_v28, %v2515_v56  ;;  %v2032_v49 = vpack.c.bf16 %v2029_v59, %v2028_v52 }
 0x5b9   :  { %v2031_v22 = vsel %vm2011_vm9, %v2007_v31, %v2516_v57 }
 0x5ba   :  { %v2033_v61 = vpack.c.bf16 %v2031_v22, %v2030_v60  ;;  %2044 = vrot.lane.b32.xlu0 %v2032_v49, %s2682_s4 }
 0x5bc   :  { %2046 = vrot.lane.b32.xlu2 %v2033_v61, %s2682_s4 }
 0x616   :  { %v2047_v1 = vpop.permute.xlu2 %2046 }
 0x617   :  { %2534 = vmatmul.msk.bf16.vlgmr.msra.gmra.mxu3 %vm308_vm5, %v2047_v1 }
 0x62c   :  { %v2045_v2 = vpop.permute.xlu0 %2044 }
 0x62d   :  { %2533 = vmatmul.msk.bf16.vlgmr.msra.gmra.mxu1 %vm308_vm5, %v2045_v2 }
 0x69a   :  { %v2092_v39 = vpop.f32.mrf.mxu3 }
 0x69b   :  { %v2099_v48 = vand.u32 2147483647, %v2092_v39  ;;  %vm2115_vm13 = vcmp.ge.f32.partialorder %v2092_v39, 0.0 }
 0x69d   :  { %v2103_v13 = vsub.f32 0.0, %v2099_v48 }
 0x69f   :  { %v2109_v46 = vmul.f32 1.442695, %v2103_v13 }
 0x6a1   :  { %2661 = vpow2.f32 %v2109_v46 }
 0x6a2   :  { %v3733_v51 = vpop.f32.mrf.mxu3 }
 0x6a3   :  { %v2100_v4 = vand.u32 2147483647, %v3733_v51  ;;  %vm2116_vm2 = vcmp.ge.f32.partialorder %v3733_v51, 0.0 }
 0x6a5   :  { %v2104_v33 = vsub.f32 0.0, %v2100_v4 }
 0x6a7   :  { %v2662_v50 = vpop.eup %2661  ;;  %v2111_v6 = vmul.f32 1.442695, %v2104_v33 }
 0x6a8   :  { %v2119_v37 = vadd.f32 1.0, %v2662_v50 }
 0x6a9   :  { %2663 = vpow2.f32 %v2111_v6 }
 0x6aa   :  { %2665 = vrcp.f32 %v2119_v37  ;;  %v3736_v62 = vpop.f32.mrf.mxu1  ;;  %v2162_v12 = vand.u32 2147483648, %v2119_v37  ;;  %v2160_v26 = vand.u32 2147483647, %v2119_v37  ;;  %vm2156_vm10 = vweird.f32 %v2119_v37 }
 0x6ab   :  { %v2097_v38 = vand.u32 2147483647, %v3736_v62  ;;  %vm2113_vm9 = vcmp.ge.f32.partialorder %v3736_v62, 0.0 }
 0x6ac   :  { %v2163_v18 = vor.u32 1.1754944e-38, %v2162_v12  ;;  %vm2161_vm12 = vcmp.eq.f32.partialorder %v2160_v26, 8.507059e+37 }
 0x6ad   :  { %v2101_v35 = vsub.f32 0.0, %v2097_v38 }
 0x6af   :  { %v2664_v44 = vpop.eup %2663  ;;  %v2105_v9 = vmul.f32 1.442695, %v2101_v35 }
 0x6b0   :  { %v2666_v63 = vpop.eup %2665  ;;  %v2120_v5 = vadd.f32 1.0, %v2664_v44 }
 0x6b1   :  { %v2152_v10 = vmul.f32 %v2666_v63, %v2119_v37  ;;  %2667 = vpow2.f32 %v2105_v9  ;;  %vm2157_vm5 = vweird.f32 %v2666_v63 }
 0x6b2   :  { %2669 = vrcp.f32 %v2120_v5  ;;  %v3739_v43 = vpop.f32.mrf.mxu1  ;;  %vm2158_vm11 = vmor %vm2156_vm10, %vm2157_vm5  ;;  %v2177_v24 = vand.u32 2147483648, %v2120_v5  ;;  %v2175_v31 = vand.u32 2147483647, %v2120_v5  ;;  %vm2171_vm15 = vweird.f32 %v2120_v5 }
 0x6b3   :  { %v2153_v45 = vsub.f32 1.0, %v2152_v10  ;;  %v2098_v11 = vand.u32 2147483647, %v3739_v43 }
 0x6b4   :  { %v2178_v0 = vor.u32 1.1754944e-38, %v2177_v24  ;;  %vm2176_vm1 = vcmp.eq.f32.partialorder %v2175_v31, 8.507059e+37 }
 0x6b5   :  { %v2154_v42 = vmul.f32 %v2666_v63, %v2153_v45  ;;  %v2102_v14 = vsub.f32 0.0, %v2098_v11 }
 0x6b7   :  { %v2668_v3 = vpop.eup %2667  ;;  %v2155_v15 = vadd.f32 %v2666_v63, %v2154_v42  ;;  %v2107_v36 = vmul.f32 1.442695, %v2102_v14 }
 0x6b8   :  { %v2670_v20 = vpop.eup %2669  ;;  %v2117_v32 = vadd.f32 1.0, %v2668_v3 }
 0x6b9   :  { %v2159_v21 = vsel %vm2158_vm11, %v2666_v63, %v2155_v15  ;;  %v2167_v30 = vmul.f32 %v2670_v20, %v2120_v5  ;;  %2671 = vpow2.f32 %v2107_v36  ;;  %vm2172_vm14 = vweird.f32 %v2670_v20 }
 0x6ba   :  { %v2164_v7 = vsel %vm2161_vm12, %v2163_v18, %v2159_v21  ;;  %2673 = vrcp.f32 %v2117_v32  ;;  %vm2173_vm0 = vmor %vm2171_vm15, %vm2172_vm14  ;;  %v2132_v54 = vand.u32 2147483648, %v2117_v32  ;;  %v2130_v52 = vand.u32 2147483647, %v2117_v32 }
 0x6bb   :  { %v2183_v23 = vmul.f32 %v2662_v50, %v2164_v7  ;;  %v2168_v34 = vsub.f32 1.0, %v2167_v30  ;;  %vm2126_vm6 = vweird.f32 %v2117_v32 }
 0x6bc   :  { %v2133_v22 = vor.u32 1.1754944e-38, %v2132_v54  ;;  %vm2131_vm8 = vcmp.eq.f32.partialorder %v2130_v52, 8.507059e+37 }
 0x6bd   :  { %v2187_v25 = vsel %vm2115_vm13, %v2164_v7, %v2183_v23  ;;  %v2169_v28 = vmul.f32 %v2670_v20, %v2168_v34  ;;  %vm2114_vm13 = vcmp.ge.f32.partialorder %v3739_v43, 0.0 }
 0x6be   :  { %v2191_v8 = vmax.f32 %v2187_v25, 1e-07 }
 0x6bf   :  { %v2672_v40 = vpop.eup %2671  ;;  %v2170_v29 = vadd.f32 %v2670_v20, %v2169_v28 }
 0x6c0   :  { %v2674_v19 = vpop.eup %2673  ;;  %v2195_v16 = vmin.f32 %v2191_v8, 0.9999999  ;;  %v2118_v58 = vadd.f32 1.0, %v2672_v40 }
 0x6c1   :  { %v2174_v47 = vsel %vm2173_vm0, %v2670_v20, %v2170_v29  ;;  %v2122_v17 = vmul.f32 %v2674_v19, %v2117_v32  ;;  %vm2127_vm3 = vweird.f32 %v2674_v19 }
 0x6c2   :  { %2199 = vst.msk [vmem:[%s3769_s8 + $0x10] sm:$0xff] %vm306_vm4, %v2195_v16  ;;  %v2179_v27 = vsel %vm2176_vm1, %v2178_v0, %v2174_v47  ;;  %2675 = vrcp.f32 %v2118_v58  ;;  %vm2128_vm7 = vmor %vm2126_vm6, %vm2127_vm3  ;;  %v2147_v13 = vand.u32 2147483648, %v2118_v58  ;;  %v2145_v4 = vand.u32 2147483647, %v2118_v58 }
 0x6c3   :  { %v2184_v41 = vmul.f32 %v2664_v44, %v2179_v27  ;;  %v2123_v53 = vsub.f32 1.0, %v2122_v17  ;;  %vm2141_vm10 = vweird.f32 %v2118_v58 }
 0x6c4   :  { %v2148_v37 = vor.u32 1.1754944e-38, %v2147_v13  ;;  %vm2146_vm12 = vcmp.eq.f32.partialorder %v2145_v4, 8.507059e+37 }
 0x6c5   :  { %v2188_v55 = vsel %vm2116_vm2, %v2179_v27, %v2184_v41  ;;  %v2124_v56 = vmul.f32 %v2674_v19, %v2123_v53 }
 0x6c6   :  { %v2192_v57 = vmax.f32 %v2188_v55, 1e-07 }
 0x6c7   :  { %v2125_v59 = vadd.f32 %v2674_v19, %v2124_v56 }
 0x6c8   :  { %v2676_v60 = vpop.eup %2675  ;;  %v2196_v49 = vmin.f32 %v2192_v57, 0.9999999 }
 0x6c9   :  { %v2129_v61 = vsel %vm2128_vm7, %v2674_v19, %v2125_v59  ;;  %v2137_v1 = vmul.f32 %v2676_v60, %v2118_v58  ;;  %vm2142_vm5 = vweird.f32 %v2676_v60 }
 0x6ca   :  { %2200 = vst.msk [vmem:[%s3769_s8 + $0x18] sm:$0xff] %vm306_vm4, %v2196_v49  ;;  %v2134_v2 = vsel %vm2131_vm8, %v2133_v22, %v2129_v61  ;;  %vm2143_vm11 = vmor %vm2141_vm10, %vm2142_vm5 }
 0x6cb   :  { %v2181_v39 = vmul.f32 %v2668_v3, %v2134_v2  ;;  %v2138_v48 = vsub.f32 1.0, %v2137_v1 }
 0x6cd   :  { %v2185_v46 = vsel %vm2113_vm9, %v2134_v2, %v2181_v39  ;;  %v2139_v51 = vmul.f32 %v2676_v60, %v2138_v48 }
 0x6ce   :  { %v2189_v33 = vmax.f32 %v2185_v46, 1e-07 }
 0x6cf   :  { %v2140_v50 = vadd.f32 %v2676_v60, %v2139_v51 }
 0x6d0   :  { %v2193_v6 = vmin.f32 %v2189_v33, 0.9999999 }
 0x6d1   :  { %v2144_v38 = vsel %vm2143_vm11, %v2676_v60, %v2140_v50 }
 0x6d2   :  { %2197 = vst.msk [vmem:[%s3769_s8] sm:$0xff] %vm306_vm4, %v2193_v6  ;;  %v2149_v35 = vsel %vm2146_vm12, %v2148_v37, %v2144_v38 }
 0x6d3   :  { %v2182_v62 = vmul.f32 %v2672_v40, %v2149_v35 }
 0x6d5   :  { %v2186_v44 = vsel %vm2114_vm13, %v2149_v35, %v2182_v62 }
 0x6d6   :  { %v2190_v9 = vmax.f32 %v2186_v44, 1e-07 }
 0x6d8   :  { %v2194_v63 = vmin.f32 %v2190_v9, 0.9999999 }
 0x6da   :  { %2198 = vst.msk [vmem:[%s3769_s8 + $0x8] sm:$0xff] %vm306_vm4, %v2194_v63 }

</bundles_post_ra>
